<compile_context>
chip_gen: v6e
topology: v6e:2x2x1
jax: 0.10.0
libtpu: 0.0.40
codegen_flags: <defaults>
</compile_context>

<pallas_src>
import functools

import jax
import jax.numpy as jnp
from jax import lax
from jax.experimental import pallas as pl
from jax.experimental.pallas import tpu as pltpu

EPS = 1e-12          # F.normalize default eps
EPS2 = EPS * EPS     # compare against sum-of-squares (representable in f32)
FEAT_CHUNK = 1152    # 4608 / 4; multiple of 128 -> lane-aligned static slices


def _inv_norm(x_f32):
    """1 / max(||x||_2, eps) per row, computed in f32 (rsqrt on the EUP)."""
    sumsq = jnp.sum(x_f32 * x_f32, axis=-1, keepdims=True)
    return lax.rsqrt(jnp.maximum(sumsq, EPS2))


def maml_kernel(pu_ref, qi_ref, feat_ref,
                w1_ref, b1_ref, w2_ref, b2_ref, w3_ref, b3_ref, w4_ref, b4_ref,
                wa1u_ref, wa1i_ref, wa1f_ref, ba1_ref, wa2_ref, ba2_ref,
                qif_ref, dist_ref):
    f32 = jnp.float32
    bf16 = jnp.bfloat16
    pu = pu_ref[...].astype(f32)      # (T, D)
    qi = qi_ref[...].astype(f32)      # (T, D)
    T = pu.shape[0]
    feat_dim = feat_ref.shape[1]
    n_h1 = w1_ref.shape[1]

    # ---- feature_fusion layer 1: Norm -> Linear(4608,256) -> ReLU ----
    # norm(x) @ W == inv_norm(x) * (x @ W)  (inv_norm is a per-row scalar).
    # Both the squared-sum and x @ w1 are accumulated over K-chunks so no
    # full-width (T, 4608) temporary is materialized beyond the input block.
    sumsq = jnp.zeros((T, 1), f32)
    acc = jnp.zeros((T, n_h1), f32)
    for c in range(0, feat_dim, FEAT_CHUNK):        # static, unrolled (4 chunks)
        w = min(FEAT_CHUNK, feat_dim - c)
        xc = feat_ref[:, c:c + w]                   # streamed f32 chunk
        xf = xc.astype(f32)
        sumsq = sumsq + jnp.sum(xf * xf, axis=-1, keepdims=True)
        acc = acc + jnp.dot(xc.astype(bf16), w1_ref[c:c + w, :],
                            preferred_element_type=f32)
    inv = lax.rsqrt(jnp.maximum(sumsq, EPS2))
    h = jnp.maximum(inv * acc + b1_ref[...], 0.0)

    # ---- layers 2,3: (Norm, Linear, ReLU, Dropout=id) ----
    inv = _inv_norm(h)
    h = jnp.maximum(
        inv * jnp.dot(h.astype(bf16), w2_ref[...], preferred_element_type=f32)
        + b2_ref[...], 0.0)
    inv = _inv_norm(h)
    h = jnp.maximum(
        inv * jnp.dot(h.astype(bf16), w3_ref[...], preferred_element_type=f32)
        + b3_ref[...], 0.0)
    # ---- final Linear(128, D) -> Norm ----
    h = jnp.dot(h.astype(bf16), w4_ref[...], preferred_element_type=f32) + b4_ref[...]
    qif = h * _inv_norm(h)            # final NormalizeLayer
    qif_ref[...] = qif

    # ---- attention: Norm, Linear(3D,3D), Tanh, Drop, Norm, Linear(3D,D), ReLU ----
    # concat eliminated: cat @ wa1 = pu @ wa1_u + qi @ wa1_i + qif @ wa1_f
    inv_cat = lax.rsqrt(jnp.maximum(
        jnp.sum(pu * pu, axis=-1, keepdims=True)
        + jnp.sum(qi * qi, axis=-1, keepdims=True)
        + jnp.sum(qif * qif, axis=-1, keepdims=True), EPS2))
    s = (jnp.dot(pu.astype(bf16), wa1u_ref[...], preferred_element_type=f32)
         + jnp.dot(qi.astype(bf16), wa1i_ref[...], preferred_element_type=f32)
         + jnp.dot(qif.astype(bf16), wa1f_ref[...], preferred_element_type=f32))
    a = jnp.tanh(inv_cat * s + ba1_ref[...])                       # (T, 3D)
    inv_a = _inv_norm(a)
    z = jnp.maximum(
        inv_a * jnp.dot(a.astype(bf16), wa2_ref[...], preferred_element_type=f32)
        + ba2_ref[...], 0.0)                                        # (T, D)

    # ---- attention = embed_dim * softmax(z, dim=-1) ----
    d = qif.shape[-1]
    m = jnp.max(z, axis=-1, keepdims=True)
    e = jnp.exp(z - m)
    att = jnp.float32(d) * e * pl.reciprocal(
        jnp.sum(e, axis=-1, keepdims=True), approx=True)

    # ---- dist = sum((att*p_u - att*q_i)^2, -1) ----
    temp = att * (pu - qi)
    dist_ref[...] = jnp.sum(temp * temp, axis=-1, keepdims=True)


def _round_up(x, m):
    return (x + m - 1) // m * m


@functools.partial(jax.jit, static_argnames=("embed_dim", "tile_m"))
def maml_forward(user, item, item_feature, params, embed_dim, tile_m=512):
    """user: (B,) int32, item: (B, S) int32, item_feature: (B, S, 4608) float."""

    def embed_max_norm(table, idx):
        # nn.Embedding(max_norm=1.0): rows with norm > 1 are rescaled to norm 1
        rows = table[idx]
        nrm = jnp.sqrt(jnp.sum(rows * rows, axis=-1, keepdims=True))
        scale = jnp.where(nrm > 1.0, 1.0 / (nrm + 1e-7), 1.0)
        return rows * scale

    p_u = embed_max_norm(params["emb_user"], user)      # (B, D)
    q_i = embed_max_norm(params["emb_item"], item)      # (B, S, D)
    B, S, D = q_i.shape
    p_u_e = jnp.broadcast_to(p_u[:, None, :], (B, S, D))

    N = B * S
    tile = min(tile_m, _round_up(N, 8))      # keep row tiles a multiple of 8
    num_tiles = pl.cdiv(N, tile)
    n_pad = num_tiles * tile
    pad = n_pad - N

    pu2 = p_u_e.reshape(N, D).astype(jnp.float32)
    qi2 = q_i.reshape(N, D).astype(jnp.float32)
    if pad:  # only the two tiny (N, D) operands are padded; feat is NOT padded
        pu2 = jnp.pad(pu2, ((0, pad), (0, 0)))
        qi2 = jnp.pad(qi2, ((0, pad), (0, 0)))

    # item_feature streamed straight from HBM: no wrapper-side dtype cast or pad
    # (the reshape is a free view). bf16 cast happens inside the kernel; the
    # ragged last row-tile reads undefined rows which are sliced off below.
    feat2 = item_feature.reshape(N, -1)
    feat_dim = feat2.shape[-1]

    bf16 = jnp.bfloat16
    # split attention weight 1 into row blocks (replaces the 96-wide concat)
    wa1 = params["wa1"]
    wa1u = wa1[:D].astype(bf16)
    wa1i = wa1[D:2 * D].astype(bf16)
    wa1f = wa1[2 * D:].astype(bf16)

    args = (pu2, qi2, feat2,
            params["w1"].astype(bf16), params["b1"],
            params["w2"].astype(bf16), params["b2"],
            params["w3"].astype(bf16), params["b3"],
            params["w4"].astype(bf16), params["b4"],
            wa1u, wa1i, wa1f, params["ba1"],
            params["wa2"].astype(bf16), params["ba2"])

    def row_spec(rows, cols):
        return pl.BlockSpec((rows, cols), lambda i: (i, 0))

    def const_spec(shape):
        return pl.BlockSpec(shape, lambda i: (0, 0))   # weights stay VMEM-resident

    in_specs = ([row_spec(tile, D), row_spec(tile, D), row_spec(tile, feat_dim)]
                + [const_spec(a.shape) for a in args[3:]])

    # ~30 MB live at tile=512 (2x9.4 MB f32 feat buffers + bf16 w1 + temps):
    # 48 MiB fits v7x's 64 MiB physical VMEM; larger tiles (v5e/v6e) get more.
    vmem_limit = 48 * 1024 * 1024 if tile <= 512 else 100 * 1024 * 1024

    qif, dist = pl.pallas_call(
        maml_kernel,
        out_shape=(jax.ShapeDtypeStruct((n_pad, D), jnp.float32),
                   jax.ShapeDtypeStruct((n_pad, 1), jnp.float32)),
        grid=(num_tiles,),
        in_specs=in_specs,
        out_specs=(row_spec(tile, D), row_spec(tile, 1)),
        compiler_params=pltpu.CompilerParams(
            dimension_semantics=("parallel",),          # shard row tiles across TCs
            vmem_limit_bytes=vmem_limit),
    )(*args)

    q_i_feature = qif[:N].reshape(B, S, D)
    dist = dist[:N, 0].reshape(B, S)
    return p_u_e, q_i, q_i_feature, dist


def init_params(key, n_users, n_items, embed_dim):
    ks = iter(jax.random.split(key, 20))

    def linear(in_dim, out_dim):
        # PyTorch nn.Linear init: U(-1/sqrt(in), 1/sqrt(in)); stored transposed (in, out)
        bound = 1.0 / jnp.sqrt(jnp.float32(in_dim))
        w = jax.random.uniform(next(ks), (in_dim, out_dim), jnp.float32, -bound, bound)
        b = jax.random.uniform(next(ks), (1, out_dim), jnp.float32, -bound, bound)
        return w, b

    params = {}
    params["emb_user"] = jax.random.normal(next(ks), (n_users, embed_dim), jnp.float32)
    params["emb_item"] = jax.random.normal(next(ks), (n_items, embed_dim), jnp.float32)
    # feature_fusion linears: 4608->256->128->128->embed_dim
    params["w1"], params["b1"] = linear(4608, 256)
    params["w2"], params["b2"] = linear(256, 128)
    params["w3"], params["b3"] = linear(128, 128)
    params["w4"], params["b4"] = linear(128, embed_dim)
    # attention linears
    params["wa1"], params["ba1"] = linear(3 * embed_dim, 3 * embed_dim)
    params["wa2"], params["ba2"] = linear(3 * embed_dim, embed_dim)
    return params


if __name__ == "__main__":
    n_users, n_items, embed_dim = 10, 20, 32
    B, S, FEAT = 2, 8, 4608

    key = jax.random.PRNGKey(0)
    k_param, k_user, k_item, k_feat = jax.random.split(key, 4)

    params = init_params(k_param, n_users, n_items, embed_dim)
    user = jax.random.randint(k_user, (B,), 0, n_users, dtype=jnp.int32)
    item = jax.random.randint(k_item, (B, S), 0, n_items, dtype=jnp.int32)
    item_feature = jax.random.normal(k_feat, (B, S, FEAT), jnp.float32)

    p_u, q_i, q_i_feature, dist = maml_forward(
        user, item, item_feature, params, embed_dim)
    jax.block_until_ready((p_u, q_i, q_i_feature, dist))

    assert p_u.shape == (B, S, embed_dim)
    assert q_i.shape == (B, S, embed_dim)
    assert q_i_feature.shape == (B, S, embed_dim)
    assert dist.shape == (B, S)
    assert bool(jnp.all(jnp.isfinite(q_i_feature))) and bool(jnp.all(jnp.isfinite(dist)))
    print("KERNEL_OK")
</pallas_src>

<mosaic_0001>
module attributes {stable_mosaic.version = 11 : i64} {
  func.func @maml_kernel(%arg0: i32, %arg1: memref<16x32xf32, #tpu.memory_space<vmem>>, %arg2: memref<16x32xf32, #tpu.memory_space<vmem>>, %arg3: memref<16x4608xf32, #tpu.memory_space<vmem>>, %arg4: memref<4608x256xbf16, #tpu.memory_space<vmem>>, %arg5: memref<1x256xf32, #tpu.memory_space<vmem>>, %arg6: memref<256x128xbf16, #tpu.memory_space<vmem>>, %arg7: memref<1x128xf32, #tpu.memory_space<vmem>>, %arg8: memref<128x128xbf16, #tpu.memory_space<vmem>>, %arg9: memref<1x128xf32, #tpu.memory_space<vmem>>, %arg10: memref<128x32xbf16, #tpu.memory_space<vmem>>, %arg11: memref<1x32xf32, #tpu.memory_space<vmem>>, %arg12: memref<32x96xbf16, #tpu.memory_space<vmem>>, %arg13: memref<32x96xbf16, #tpu.memory_space<vmem>>, %arg14: memref<32x96xbf16, #tpu.memory_space<vmem>>, %arg15: memref<1x96xf32, #tpu.memory_space<vmem>>, %arg16: memref<96x32xbf16, #tpu.memory_space<vmem>>, %arg17: memref<1x32xf32, #tpu.memory_space<vmem>>, %arg18: memref<16x32xf32, #tpu.memory_space<vmem>>, %arg19: memref<16x1xf32, #tpu.memory_space<vmem>>) attributes {dimension_semantics = [#tpu.dimension_semantics<parallel>], iteration_bounds = array<i64: 1>, scalar_prefetch = 0 : i64, scratch_operands = 0 : i64, tpu.core_type = #tpu.core_type<tc>, window_params = [{transform_indices = @transform_0, window_bounds = array<i64: 16, 32>}, {transform_indices = @transform_1, window_bounds = array<i64: 16, 32>}, {transform_indices = @transform_2, window_bounds = array<i64: 16, 4608>}, {pipeline_mode = #tpu.pipeline_mode<synchronous>, transform_indices = @transform_3, window_bounds = array<i64: 4608, 256>}, {pipeline_mode = #tpu.pipeline_mode<synchronous>, transform_indices = @transform_4, window_bounds = array<i64: 1, 256>}, {pipeline_mode = #tpu.pipeline_mode<synchronous>, transform_indices = @transform_5, window_bounds = array<i64: 256, 128>}, {pipeline_mode = #tpu.pipeline_mode<synchronous>, transform_indices = @transform_6, window_bounds = array<i64: 1, 128>}, {pipeline_mode = #tpu.pipeline_mode<synchronous>, transform_indices = @transform_7, window_bounds = array<i64: 128, 128>}, {pipeline_mode = #tpu.pipeline_mode<synchronous>, transform_indices = @transform_8, window_bounds = array<i64: 1, 128>}, {pipeline_mode = #tpu.pipeline_mode<synchronous>, transform_indices = @transform_9, window_bounds = array<i64: 128, 32>}, {pipeline_mode = #tpu.pipeline_mode<synchronous>, transform_indices = @transform_10, window_bounds = array<i64: 1, 32>}, {pipeline_mode = #tpu.pipeline_mode<synchronous>, transform_indices = @transform_11, window_bounds = array<i64: 32, 96>}, {pipeline_mode = #tpu.pipeline_mode<synchronous>, transform_indices = @transform_12, window_bounds = array<i64: 32, 96>}, {pipeline_mode = #tpu.pipeline_mode<synchronous>, transform_indices = @transform_13, window_bounds = array<i64: 32, 96>}, {pipeline_mode = #tpu.pipeline_mode<synchronous>, transform_indices = @transform_14, window_bounds = array<i64: 1, 96>}, {pipeline_mode = #tpu.pipeline_mode<synchronous>, transform_indices = @transform_15, window_bounds = array<i64: 96, 32>}, {pipeline_mode = #tpu.pipeline_mode<synchronous>, transform_indices = @transform_16, window_bounds = array<i64: 1, 32>}, {transform_indices = @transform_17, window_bounds = array<i64: 16, 32>}, {transform_indices = @transform_18, window_bounds = array<i64: 16, 1>}]} {
    %c0 = arith.constant 0 : index
    %c0_0 = arith.constant 0 : index
    %0 = vector.load %arg1[%c0, %c0_0] : memref<16x32xf32, #tpu.memory_space<vmem>>, vector<16x32xf32>
    %c0_1 = arith.constant 0 : index
    %c0_2 = arith.constant 0 : index
    %1 = vector.load %arg2[%c0_1, %c0_2] : memref<16x32xf32, #tpu.memory_space<vmem>>, vector<16x32xf32>
    %cst = arith.constant 0.000000e+00 : f32
    %2 = vector.broadcast %cst : f32 to vector<16x1xf32>
    %cst_3 = arith.constant 0.000000e+00 : f32
    %3 = vector.broadcast %cst_3 : f32 to vector<16x256xf32>
    %c0_4 = arith.constant 0 : index
    %c0_5 = arith.constant 0 : index
    %4 = vector.load %arg3[%c0_4, %c0_5] : memref<16x4608xf32, #tpu.memory_space<vmem>>, vector<16x1152xf32>
    %5 = arith.mulf %4, %4 : vector<16x1152xf32>
    %cst_6 = arith.constant dense<0.000000e+00> : vector<16xf32>
    %6 = vector.multi_reduction <add>, %5, %cst_6 [1] : vector<16x1152xf32> to vector<16xf32>
    %7 = vector.shape_cast %6 : vector<16xf32> to vector<16x1xf32>
    %8 = arith.addf %2, %7 : vector<16x1xf32>
    %9 = arith.truncf %4 : vector<16x1152xf32> to vector<16x1152xbf16>
    %c0_7 = arith.constant 0 : index
    %c0_8 = arith.constant 0 : index
    %10 = vector.load %arg4[%c0_7, %c0_8] : memref<4608x256xbf16, #tpu.memory_space<vmem>>, vector<1152x256xbf16>
    %cst_9 = arith.constant dense<0.000000e+00> : vector<16x256xf32>
    %11 = tpu.matmul %9, %10, %cst_9 {dimension_numbers = #tpu.dot_dimension_numbers<[1], [0], [0], [1], [0, 0, 1, 1], [], []>} : vector<16x1152xbf16>, vector<1152x256xbf16>, vector<16x256xf32> -> vector<16x256xf32>
    %12 = arith.addf %3, %11 : vector<16x256xf32>
    %c0_10 = arith.constant 0 : index
    %c1152 = arith.constant 1152 : index
    %13 = vector.load %arg3[%c0_10, %c1152] : memref<16x4608xf32, #tpu.memory_space<vmem>>, vector<16x1152xf32>
    %14 = arith.mulf %13, %13 : vector<16x1152xf32>
    %cst_11 = arith.constant dense<0.000000e+00> : vector<16xf32>
    %15 = vector.multi_reduction <add>, %14, %cst_11 [1] : vector<16x1152xf32> to vector<16xf32>
    %16 = vector.shape_cast %15 : vector<16xf32> to vector<16x1xf32>
    %17 = arith.addf %8, %16 : vector<16x1xf32>
    %18 = arith.truncf %13 : vector<16x1152xf32> to vector<16x1152xbf16>
    %c1152_12 = arith.constant 1152 : index
    %c0_13 = arith.constant 0 : index
    %19 = vector.load %arg4[%c1152_12, %c0_13] : memref<4608x256xbf16, #tpu.memory_space<vmem>>, vector<1152x256xbf16>
    %cst_14 = arith.constant dense<0.000000e+00> : vector<16x256xf32>
    %20 = tpu.matmul %18, %19, %cst_14 {dimension_numbers = #tpu.dot_dimension_numbers<[1], [0], [0], [1], [0, 0, 1, 1], [], []>} : vector<16x1152xbf16>, vector<1152x256xbf16>, vector<16x256xf32> -> vector<16x256xf32>
    %21 = arith.addf %12, %20 : vector<16x256xf32>
    %c0_15 = arith.constant 0 : index
    %c2304 = arith.constant 2304 : index
    %22 = vector.load %arg3[%c0_15, %c2304] : memref<16x4608xf32, #tpu.memory_space<vmem>>, vector<16x1152xf32>
    %23 = arith.mulf %22, %22 : vector<16x1152xf32>
    %cst_16 = arith.constant dense<0.000000e+00> : vector<16xf32>
    %24 = vector.multi_reduction <add>, %23, %cst_16 [1] : vector<16x1152xf32> to vector<16xf32>
    %25 = vector.shape_cast %24 : vector<16xf32> to vector<16x1xf32>
    %26 = arith.addf %17, %25 : vector<16x1xf32>
    %27 = arith.truncf %22 : vector<16x1152xf32> to vector<16x1152xbf16>
    %c2304_17 = arith.constant 2304 : index
    %c0_18 = arith.constant 0 : index
    %28 = vector.load %arg4[%c2304_17, %c0_18] : memref<4608x256xbf16, #tpu.memory_space<vmem>>, vector<1152x256xbf16>
    %cst_19 = arith.constant dense<0.000000e+00> : vector<16x256xf32>
    %29 = tpu.matmul %27, %28, %cst_19 {dimension_numbers = #tpu.dot_dimension_numbers<[1], [0], [0], [1], [0, 0, 1, 1], [], []>} : vector<16x1152xbf16>, vector<1152x256xbf16>, vector<16x256xf32> -> vector<16x256xf32>
    %30 = arith.addf %21, %29 : vector<16x256xf32>
    %c0_20 = arith.constant 0 : index
    %c3456 = arith.constant 3456 : index
    %31 = vector.load %arg3[%c0_20, %c3456] : memref<16x4608xf32, #tpu.memory_space<vmem>>, vector<16x1152xf32>
    %32 = arith.mulf %31, %31 : vector<16x1152xf32>
    %cst_21 = arith.constant dense<0.000000e+00> : vector<16xf32>
    %33 = vector.multi_reduction <add>, %32, %cst_21 [1] : vector<16x1152xf32> to vector<16xf32>
    %34 = vector.shape_cast %33 : vector<16xf32> to vector<16x1xf32>
    %35 = arith.addf %26, %34 : vector<16x1xf32>
    %36 = arith.truncf %31 : vector<16x1152xf32> to vector<16x1152xbf16>
    %c3456_22 = arith.constant 3456 : index
    %c0_23 = arith.constant 0 : index
    %37 = vector.load %arg4[%c3456_22, %c0_23] : memref<4608x256xbf16, #tpu.memory_space<vmem>>, vector<1152x256xbf16>
    %cst_24 = arith.constant dense<0.000000e+00> : vector<16x256xf32>
    %38 = tpu.matmul %36, %37, %cst_24 {dimension_numbers = #tpu.dot_dimension_numbers<[1], [0], [0], [1], [0, 0, 1, 1], [], []>} : vector<16x1152xbf16>, vector<1152x256xbf16>, vector<16x256xf32> -> vector<16x256xf32>
    %39 = arith.addf %30, %38 : vector<16x256xf32>
    %cst_25 = arith.constant 1.000000e-24 : f32
    %40 = vector.broadcast %cst_25 : f32 to vector<16x1xf32>
    %41 = arith.maximumf %35, %40 : vector<16x1xf32>
    %42 = math.rsqrt %41 : vector<16x1xf32>
    %43 = vector.broadcast %42 : vector<16x1xf32> to vector<16x256xf32>
    %44 = arith.mulf %43, %39 : vector<16x256xf32>
    %c0_26 = arith.constant 0 : index
    %c0_27 = arith.constant 0 : index
    %45 = vector.load %arg5[%c0_26, %c0_27] : memref<1x256xf32, #tpu.memory_space<vmem>>, vector<1x256xf32>
    %46 = vector.broadcast %45 : vector<1x256xf32> to vector<16x256xf32>
    %47 = arith.addf %44, %46 : vector<16x256xf32>
    %cst_28 = arith.constant 0.000000e+00 : f32
    %48 = vector.broadcast %cst_28 : f32 to vector<16x256xf32>
    %49 = arith.maximumf %47, %48 : vector<16x256xf32>
    %50 = arith.mulf %49, %49 : vector<16x256xf32>
    %cst_29 = arith.constant dense<0.000000e+00> : vector<16xf32>
    %51 = vector.multi_reduction <add>, %50, %cst_29 [1] : vector<16x256xf32> to vector<16xf32>
    %52 = vector.shape_cast %51 : vector<16xf32> to vector<16x1xf32>
    %cst_30 = arith.constant 1.000000e-24 : f32
    %53 = vector.broadcast %cst_30 : f32 to vector<16x1xf32>
    %54 = arith.maximumf %52, %53 : vector<16x1xf32>
    %55 = math.rsqrt %54 : vector<16x1xf32>
    %56 = arith.truncf %49 : vector<16x256xf32> to vector<16x256xbf16>
    %c0_31 = arith.constant 0 : index
    %c0_32 = arith.constant 0 : index
    %57 = vector.load %arg6[%c0_31, %c0_32] : memref<256x128xbf16, #tpu.memory_space<vmem>>, vector<256x128xbf16>
    %cst_33 = arith.constant dense<0.000000e+00> : vector<16x128xf32>
    %58 = tpu.matmul %56, %57, %cst_33 {dimension_numbers = #tpu.dot_dimension_numbers<[1], [0], [0], [1], [0, 0, 1, 1], [], []>} : vector<16x256xbf16>, vector<256x128xbf16>, vector<16x128xf32> -> vector<16x128xf32>
    %59 = vector.broadcast %55 : vector<16x1xf32> to vector<16x128xf32>
    %60 = arith.mulf %59, %58 : vector<16x128xf32>
    %c0_34 = arith.constant 0 : index
    %c0_35 = arith.constant 0 : index
    %61 = vector.load %arg7[%c0_34, %c0_35] : memref<1x128xf32, #tpu.memory_space<vmem>>, vector<1x128xf32>
    %62 = vector.broadcast %61 : vector<1x128xf32> to vector<16x128xf32>
    %63 = arith.addf %60, %62 : vector<16x128xf32>
    %cst_36 = arith.constant 0.000000e+00 : f32
    %64 = vector.broadcast %cst_36 : f32 to vector<16x128xf32>
    %65 = arith.maximumf %63, %64 : vector<16x128xf32>
    %66 = arith.mulf %65, %65 : vector<16x128xf32>
    %cst_37 = arith.constant dense<0.000000e+00> : vector<16xf32>
    %67 = vector.multi_reduction <add>, %66, %cst_37 [1] : vector<16x128xf32> to vector<16xf32>
    %68 = vector.shape_cast %67 : vector<16xf32> to vector<16x1xf32>
    %cst_38 = arith.constant 1.000000e-24 : f32
    %69 = vector.broadcast %cst_38 : f32 to vector<16x1xf32>
    %70 = arith.maximumf %68, %69 : vector<16x1xf32>
    %71 = math.rsqrt %70 : vector<16x1xf32>
    %72 = arith.truncf %65 : vector<16x128xf32> to vector<16x128xbf16>
    %c0_39 = arith.constant 0 : index
    %c0_40 = arith.constant 0 : index
    %73 = vector.load %arg8[%c0_39, %c0_40] : memref<128x128xbf16, #tpu.memory_space<vmem>>, vector<128x128xbf16>
    %cst_41 = arith.constant dense<0.000000e+00> : vector<16x128xf32>
    %74 = tpu.matmul %72, %73, %cst_41 {dimension_numbers = #tpu.dot_dimension_numbers<[1], [0], [0], [1], [0, 0, 1, 1], [], []>} : vector<16x128xbf16>, vector<128x128xbf16>, vector<16x128xf32> -> vector<16x128xf32>
    %75 = vector.broadcast %71 : vector<16x1xf32> to vector<16x128xf32>
    %76 = arith.mulf %75, %74 : vector<16x128xf32>
    %c0_42 = arith.constant 0 : index
    %c0_43 = arith.constant 0 : index
    %77 = vector.load %arg9[%c0_42, %c0_43] : memref<1x128xf32, #tpu.memory_space<vmem>>, vector<1x128xf32>
    %78 = vector.broadcast %77 : vector<1x128xf32> to vector<16x128xf32>
    %79 = arith.addf %76, %78 : vector<16x128xf32>
    %cst_44 = arith.constant 0.000000e+00 : f32
    %80 = vector.broadcast %cst_44 : f32 to vector<16x128xf32>
    %81 = arith.maximumf %79, %80 : vector<16x128xf32>
    %82 = arith.truncf %81 : vector<16x128xf32> to vector<16x128xbf16>
    %c0_45 = arith.constant 0 : index
    %c0_46 = arith.constant 0 : index
    %83 = vector.load %arg10[%c0_45, %c0_46] : memref<128x32xbf16, #tpu.memory_space<vmem>>, vector<128x32xbf16>
    %cst_47 = arith.constant dense<0.000000e+00> : vector<16x32xf32>
    %84 = tpu.matmul %82, %83, %cst_47 {dimension_numbers = #tpu.dot_dimension_numbers<[1], [0], [0], [1], [0, 0, 1, 1], [], []>} : vector<16x128xbf16>, vector<128x32xbf16>, vector<16x32xf32> -> vector<16x32xf32>
    %c0_48 = arith.constant 0 : index
    %c0_49 = arith.constant 0 : index
    %85 = vector.load %arg11[%c0_48, %c0_49] : memref<1x32xf32, #tpu.memory_space<vmem>>, vector<1x32xf32>
    %86 = vector.broadcast %85 : vector<1x32xf32> to vector<16x32xf32>
    %87 = arith.addf %84, %86 : vector<16x32xf32>
    %88 = arith.mulf %87, %87 : vector<16x32xf32>
    %cst_50 = arith.constant dense<0.000000e+00> : vector<16xf32>
    %89 = vector.multi_reduction <add>, %88, %cst_50 [1] : vector<16x32xf32> to vector<16xf32>
    %90 = vector.shape_cast %89 : vector<16xf32> to vector<16x1xf32>
    %cst_51 = arith.constant 1.000000e-24 : f32
    %91 = vector.broadcast %cst_51 : f32 to vector<16x1xf32>
    %92 = arith.maximumf %90, %91 : vector<16x1xf32>
    %93 = math.rsqrt %92 : vector<16x1xf32>
    %94 = vector.broadcast %93 : vector<16x1xf32> to vector<16x32xf32>
    %95 = arith.mulf %87, %94 : vector<16x32xf32>
    %c0_52 = arith.constant 0 : index
    %c0_53 = arith.constant 0 : index
    %96 = vector.load %arg18[%c0_52, %c0_53] : memref<16x32xf32, #tpu.memory_space<vmem>>, vector<16x32xf32>
    tpu.vector_store %arg18[%c0_52, %c0_53], %95 {strides = array<i32>} : memref<16x32xf32, #tpu.memory_space<vmem>>, vector<16x32xf32>,
    %97 = arith.mulf %0, %0 : vector<16x32xf32>
    %cst_54 = arith.constant dense<0.000000e+00> : vector<16xf32>
    %98 = vector.multi_reduction <add>, %97, %cst_54 [1] : vector<16x32xf32> to vector<16xf32>
    %99 = vector.shape_cast %98 : vector<16xf32> to vector<16x1xf32>
    %100 = arith.mulf %1, %1 : vector<16x32xf32>
    %cst_55 = arith.constant dense<0.000000e+00> : vector<16xf32>
    %101 = vector.multi_reduction <add>, %100, %cst_55 [1] : vector<16x32xf32> to vector<16xf32>
    %102 = vector.shape_cast %101 : vector<16xf32> to vector<16x1xf32>
    %103 = arith.addf %99, %102 : vector<16x1xf32>
    %104 = arith.mulf %95, %95 : vector<16x32xf32>
    %cst_56 = arith.constant dense<0.000000e+00> : vector<16xf32>
    %105 = vector.multi_reduction <add>, %104, %cst_56 [1] : vector<16x32xf32> to vector<16xf32>
    %106 = vector.shape_cast %105 : vector<16xf32> to vector<16x1xf32>
    %107 = arith.addf %103, %106 : vector<16x1xf32>
    %cst_57 = arith.constant 1.000000e-24 : f32
    %108 = vector.broadcast %cst_57 : f32 to vector<16x1xf32>
    %109 = arith.maximumf %107, %108 : vector<16x1xf32>
    %110 = math.rsqrt %109 : vector<16x1xf32>
    %111 = arith.truncf %0 : vector<16x32xf32> to vector<16x32xbf16>
    %c0_58 = arith.constant 0 : index
    %c0_59 = arith.constant 0 : index
    %112 = vector.load %arg12[%c0_58, %c0_59] : memref<32x96xbf16, #tpu.memory_space<vmem>>, vector<32x96xbf16>
    %cst_60 = arith.constant dense<0.000000e+00> : vector<16x96xf32>
    %113 = tpu.matmul %111, %112, %cst_60 {dimension_numbers = #tpu.dot_dimension_numbers<[1], [0], [0], [1], [0, 0, 1, 1], [], []>} : vector<16x32xbf16>, vector<32x96xbf16>, vector<16x96xf32> -> vector<16x96xf32>
    %114 = arith.truncf %1 : vector<16x32xf32> to vector<16x32xbf16>
    %c0_61 = arith.constant 0 : index
    %c0_62 = arith.constant 0 : index
    %115 = vector.load %arg13[%c0_61, %c0_62] : memref<32x96xbf16, #tpu.memory_space<vmem>>, vector<32x96xbf16>
    %cst_63 = arith.constant dense<0.000000e+00> : vector<16x96xf32>
    %116 = tpu.matmul %114, %115, %cst_63 {dimension_numbers = #tpu.dot_dimension_numbers<[1], [0], [0], [1], [0, 0, 1, 1], [], []>} : vector<16x32xbf16>, vector<32x96xbf16>, vector<16x96xf32> -> vector<16x96xf32>
    %117 = arith.addf %113, %116 : vector<16x96xf32>
    %118 = arith.truncf %95 : vector<16x32xf32> to vector<16x32xbf16>
    %c0_64 = arith.constant 0 : index
    %c0_65 = arith.constant 0 : index
    %119 = vector.load %arg14[%c0_64, %c0_65] : memref<32x96xbf16, #tpu.memory_space<vmem>>, vector<32x96xbf16>
    %cst_66 = arith.constant dense<0.000000e+00> : vector<16x96xf32>
    %120 = tpu.matmul %118, %119, %cst_66 {dimension_numbers = #tpu.dot_dimension_numbers<[1], [0], [0], [1], [0, 0, 1, 1], [], []>} : vector<16x32xbf16>, vector<32x96xbf16>, vector<16x96xf32> -> vector<16x96xf32>
    %121 = arith.addf %117, %120 : vector<16x96xf32>
    %122 = vector.broadcast %110 : vector<16x1xf32> to vector<16x96xf32>
    %123 = arith.mulf %122, %121 : vector<16x96xf32>
    %c0_67 = arith.constant 0 : index
    %c0_68 = arith.constant 0 : index
    %124 = vector.load %arg15[%c0_67, %c0_68] : memref<1x96xf32, #tpu.memory_space<vmem>>, vector<1x96xf32>
    %125 = vector.broadcast %124 : vector<1x96xf32> to vector<16x96xf32>
    %126 = arith.addf %123, %125 : vector<16x96xf32>
    %127 = math.tanh %126 : vector<16x96xf32>
    %128 = arith.mulf %127, %127 : vector<16x96xf32>
    %cst_69 = arith.constant dense<0.000000e+00> : vector<16xf32>
    %129 = vector.multi_reduction <add>, %128, %cst_69 [1] : vector<16x96xf32> to vector<16xf32>
    %130 = vector.shape_cast %129 : vector<16xf32> to vector<16x1xf32>
    %cst_70 = arith.constant 1.000000e-24 : f32
    %131 = vector.broadcast %cst_70 : f32 to vector<16x1xf32>
    %132 = arith.maximumf %130, %131 : vector<16x1xf32>
    %133 = math.rsqrt %132 : vector<16x1xf32>
    %134 = arith.truncf %127 : vector<16x96xf32> to vector<16x96xbf16>
    %c0_71 = arith.constant 0 : index
    %c0_72 = arith.constant 0 : index
    %135 = vector.load %arg16[%c0_71, %c0_72] : memref<96x32xbf16, #tpu.memory_space<vmem>>, vector<96x32xbf16>
    %cst_73 = arith.constant dense<0.000000e+00> : vector<16x32xf32>
    %136 = tpu.matmul %134, %135, %cst_73 {dimension_numbers = #tpu.dot_dimension_numbers<[1], [0], [0], [1], [0, 0, 1, 1], [], []>} : vector<16x96xbf16>, vector<96x32xbf16>, vector<16x32xf32> -> vector<16x32xf32>
    %137 = vector.broadcast %133 : vector<16x1xf32> to vector<16x32xf32>
    %138 = arith.mulf %137, %136 : vector<16x32xf32>
    %c0_74 = arith.constant 0 : index
    %c0_75 = arith.constant 0 : index
    %139 = vector.load %arg17[%c0_74, %c0_75] : memref<1x32xf32, #tpu.memory_space<vmem>>, vector<1x32xf32>
    %140 = vector.broadcast %139 : vector<1x32xf32> to vector<16x32xf32>
    %141 = arith.addf %138, %140 : vector<16x32xf32>
    %cst_76 = arith.constant 0.000000e+00 : f32
    %142 = vector.broadcast %cst_76 : f32 to vector<16x32xf32>
    %143 = arith.maximumf %141, %142 : vector<16x32xf32>
    %cst_77 = arith.constant dense<0xFF800000> : vector<16xf32>
    %144 = vector.multi_reduction <maximumf>, %143, %cst_77 [1] : vector<16x32xf32> to vector<16xf32>
    %145 = vector.shape_cast %144 : vector<16xf32> to vector<16x1xf32>
    %146 = vector.broadcast %145 : vector<16x1xf32> to vector<16x32xf32>
    %147 = arith.subf %143, %146 : vector<16x32xf32>
    %148 = math.exp %147 : vector<16x32xf32>
    %cst_78 = arith.constant 3.200000e+01 : f32
    %149 = vector.broadcast %cst_78 : f32 to vector<16x32xf32>
    %150 = arith.mulf %149, %148 : vector<16x32xf32>
    %cst_79 = arith.constant dense<0.000000e+00> : vector<16xf32>
    %151 = vector.multi_reduction <add>, %148, %cst_79 [1] : vector<16x32xf32> to vector<16xf32>
    %152 = vector.shape_cast %151 : vector<16xf32> to vector<16x1xf32>
    %153 = tpu.reciprocal %152 {approx = true} : vector<16x1xf32> -> vector<16x1xf32>
    %154 = vector.broadcast %153 : vector<16x1xf32> to vector<16x32xf32>
    %155 = arith.mulf %150, %154 : vector<16x32xf32>
    %156 = arith.subf %0, %1 : vector<16x32xf32>
    %157 = arith.mulf %155, %156 : vector<16x32xf32>
    %158 = arith.mulf %157, %157 : vector<16x32xf32>
    %cst_80 = arith.constant dense<0.000000e+00> : vector<16xf32>
    %159 = vector.multi_reduction <add>, %158, %cst_80 [1] : vector<16x32xf32> to vector<16xf32>
    %160 = vector.shape_cast %159 : vector<16xf32> to vector<16x1xf32>
    %c0_81 = arith.constant 0 : index
    %c0_82 = arith.constant 0 : index
    %161 = vector.load %arg19[%c0_81, %c0_82] : memref<16x1xf32, #tpu.memory_space<vmem>>, vector<16x1xf32>
    tpu.vector_store %arg19[%c0_81, %c0_82], %160 {strides = array<i32>} : memref<16x1xf32, #tpu.memory_space<vmem>>, vector<16x1xf32>,
    return
  }
  func.func @transform_0(%arg0: i32) -> (i32, i32) {
    %c0_i32 = arith.constant 0 : i32
    %c0_i32_0 = arith.constant 0 : i32
    return %arg0, %c0_i32 : i32, i32
  }
  func.func @transform_1(%arg0: i32) -> (i32, i32) {
    %c0_i32 = arith.constant 0 : i32
    %c0_i32_0 = arith.constant 0 : i32
    return %arg0, %c0_i32 : i32, i32
  }
  func.func @transform_2(%arg0: i32) -> (i32, i32) {
    %c0_i32 = arith.constant 0 : i32
    %c0_i32_0 = arith.constant 0 : i32
    return %arg0, %c0_i32 : i32, i32
  }
  func.func @transform_3(%arg0: i32) -> (i32, i32) {
    %c0_i32 = arith.constant 0 : i32
    %c0_i32_0 = arith.constant 0 : i32
    %c0_i32_1 = arith.constant 0 : i32
    return %c0_i32, %c0_i32_0 : i32, i32
  }
  func.func @transform_4(%arg0: i32) -> (i32, i32) {
    %c0_i32 = arith.constant 0 : i32
    %c0_i32_0 = arith.constant 0 : i32
    %c0_i32_1 = arith.constant 0 : i32
    return %c0_i32, %c0_i32_0 : i32, i32
  }
  func.func @transform_5(%arg0: i32) -> (i32, i32) {
    %c0_i32 = arith.constant 0 : i32
    %c0_i32_0 = arith.constant 0 : i32
    %c0_i32_1 = arith.constant 0 : i32
    return %c0_i32, %c0_i32_0 : i32, i32
  }
  func.func @transform_6(%arg0: i32) -> (i32, i32) {
    %c0_i32 = arith.constant 0 : i32
    %c0_i32_0 = arith.constant 0 : i32
    %c0_i32_1 = arith.constant 0 : i32
    return %c0_i32, %c0_i32_0 : i32, i32
  }
  func.func @transform_7(%arg0: i32) -> (i32, i32) {
    %c0_i32 = arith.constant 0 : i32
    %c0_i32_0 = arith.constant 0 : i32
    %c0_i32_1 = arith.constant 0 : i32
    return %c0_i32, %c0_i32_0 : i32, i32
  }
  func.func @transform_8(%arg0: i32) -> (i32, i32) {
    %c0_i32 = arith.constant 0 : i32
    %c0_i32_0 = arith.constant 0 : i32
    %c0_i32_1 = arith.constant 0 : i32
    return %c0_i32, %c0_i32_0 : i32, i32
  }
  func.func @transform_9(%arg0: i32) -> (i32, i32) {
    %c0_i32 = arith.constant 0 : i32
    %c0_i32_0 = arith.constant 0 : i32
    %c0_i32_1 = arith.constant 0 : i32
    return %c0_i32, %c0_i32_0 : i32, i32
  }
  func.func @transform_10(%arg0: i32) -> (i32, i32) {
    %c0_i32 = arith.constant 0 : i32
    %c0_i32_0 = arith.constant 0 : i32
    %c0_i32_1 = arith.constant 0 : i32
    return %c0_i32, %c0_i32_0 : i32, i32
  }
  func.func @transform_11(%arg0: i32) -> (i32, i32) {
    %c0_i32 = arith.constant 0 : i32
    %c0_i32_0 = arith.constant 0 : i32
    %c0_i32_1 = arith.constant 0 : i32
    return %c0_i32, %c0_i32_0 : i32, i32
  }
  func.func @transform_12(%arg0: i32) -> (i32, i32) {
    %c0_i32 = arith.constant 0 : i32
    %c0_i32_0 = arith.constant 0 : i32
    %c0_i32_1 = arith.constant 0 : i32
    return %c0_i32, %c0_i32_0 : i32, i32
  }
  func.func @transform_13(%arg0: i32) -> (i32, i32) {
    %c0_i32 = arith.constant 0 : i32
    %c0_i32_0 = arith.constant 0 : i32
    %c0_i32_1 = arith.constant 0 : i32
    return %c0_i32, %c0_i32_0 : i32, i32
  }
  func.func @transform_14(%arg0: i32) -> (i32, i32) {
    %c0_i32 = arith.constant 0 : i32
    %c0_i32_0 = arith.constant 0 : i32
    %c0_i32_1 = arith.constant 0 : i32
    return %c0_i32, %c0_i32_0 : i32, i32
  }
  func.func @transform_15(%arg0: i32) -> (i32, i32) {
    %c0_i32 = arith.constant 0 : i32
    %c0_i32_0 = arith.constant 0 : i32
    %c0_i32_1 = arith.constant 0 : i32
    return %c0_i32, %c0_i32_0 : i32, i32
  }
  func.func @transform_16(%arg0: i32) -> (i32, i32) {
    %c0_i32 = arith.constant 0 : i32
    %c0_i32_0 = arith.constant 0 : i32
    %c0_i32_1 = arith.constant 0 : i32
    return %c0_i32, %c0_i32_0 : i32, i32
  }
  func.func @transform_17(%arg0: i32) -> (i32, i32) {
    %c0_i32 = arith.constant 0 : i32
    %c0_i32_0 = arith.constant 0 : i32
    return %arg0, %c0_i32 : i32, i32
  }
  func.func @transform_18(%arg0: i32) -> (i32, i32) {
    %c0_i32 = arith.constant 0 : i32
    %c0_i32_0 = arith.constant 0 : i32
    return %arg0, %c0_i32 : i32, i32
  }
}

</mosaic_0001>

<bundles_post_ra>
// kernel: squeeze.1
= control target key start
LH: loop header
LB: loop body
LE: loop exit
PB: predicated region body
PF: predicated region fallthrough
CT: control target
= control target key end

     0   :  { %s77_s0 = inlined_call_operand.vmem [shape: f32[16], index: 0, kind: input, shape index: {}]   ;;  %s78_s1 = inlined_call_operand.hbm [shape: f32[2,8], index: 1, kind: output, shape index: {}]  }
   0x1   :  { %v6_v0 = vld [vmem:[%s77_s0] sm:$0x1] }
   0x2   :  { %2 = vsyncpa [#allocation1], 0  ;;  %7 = vst [vmem:[#allocation3] sm:$0x1] %v6_v0  ;;  %vm9_vm0 = vcmask 64512   ;;  %s59_s0 = smov 120  }
   0x3   :  { %s60_s8 = smov [#allocation0]  }
   0x4   :  { %s29_s9 = sshll.u32 %s60_s8, 4  ;;  %s30_s9 = int_to_ptr.vmem [resolvable:$true] %s29_s9 }
   0x5   :  { %s37_s10 = scalar_lea.vmem %s30_s9, 32  ;;  %p42_p1 = scmp.lt.s32.totalorder %s30_s9, %s30_s9 }
   0x6   :  { %p38_p0 = scmp.ne.s32.totalorder %s30_s9, %s37_s10  ;;  %p43_p2 = scmp.lt.s32.totalorder %s37_s10, %s37_s10 }
   0x8   :  { %p44_p3 = por %p43_p2, %p42_p1 }
   0x9   :  { %v11_v1 = vld [vmem:[#allocation3] sm:$0x1]  }
   0xa   :  { %v8_v2 = vld [vmem:[#allocation3] sm:$0x1]   ;;  %12 = vrot.lane.b32.xlu0 %v11_v1, %s59_s0  ;;  %p45_p4 = pnand %p44_p3, %p38_p0 }
   0xb   :  { %10 = vst.msk [vmem:[#allocation2] sm:$0x1] %vm9_vm0, %v8_v2  }
  0x7c   :  { %v13_v3 = vpop.permute.xlu0 %12  }
  0x7d   :  { %16 = vst.msk [vmem:[#allocation2 + $0x1] sm:$0x1] %vm9_vm0, %v13_v3  }
  0x84   :  { %v21_v4 = vld [vmem:[#allocation2] sm:$0x3] }
  0x85   :  { %24 = vst [vmem:[#allocation0] sm:$0x3] %v21_v4 }
  0x86   :  { %48 = shalt.err (!%p45_p4)
}
  0x87   :  { %32 = dma.vmem_to_hbm [thread:$0]  %s30_s9, 32, %s78_s1, [#allocation1]  }
  0x88   :  { %57 = dma.done.wait [#allocation1], 32  }
  0x89   :  { %58 = vsyncadd [#allocation1], 4294967264 }
  0x8a   :  { %34 = vsyncpa [#allocation1], 1 }

// kernel: maml_forward.1
= control target key start
LH: loop header
LB: loop body
LE: loop exit
PB: predicated region body
PF: predicated region fallthrough
CT: control target
= control target key end

     0   :  { %s10106_s0 = inlined_call_operand.vmem [shape: f32[16,32], index: 0, kind: input, shape index: {}]   ;;  %s10107_s1 = inlined_call_operand.vmem [shape: f32[16,32], index: 1, kind: input, shape index: {}]   ;;  %s10108_s2 = inlined_call_operand.vmem [shape: f32[16,4608], index: 2, kind: input, shape index: {}]   ;;  %s10109_s3 = inlined_call_operand.vmem [shape: bf16[4608,256], index: 3, kind: input, shape index: {}]   ;;  %s10110_s4 = inlined_call_operand.vmem [shape: f32[1,256], index: 4, kind: input, shape index: {}]   ;;  %s10111_s5 = inlined_call_operand.vmem [shape: bf16[256,128], index: 5, kind: input, shape index: {}]   ;;  %s10112_s6 = inlined_call_operand.vmem [shape: f32[1,128], index: 6, kind: input, shape index: {}]   ;;  %s10113_s7 = inlined_call_operand.vmem [shape: bf16[128,128], index: 7, kind: input, shape index: {}]   ;;  %s10114_s8 = inlined_call_operand.vmem [shape: f32[1,128], index: 8, kind: input, shape index: {}]   ;;  %s10115_s9 = inlined_call_operand.vmem [shape: bf16[128,32], index: 9, kind: input, shape index: {}]   ;;  %s10116_s10 = inlined_call_operand.vmem [shape: f32[1,32], index: 10, kind: input, shape index: {}]   ;;  %s10117_s11 = inlined_call_operand.vmem [shape: bf16[32,96], index: 11, kind: input, shape index: {}]   ;;  %s10118_s12 = inlined_call_operand.vmem [shape: bf16[32,96], index: 12, kind: input, shape index: {}]   ;;  %s10119_s13 = inlined_call_operand.vmem [shape: bf16[32,96], index: 13, kind: input, shape index: {}]   ;;  %s10120_s14 = inlined_call_operand.vmem [shape: f32[1,96], index: 14, kind: input, shape index: {}]   ;;  %s10121_s15 = inlined_call_operand.vmem [shape: bf16[96,32], index: 15, kind: input, shape index: {}]   ;;  %s10122_s16 = inlined_call_operand.vmem [shape: f32[1,32], index: 16, kind: input, shape index: {}]   ;;  %s10123_s17 = inlined_call_operand.hbm [shape: f32[16,32], index: 17, kind: output, shape index: {0}]   ;;  %s10124_s18 = inlined_call_operand.vmem [shape: f32[16,1], index: 18, kind: output, shape index: {1}]  }
   0x1   :  { %10128 = sst [smem:[#allocation16_spill]] %s10106_s0 }
   0x2   :  { %10129 = sst [smem:[#allocation17_spill]] %s10107_s1 }
   0x3   :  { %10130 = sst [smem:[#allocation18_spill]] %s10108_s2 }
   0x4   :  { %v6320_v0 = vld [vmem:[%s10109_s3 + $0x4f4] ss:$8 sps:$4 sm:$0xff]   ;;  %v6324_v2 = vld [vmem:[%s10109_s3 + $0x4f0] ss:$8 sps:$4 sm:$0xff]   ;;  %v6326_v4 = vld [vmem:[%s10109_s3 + $0x4e4] ss:$8 sps:$4 sm:$0xff]  }
   0x5   :  { %v6322_v1 = vld [vmem:[%s10109_s3 + $0x5f4] ss:$8 sps:$4 sm:$0xff]   ;;  %1206 = vmatprep.subr.bf16.mxu0 %v6320_v0  ;;  %v6325_v3 = vld [vmem:[%s10109_s3 + $0x5f0] ss:$8 sps:$4 sm:$0xff]   ;;  %v6328_v5 = vld [vmem:[%s10109_s3 + $0x5e4] ss:$8 sps:$4 sm:$0xff]  }
   0x6   :  { %1249 = vmatprep.subr.bf16.mxu1 %v6322_v1  ;;  %1207 = vmatpush1.bf16.msra.mxu0 %v6324_v2  ;;  %v6330_v6 = vld [vmem:[%s10109_s3 + $0x4e0] ss:$8 sps:$4 sm:$0xff]   ;;  %v6332_v8 = vld [vmem:[%s10109_s3 + $0x4d4] ss:$8 sps:$4 sm:$0xff]   ;;  %v6336_v10 = vld [vmem:[%s10109_s3 + $0x4d0] ss:$8 sps:$4 sm:$0xff]  }
   0x7   :  { %1250 = vmatpush1.bf16.msra.mxu1 %v6325_v3  ;;  %1208 = vmatprep.subr.bf16.mxu0 %v6326_v4  ;;  %v6331_v7 = vld [vmem:[%s10109_s3 + $0x5e0] ss:$8 sps:$4 sm:$0xff]   ;;  %v6334_v9 = vld [vmem:[%s10109_s3 + $0x5d4] ss:$8 sps:$4 sm:$0xff]   ;;  %v6337_v11 = vld [vmem:[%s10109_s3 + $0x5d0] ss:$8 sps:$4 sm:$0xff]  }
   0x8   :  { %1251 = vmatprep.subr.bf16.mxu1 %v6328_v5  ;;  %v6338_v12 = vld [vmem:[%s10109_s3 + $0x4c4] ss:$8 sps:$4 sm:$0xff]   ;;  %v6342_v14 = vld [vmem:[%s10109_s3 + $0x4c0] ss:$8 sps:$4 sm:$0xff]   ;;  %v6344_v16 = vld [vmem:[%s10109_s3 + $0x4b4] ss:$8 sps:$4 sm:$0xff]  }
   0x9   :  { %v6340_v13 = vld [vmem:[%s10109_s3 + $0x5c4] ss:$8 sps:$4 sm:$0xff]   ;;  %v6343_v15 = vld [vmem:[%s10109_s3 + $0x5c0] ss:$8 sps:$4 sm:$0xff]   ;;  %v6346_v17 = vld [vmem:[%s10109_s3 + $0x5b4] ss:$8 sps:$4 sm:$0xff]  }
   0xa   :  { %1209 = vmatpush1.bf16.msra.mxu0 %v6330_v6  ;;  %v6348_v18 = vld [vmem:[%s10109_s3 + $0x4b0] ss:$8 sps:$4 sm:$0xff]   ;;  %v6350_v20 = vld [vmem:[%s10109_s3 + $0x4a4] ss:$8 sps:$4 sm:$0xff]   ;;  %v6354_v22 = vld [vmem:[%s10109_s3 + $0x4a0] ss:$8 sps:$4 sm:$0xff]  }
   0xb   :  { %1252 = vmatpush1.bf16.msra.mxu1 %v6331_v7  ;;  %1210 = vmatprep.subr.bf16.mxu0 %v6332_v8  ;;  %v6349_v19 = vld [vmem:[%s10109_s3 + $0x5b0] ss:$8 sps:$4 sm:$0xff]   ;;  %v6352_v21 = vld [vmem:[%s10109_s3 + $0x5a4] ss:$8 sps:$4 sm:$0xff]   ;;  %v6355_v23 = vld [vmem:[%s10109_s3 + $0x5a0] ss:$8 sps:$4 sm:$0xff]  }
   0xc   :  { %1253 = vmatprep.subr.bf16.mxu1 %v6334_v9  ;;  %v6356_v24 = vld [vmem:[%s10109_s3 + $0x494] ss:$8 sps:$4 sm:$0xff]   ;;  %v6360_v26 = vld [vmem:[%s10109_s3 + $0x490] ss:$8 sps:$4 sm:$0xff]   ;;  %v6362_v28 = vld [vmem:[%s10109_s3 + $0x484] ss:$8 sps:$4 sm:$0xff]  }
   0xd   :  { %v6358_v25 = vld [vmem:[%s10109_s3 + $0x594] ss:$8 sps:$4 sm:$0xff]   ;;  %v6361_v27 = vld [vmem:[%s10109_s3 + $0x590] ss:$8 sps:$4 sm:$0xff]   ;;  %v6364_v29 = vld [vmem:[%s10109_s3 + $0x584] ss:$8 sps:$4 sm:$0xff]  }
   0xe   :  { %1211 = vmatpush1.bf16.msra.mxu0 %v6336_v10  ;;  %v6366_v30 = vld [vmem:[%s10109_s3 + $0x480] ss:$8 sps:$4 sm:$0xff]   ;;  %v6368_v32 = vld [vmem:[%s10109_s3 + $0x574] ss:$8 sps:$4 sm:$0xff]   ;;  %v6372_v34 = vld [vmem:[%s10109_s3 + $0x570] ss:$8 sps:$4 sm:$0xff]  }
   0xf   :  { %1254 = vmatpush1.bf16.msra.mxu1 %v6337_v11  ;;  %1212 = vmatprep.subr.bf16.mxu0 %v6338_v12  ;;  %v6367_v31 = vld [vmem:[%s10109_s3 + $0x580] ss:$8 sps:$4 sm:$0xff]   ;;  %v6370_v33 = vld [vmem:[%s10109_s3 + $0x674] ss:$8 sps:$4 sm:$0xff]   ;;  %v6373_v35 = vld [vmem:[%s10109_s3 + $0x670] ss:$8 sps:$4 sm:$0xff]  }
  0x10   :  { %1255 = vmatprep.subr.bf16.mxu1 %v6340_v13  ;;  %v6374_v36 = vld [vmem:[%s10109_s3 + $0x564] ss:$8 sps:$4 sm:$0xff]   ;;  %v6378_v38 = vld [vmem:[%s10109_s3 + $0x560] ss:$8 sps:$4 sm:$0xff]   ;;  %v6380_v40 = vld [vmem:[%s10109_s3 + $0x554] ss:$8 sps:$4 sm:$0xff]  }
  0x11   :  { %v6376_v37 = vld [vmem:[%s10109_s3 + $0x664] ss:$8 sps:$4 sm:$0xff]   ;;  %v6379_v39 = vld [vmem:[%s10109_s3 + $0x660] ss:$8 sps:$4 sm:$0xff]   ;;  %v6382_v41 = vld [vmem:[%s10109_s3 + $0x654] ss:$8 sps:$4 sm:$0xff]  }
  0x12   :  { %1213 = vmatpush1.bf16.msra.mxu0 %v6342_v14  ;;  %v6384_v42 = vld [vmem:[%s10109_s3 + $0x550] ss:$8 sps:$4 sm:$0xff]   ;;  %v6386_v44 = vld [vmem:[%s10109_s3 + $0x544] ss:$8 sps:$4 sm:$0xff]   ;;  %v6390_v46 = vld [vmem:[%s10109_s3 + $0x540] ss:$8 sps:$4 sm:$0xff]  }
  0x13   :  { %1256 = vmatpush1.bf16.msra.mxu1 %v6343_v15  ;;  %1214 = vmatprep.subr.bf16.mxu0 %v6344_v16  ;;  %v6385_v43 = vld [vmem:[%s10109_s3 + $0x650] ss:$8 sps:$4 sm:$0xff]   ;;  %v6388_v45 = vld [vmem:[%s10109_s3 + $0x644] ss:$8 sps:$4 sm:$0xff]   ;;  %v6391_v47 = vld [vmem:[%s10109_s3 + $0x640] ss:$8 sps:$4 sm:$0xff]  }
  0x14   :  { %1257 = vmatprep.subr.bf16.mxu1 %v6346_v17  ;;  %s10131_s21 = sld [smem:[#allocation18_spill]]  ;;  %v6392_v53 = vld [vmem:[%s10109_s3 + $0x534] ss:$8 sps:$4 sm:$0xff]   ;;  %v6396_v9 = vld [vmem:[%s10109_s3 + $0x530] ss:$8 sps:$4 sm:$0xff]  }
  0x15   :  { %v6394_v59 = vld [vmem:[%s10109_s3 + $0x634] ss:$8 sps:$4 sm:$0xff]   ;;  %v6397_v10 = vld [vmem:[%s10109_s3 + $0x630] ss:$8 sps:$4 sm:$0xff]   ;;  %v6398_v14 = vld [vmem:[%s10109_s3 + $0x524] ss:$8 sps:$4 sm:$0xff]  }
  0x16   :  { %1215 = vmatpush1.bf16.msra.mxu0 %v6348_v18  ;;  %v6400_v15 = vld [vmem:[%s10109_s3 + $0x624] ss:$8 sps:$4 sm:$0xff]   ;;  %v6402_v18 = vld [vmem:[%s10109_s3 + $0x520] ss:$8 sps:$4 sm:$0xff]  }
  0x17   :  { %1258 = vmatpush1.bf16.msra.mxu1 %v6349_v19  ;;  %1216 = vmatprep.subr.bf16.mxu0 %v6350_v20  ;;  %v6403_v19 = vld [vmem:[%s10109_s3 + $0x620] ss:$8 sps:$4 sm:$0xff]  }
  0x18   :  { %1259 = vmatprep.subr.bf16.mxu1 %v6352_v21 }
  0x1a   :  { %1217 = vmatpush1.bf16.msra.mxu0 %v6354_v22  ;;  %v7553_v48 = vld [vmem:[%s10131_s21 + $0x48] sm:$0xff]  ;;  %v276_v49 = vld [vmem:[%s10131_s21 + $0x50] sm:$0xff]  ;;  %v7576_v57 = vld [vmem:[%s10131_s21 + $0x58] sm:$0xff] }
  0x1b   :  { %1260 = vmatpush1.bf16.msra.mxu1 %v6355_v23  ;;  %1218 = vmatprep.subr.bf16.mxu0 %v6356_v24  ;;  %v7561_v50 = vld [vmem:[%s10131_s21 + $0x168] sm:$0xff]  ;;  %v285_v51 = vld [vmem:[%s10131_s21 + $0x170] sm:$0xff]  ;;  %v293_v52 = vmul.f32 %v7553_v48, %v7553_v48  ;;  %v294_v54 = vmul.f32 %v276_v49, %v276_v49  ;;  %v278_v58 = vld [vmem:[%s10131_s21 + $0x60] sm:$0xff]  ;;  %v295_v63 = vmul.f32 %v7576_v57, %v7576_v57 }
  0x1c   :  { %1261 = vmatprep.subr.bf16.mxu1 %v6358_v25  ;;  %v302_v55 = vmul.f32 %v7561_v50, %v7561_v50  ;;  %v303_v56 = vmul.f32 %v285_v51, %v285_v51  ;;  %v334_v60 = vpack.c.bf16 %v285_v51, %v276_v49  ;;  %v7587_v61 = vld [vmem:[%s10131_s21 + $0x178] sm:$0xff]  ;;  %v287_v62 = vld [vmem:[%s10131_s21 + $0x180] sm:$0xff]  ;;  %v7597_v2 = vld [vmem:[%s10131_s21 + $0x68] sm:$0xff]  ;;  %v296_v3 = vmul.f32 %v278_v58, %v278_v58 }
  0x1d   :  { %v311_v0 = vadd.f32 %v294_v54, %v293_v52  ;;  %v304_v4 = vmul.f32 %v7587_v61, %v7587_v61  ;;  %v7604_v5 = vld [vmem:[%s10131_s21 + $0x188] sm:$0xff]  ;;  %v297_v6 = vmul.f32 %v7597_v2, %v7597_v2  ;;  %v305_v7 = vmul.f32 %v287_v62, %v287_v62  ;;  %v6404_v22 = vld [vmem:[%s10109_s3 + $0x514] ss:$8 sps:$4 sm:$0xff]   ;;  %v6408_v24 = vld [vmem:[%s10109_s3 + $0x510] ss:$8 sps:$4 sm:$0xff]  }
  0x1e   :  { %1219 = vmatpush1.bf16.msra.mxu0 %v6360_v26  ;;  %v321_v1 = vadd.f32 %v303_v56, %v302_v55  ;;  %1238 = vmatprep.mubr.bf16.mxu0 %v334_v60  ;;  %v336_v8 = vpack.c.bf16 %v287_v62, %v278_v58  ;;  %v306_v11 = vmul.f32 %v7604_v5, %v7604_v5  ;;  %v6406_v23 = vld [vmem:[%s10109_s3 + $0x614] ss:$8 sps:$4 sm:$0xff]   ;;  %v6409_v25 = vld [vmem:[%s10109_s3 + $0x610] ss:$8 sps:$4 sm:$0xff]   ;;  %v6410_v26 = vld [vmem:[%s10109_s3 + $0x504] ss:$8 sps:$4 sm:$0xff]  }
  0x1f   :  { %1262 = vmatpush1.bf16.msra.mxu1 %v6361_v27  ;;  %1220 = vmatprep.subr.bf16.mxu0 %v6362_v28  ;;  %v312_v12 = vadd.f32 %v311_v0, %v295_v63  ;;  %v6412_v27 = vld [vmem:[%s10109_s3 + $0x604] ss:$8 sps:$4 sm:$0xff]   ;;  %v6414_v28 = vld [vmem:[%s10109_s3 + $0x500] ss:$8 sps:$4 sm:$0xff]   ;;  %v6445_v49 = vld [vmem:[%s10109_s3 + $0x7b4] ss:$8 sps:$4 sm:$0xff]  }
  0x20   :  { %1263 = vmatprep.subr.bf16.mxu1 %v6364_v29  ;;  %v322_v13 = vadd.f32 %v321_v1, %v304_v4  ;;  %1281 = vmatprep.mubr.bf16.mxu1 %v336_v8  ;;  %v6415_v29 = vld [vmem:[%s10109_s3 + $0x600] ss:$8 sps:$4 sm:$0xff]   ;;  %v6443_v51 = vld [vmem:[%s10109_s3 + $0x7b0] ss:$8 sps:$4 sm:$0xff]   ;;  %v6448_v52 = vld [vmem:[%s10109_s3 + $0x6a4] ss:$8 sps:$4 sm:$0xff]  }
  0x21   :  { %v313_v16 = vadd.f32 %v312_v12, %v296_v3  ;;  %v6446_v54 = vld [vmem:[%s10109_s3 + $0x6a0] ss:$8 sps:$4 sm:$0xff]   ;;  %v6454_v56 = vld [vmem:[%s10109_s3 + $0x694] ss:$8 sps:$4 sm:$0xff]   ;;  %v6452_v58 = vld [vmem:[%s10109_s3 + $0x690] ss:$8 sps:$4 sm:$0xff]  }
  0x22   :  { %1221 = vmatpush1.bf16.msra.mxu0 %v6366_v30  ;;  %v323_v17 = vadd.f32 %v322_v13, %v305_v7  ;;  %v6418_v30 = vld [vmem:[%s10109_s3 + $0x6f4] ss:$8 sps:$4 sm:$0xff]   ;;  %v6449_v55 = vld [vmem:[%s10109_s3 + $0x7a0] ss:$8 sps:$4 sm:$0xff]   ;;  %v6460_v60 = vld [vmem:[%s10109_s3 + $0x684] ss:$8 sps:$4 sm:$0xff]  }
  0x23   :  { %1264 = vmatpush1.bf16.msra.mxu1 %v6367_v31  ;;  %1222 = vmatprep.subr.bf16.mxu0 %v6368_v32  ;;  %v7628_v20 = vadd.f32 %v313_v16, %v297_v6  ;;  %v6421_v31 = vld [vmem:[%s10109_s3 + $0x7f4] ss:$8 sps:$4 sm:$0xff]   ;;  %v333_v32 = vpack.c.bf16 %v7561_v50, %v7553_v48  ;;  %v6440_v50 = vld [vmem:[%s10109_s3 + $0x6b0] ss:$8 sps:$4 sm:$0xff]   ;;  %v282_v0 = vld [vmem:[%s10131_s21 + $0x80] sm:$0xff] }
  0x24   :  { %1265 = vmatprep.subr.bf16.mxu1 %v6370_v33  ;;  %v7630_v21 = vadd.f32 %v323_v17, %v306_v11  ;;  %v335_v33 = vpack.c.bf16 %v7587_v61, %v7576_v57  ;;  %v6442_v48 = vld [vmem:[%s10109_s3 + $0x6b4] ss:$8 sps:$4 sm:$0xff]   ;;  %v6463_v61 = vld [vmem:[%s10109_s3 + $0x784] ss:$8 sps:$4 sm:$0xff]   ;;  %v6458_v6 = vld [vmem:[%s10109_s3 + $0x680] ss:$8 sps:$4 sm:$0xff]  }
  0x25   :  { %v6457_v57 = vld [vmem:[%s10109_s3 + $0x794] ss:$8 sps:$4 sm:$0xff]   ;;  %v291_v1 = vld [vmem:[%s10131_s21 + $0x1a0] sm:$0xff]  ;;  %v6467_v11 = vld [vmem:[%s10109_s3 + $0x870] ss:$8 sps:$4 sm:$0xff]  }
  0x26   :  { %1223 = vmatpush2.bf16.msra.mxu0 %v6372_v34  ;;  %v6416_v34 = vld [vmem:[%s10109_s3 + $0x6f0] ss:$8 sps:$4 sm:$0xff]   ;;  %v340_v4 = vpack.c.bf16 %v291_v1, %v282_v0  ;;  %v6461_v7 = vld [vmem:[%s10109_s3 + $0x780] ss:$8 sps:$4 sm:$0xff]   ;;  %v6466_v8 = vld [vmem:[%s10109_s3 + $0x774] ss:$8 sps:$4 sm:$0xff]  }
  0x27   :  { %1266 = vmatpush2.bf16.msra.mxu1 %v6373_v35  ;;  %1224 = vmatprep.subr.bf16.mxu0 %v6374_v36  ;;  %v6419_v35 = vld [vmem:[%s10109_s3 + $0x7f0] ss:$8 sps:$4 sm:$0xff]   ;;  %v6424_v36 = vld [vmem:[%s10109_s3 + $0x6e4] ss:$8 sps:$4 sm:$0xff]   ;;  %v6478_v16 = vld [vmem:[%s10109_s3 + $0x754] ss:$8 sps:$4 sm:$0xff]  }
  0x28   :  { %1267 = vmatprep.subr.bf16.mxu1 %v6376_v37  ;;  %v6427_v37 = vld [vmem:[%s10109_s3 + $0x7e4] ss:$8 sps:$4 sm:$0xff]   ;;  %v280_v62 = vld [vmem:[%s10131_s21 + $0x70] sm:$0xff] }
  0x29   :  { %v289_v63 = vld [vmem:[%s10131_s21 + $0x190] sm:$0xff]  ;;  %v6472_v12 = vld [vmem:[%s10109_s3 + $0x764] ss:$8 sps:$4 sm:$0xff]  }
  0x2a   :  { %1225 = vmatpush2.bf16.msra.mxu0 %v6378_v38  ;;  %v6422_v38 = vld [vmem:[%s10109_s3 + $0x6e0] ss:$8 sps:$4 sm:$0xff]   ;;  %v338_v3 = vpack.c.bf16 %v289_v63, %v280_v62  ;;  %v6475_v13 = vld [vmem:[%s10109_s3 + $0x864] ss:$8 sps:$4 sm:$0xff]   ;;  %v6481_v17 = vld [vmem:[%s10109_s3 + $0x854] ss:$8 sps:$4 sm:$0xff]  }
  0x2b   :  { %1268 = vmatpush2.bf16.msra.mxu1 %v6379_v39  ;;  %1226 = vmatprep.subr.bf16.mxu0 %v6380_v40  ;;  %v6425_v39 = vld [vmem:[%s10109_s3 + $0x7e0] ss:$8 sps:$4 sm:$0xff]   ;;  %v6430_v40 = vld [vmem:[%s10109_s3 + $0x6d4] ss:$8 sps:$4 sm:$0xff]   ;;  %v6524_v62 = vld [vmem:[%s10109_s3 + $0x8d0] ss:$8 sps:$4 sm:$0xff]  }
  0x2c   :  { %1269 = vmatprep.subr.bf16.mxu1 %v6382_v41  ;;  %v6433_v41 = vld [vmem:[%s10109_s3 + $0x7d4] ss:$8 sps:$4 sm:$0xff]   ;;  %v6527_v63 = vld [vmem:[%s10109_s3 + $0x50] ss:$8 sps:$4 sm:$0xff]  }
  0x2e   :  { %1227 = vmatpush2.bf16.msra.mxu0 %v6384_v42  ;;  %v6428_v42 = vld [vmem:[%s10109_s3 + $0x6d0] ss:$8 sps:$4 sm:$0xff]  }
  0x2f   :  { %1270 = vmatpush2.bf16.msra.mxu1 %v6385_v43  ;;  %1228 = vmatprep.subr.bf16.mxu0 %v6386_v44  ;;  %v6431_v43 = vld [vmem:[%s10109_s3 + $0x7d0] ss:$8 sps:$4 sm:$0xff]   ;;  %v6436_v44 = vld [vmem:[%s10109_s3 + $0x6c4] ss:$8 sps:$4 sm:$0xff]  }
  0x30   :  { %1271 = vmatprep.subr.bf16.mxu1 %v6388_v45  ;;  %v6439_v45 = vld [vmem:[%s10109_s3 + $0x7c4] ss:$8 sps:$4 sm:$0xff]  }
  0x32   :  { %1229 = vmatpush2.bf16.msra.mxu0 %v6390_v46  ;;  %v6434_v46 = vld [vmem:[%s10109_s3 + $0x6c0] ss:$8 sps:$4 sm:$0xff]  }
  0x33   :  { %1272 = vmatpush2.bf16.msra.mxu1 %v6391_v47  ;;  %1230 = vmatprep.subr.bf16.mxu0 %v6392_v53  ;;  %v6437_v47 = vld [vmem:[%s10109_s3 + $0x7c0] ss:$8 sps:$4 sm:$0xff]   ;;  %v6451_v53 = vld [vmem:[%s10109_s3 + $0x7a4] ss:$8 sps:$4 sm:$0xff]  }
  0x34   :  { %1273 = vmatprep.subr.bf16.mxu1 %v6394_v59  ;;  %v6455_v59 = vld [vmem:[%s10109_s3 + $0x790] ss:$8 sps:$4 sm:$0xff]  }
  0x36   :  { %1231 = vmatpush2.bf16.msra.mxu0 %v6396_v9  ;;  %v6469_v9 = vld [vmem:[%s10109_s3 + $0x874] ss:$8 sps:$4 sm:$0xff]  }
  0x37   :  { %1274 = vmatpush2.bf16.msra.mxu1 %v6397_v10  ;;  %1232 = vmatprep.subr.bf16.mxu0 %v6398_v14  ;;  %v6464_v10 = vld [vmem:[%s10109_s3 + $0x770] ss:$8 sps:$4 sm:$0xff]   ;;  %v6470_v14 = vld [vmem:[%s10109_s3 + $0x760] ss:$8 sps:$4 sm:$0xff]  }
  0x38   :  { %1275 = vmatprep.subr.bf16.mxu1 %v6400_v15  ;;  %v6473_v15 = vld [vmem:[%s10109_s3 + $0x860] ss:$8 sps:$4 sm:$0xff]  }
  0x3a   :  { %1233 = vmatpush2.bf16.msra.mxu0 %v6402_v18  ;;  %v6476_v18 = vld [vmem:[%s10109_s3 + $0x750] ss:$8 sps:$4 sm:$0xff]  }
  0x3b   :  { %1276 = vmatpush2.bf16.msra.mxu1 %v6403_v19  ;;  %1234 = vmatprep.subr.bf16.mxu0 %v6404_v22  ;;  %v6479_v19 = vld [vmem:[%s10109_s3 + $0x850] ss:$8 sps:$4 sm:$0xff]   ;;  %v6484_v22 = vld [vmem:[%s10109_s3 + $0x744] ss:$8 sps:$4 sm:$0xff]  }
  0x3c   :  { %1277 = vmatprep.subr.bf16.mxu1 %v6406_v23  ;;  %v6487_v23 = vld [vmem:[%s10109_s3 + $0x844] ss:$8 sps:$4 sm:$0xff]  }
  0x3e   :  { %1235 = vmatpush2.bf16.msra.mxu0 %v6408_v24  ;;  %v6482_v24 = vld [vmem:[%s10109_s3 + $0x740] ss:$8 sps:$4 sm:$0xff]  }
  0x3f   :  { %1278 = vmatpush2.bf16.msra.mxu1 %v6409_v25  ;;  %1236 = vmatprep.subr.bf16.mxu0 %v6410_v26  ;;  %v6485_v25 = vld [vmem:[%s10109_s3 + $0x840] ss:$8 sps:$4 sm:$0xff]   ;;  %v6490_v26 = vld [vmem:[%s10109_s3 + $0x734] ss:$8 sps:$4 sm:$0xff]  }
  0x40   :  { %1279 = vmatprep.subr.bf16.mxu1 %v6412_v27  ;;  %v6493_v27 = vld [vmem:[%s10109_s3 + $0x834] ss:$8 sps:$4 sm:$0xff]  }
  0x42   :  { %1237 = vmatpush2.bf16.msra.mxu0 %v6414_v28  ;;  %v6488_v28 = vld [vmem:[%s10109_s3 + $0x730] ss:$8 sps:$4 sm:$0xff]  }
  0x43   :  { %1280 = vmatpush2.bf16.msra.mxu1 %v6415_v29  ;;  %1292 = vmatprep.subr.bf16.mxu0 %v6418_v30  ;;  %v6491_v29 = vld [vmem:[%s10109_s3 + $0x830] ss:$8 sps:$4 sm:$0xff]   ;;  %v6496_v30 = vld [vmem:[%s10109_s3 + $0x724] ss:$8 sps:$4 sm:$0xff]  }
  0x44   :  { %1335 = vmatprep.subr.bf16.mxu1 %v6421_v31  ;;  %v6499_v31 = vld [vmem:[%s10109_s3 + $0x824] ss:$8 sps:$4 sm:$0xff]  }
  0x45   :  { %1239 = vmatmul.mubr.bf16.vlgmr.msra.gmra.mxu0 %v333_v32  ;;  %v6494_v32 = vld [vmem:[%s10109_s3 + $0x720] ss:$8 sps:$4 sm:$0xff]  }
  0x46   :  { %1282 = vmatmul.mubr.bf16.vlgmr.msra.gmra.mxu1 %v335_v33  ;;  %1293 = vmatpush1.bf16.msra.mxu0 %v6416_v34  ;;  %v6497_v33 = vld [vmem:[%s10109_s3 + $0x820] ss:$8 sps:$4 sm:$0xff]   ;;  %v6502_v34 = vld [vmem:[%s10109_s3 + $0x714] ss:$8 sps:$4 sm:$0xff]  }
  0x47   :  { %1336 = vmatpush1.bf16.msra.mxu1 %v6419_v35  ;;  %1294 = vmatprep.subr.bf16.mxu0 %v6424_v36  ;;  %v6505_v35 = vld [vmem:[%s10109_s3 + $0x814] ss:$8 sps:$4 sm:$0xff]   ;;  %v6500_v36 = vld [vmem:[%s10109_s3 + $0x710] ss:$8 sps:$4 sm:$0xff]  }
  0x48   :  { %1337 = vmatprep.subr.bf16.mxu1 %v6427_v37  ;;  %1324 = vmatprep.mubr.bf16.mxu0 %v338_v3  ;;  %v6503_v37 = vld [vmem:[%s10109_s3 + $0x810] ss:$8 sps:$4 sm:$0xff]   ;;  %v6532_v3 = vld [vmem:[%s10109_s3 + $0x8c4] ss:$8 sps:$4 sm:$0xff]  }
  0x49   :  { %1367 = vmatprep.mubr.bf16.mxu1 %v340_v4  ;;  %v6535_v4 = vld [vmem:[%s10109_s3 + $0x44] ss:$8 sps:$4 sm:$0xff]  }
  0x4a   :  { %1295 = vmatpush1.bf16.msra.mxu0 %v6422_v38  ;;  %v6508_v38 = vld [vmem:[%s10109_s3 + $0x704] ss:$8 sps:$4 sm:$0xff]  }
  0x4b   :  { %1338 = vmatpush1.bf16.msra.mxu1 %v6425_v39  ;;  %1296 = vmatprep.subr.bf16.mxu0 %v6430_v40  ;;  %v6511_v39 = vld [vmem:[%s10109_s3 + $0x804] ss:$8 sps:$4 sm:$0xff]   ;;  %v6506_v40 = vld [vmem:[%s10109_s3 + $0x700] ss:$8 sps:$4 sm:$0xff]  }
  0x4c   :  { %1339 = vmatprep.subr.bf16.mxu1 %v6433_v41  ;;  %v6509_v41 = vld [vmem:[%s10109_s3 + $0x800] ss:$8 sps:$4 sm:$0xff]  }
  0x4e   :  { %1297 = vmatpush1.bf16.msra.mxu0 %v6428_v42  ;;  %v281_v42 = vld [vmem:[%s10131_s21 + $0x78] sm:$0xff] }
  0x4f   :  { %1340 = vmatpush1.bf16.msra.mxu1 %v6431_v43  ;;  %1298 = vmatprep.subr.bf16.mxu0 %v6436_v44  ;;  %v290_v43 = vld [vmem:[%s10131_s21 + $0x198] sm:$0xff] }
  0x50   :  { %1341 = vmatprep.subr.bf16.mxu1 %v6439_v45  ;;  %v6514_v44 = vld [vmem:[%s10109_s3 + $0x8f4] ss:$8 sps:$4 sm:$0xff]  }
  0x51   :  { %v6517_v45 = vld [vmem:[%s10109_s3 + $0x74] ss:$8 sps:$4 sm:$0xff]  }
  0x52   :  { %1299 = vmatpush1.bf16.msra.mxu0 %v6434_v46  ;;  %v337_v46 = vpack.c.bf16 %v7604_v5, %v7597_v2  ;;  %v6523_v2 = vld [vmem:[%s10109_s3 + $0x64] ss:$8 sps:$4 sm:$0xff]   ;;  %v6518_v5 = vld [vmem:[%s10109_s3 + $0x8e0] ss:$8 sps:$4 sm:$0xff]  }
  0x53   :  { %1342 = vmatpush1.bf16.msra.mxu1 %v6437_v47  ;;  %1300 = vmatprep.subr.bf16.mxu0 %v6442_v48  ;;  %v339_v47 = vpack.c.bf16 %v290_v43, %v281_v42  ;;  %v6512_v48 = vld [vmem:[%s10109_s3 + $0x8f0] ss:$8 sps:$4 sm:$0xff]  }
  0x54   :  { %1343 = vmatprep.subr.bf16.mxu1 %v6445_v49  ;;  %v6515_v49 = vld [vmem:[%s10109_s3 + $0x70] ss:$8 sps:$4 sm:$0xff]  }
  0x55   :  { %v6560_v42 = vld [vmem:[%s10109_s3 + $0xf0] ss:$8 sps:$4 sm:$0xff]  }
  0x56   :  { %1301 = vmatpush1.bf16.msra.mxu0 %v6440_v50  ;;  %v6520_v50 = vld [vmem:[%s10109_s3 + $0x8e4] ss:$8 sps:$4 sm:$0xff]   ;;  %v6563_v43 = vld [vmem:[%s10109_s3 + $0x170] ss:$8 sps:$4 sm:$0xff]  }
  0x57   :  { %1344 = vmatpush1.bf16.msra.mxu1 %v6443_v51  ;;  %1302 = vmatprep.subr.bf16.mxu0 %v6448_v52  ;;  %v6521_v51 = vld [vmem:[%s10109_s3 + $0x60] ss:$8 sps:$4 sm:$0xff]   ;;  %v6526_v52 = vld [vmem:[%s10109_s3 + $0x8d4] ss:$8 sps:$4 sm:$0xff]  }
  0x58   :  { %1345 = vmatprep.subr.bf16.mxu1 %v6451_v53  ;;  %v6529_v53 = vld [vmem:[%s10109_s3 + $0x54] ss:$8 sps:$4 sm:$0xff]  }
  0x5a   :  { %1303 = vmatpush1.bf16.msra.mxu0 %v6446_v54  ;;  %v7305_v54 = vmov 0  }
  0x5b   :  { %1346 = vmatpush1.bf16.msra.mxu1 %v6449_v55  ;;  %1304 = vmatprep.subr.bf16.mxu0 %v6454_v56  ;;  %v7906_v55 = vld [vmem:[%s10131_s21] sm:$0xff]  ;;  %v65_v56 = vld [vmem:[%s10131_s21 + $0x8] sm:$0xff] }
  0x5c   :  { %1347 = vmatprep.subr.bf16.mxu1 %v6457_v57  ;;  %v7914_v57 = vld [vmem:[%s10131_s21 + $0x120] sm:$0xff] }
  0x5e   :  { %1305 = vmatpush1.bf16.msra.mxu0 %v6452_v58  ;;  %v74_v58 = vld [vmem:[%s10131_s21 + $0x128] sm:$0xff] }
  0x5f   :  { %1348 = vmatpush1.bf16.msra.mxu1 %v6455_v59  ;;  %1306 = vmatprep.subr.bf16.mxu0 %v6460_v60  ;;  %v82_v59 = vmul.f32 %v7906_v55, %v7906_v55  ;;  %v83_v60 = vmul.f32 %v65_v56, %v65_v56  ;;  %v92_v0 = vmul.f32 %v74_v58, %v74_v58 }
  0x60   :  { %1349 = vmatprep.subr.bf16.mxu1 %v6463_v61  ;;  %v91_v61 = vmul.f32 %v7914_v57, %v7914_v57  ;;  %v123_v1 = vpack.c.bf16 %v74_v58, %v65_v56  ;;  %v6580_v56 = vld [vmem:[%s10109_s3 + $0xc4] ss:$8 sps:$4 sm:$0xff]  }
  0x61   :  { %v6583_v58 = vld [vmem:[%s10109_s3 + $0x144] ss:$8 sps:$4 sm:$0xff]  }
  0x62   :  { %1307 = vmatpush1.bf16.msra.mxu0 %v6458_v6  ;;  %v100_v6 = vadd.f32 %v83_v60, %v82_v59  ;;  %v6578_v59 = vld [vmem:[%s10109_s3 + $0xc0] ss:$8 sps:$4 sm:$0xff]  }
  0x63   :  { %1350 = vmatpush1.bf16.msra.mxu1 %v6461_v7  ;;  %1308 = vmatprep.subr.bf16.mxu0 %v6466_v8  ;;  %v110_v7 = vadd.f32 %v92_v0, %v91_v61  ;;  %v6530_v8 = vld [vmem:[%s10109_s3 + $0x8c0] ss:$8 sps:$4 sm:$0xff]   ;;  %v6586_v61 = vld [vmem:[%s10109_s3 + $0xb4] ss:$8 sps:$4 sm:$0xff]   ;;  %v6587_v0 = vld [vmem:[%s10109_s3 + $0x130] ss:$8 sps:$4 sm:$0xff]  }
  0x64   :  { %1351 = vmatprep.subr.bf16.mxu1 %v6469_v9  ;;  %v6533_v9 = vld [vmem:[%s10109_s3 + $0x40] ss:$8 sps:$4 sm:$0xff]  }
  0x65   :  { %v6581_v60 = vld [vmem:[%s10109_s3 + $0x140] ss:$8 sps:$4 sm:$0xff]  }
  0x66   :  { %1309 = vmatpush2.bf16.msra.mxu0 %v6464_v10  ;;  %v6538_v10 = vld [vmem:[%s10109_s3 + $0x8b4] ss:$8 sps:$4 sm:$0xff]  }
  0x67   :  { %1352 = vmatpush2.bf16.msra.mxu1 %v6467_v11  ;;  %1310 = vmatprep.subr.bf16.mxu0 %v6472_v12  ;;  %v6541_v11 = vld [vmem:[%s10109_s3 + $0x34] ss:$8 sps:$4 sm:$0xff]   ;;  %v6536_v12 = vld [vmem:[%s10109_s3 + $0x8b0] ss:$8 sps:$4 sm:$0xff]  }
  0x68   :  { %1353 = vmatprep.subr.bf16.mxu1 %v6475_v13  ;;  %v6539_v13 = vld [vmem:[%s10109_s3 + $0x30] ss:$8 sps:$4 sm:$0xff]  }
  0x6a   :  { %1311 = vmatpush2.bf16.msra.mxu0 %v6470_v14  ;;  %v6544_v14 = vld [vmem:[%s10109_s3 + $0x8a4] ss:$8 sps:$4 sm:$0xff]  }
  0x6b   :  { %1354 = vmatpush2.bf16.msra.mxu1 %v6473_v15  ;;  %1312 = vmatprep.subr.bf16.mxu0 %v6478_v16  ;;  %v6547_v15 = vld [vmem:[%s10109_s3 + $0x24] ss:$8 sps:$4 sm:$0xff]   ;;  %v6542_v16 = vld [vmem:[%s10109_s3 + $0x8a0] ss:$8 sps:$4 sm:$0xff]  }
  0x6c   :  { %1355 = vmatprep.subr.bf16.mxu1 %v6481_v17  ;;  %v6545_v17 = vld [vmem:[%s10109_s3 + $0x20] ss:$8 sps:$4 sm:$0xff]  }
  0x6e   :  { %1313 = vmatpush2.bf16.msra.mxu0 %v6476_v18  ;;  %v6550_v18 = vld [vmem:[%s10109_s3 + $0x894] ss:$8 sps:$4 sm:$0xff]  }
  0x6f   :  { %1356 = vmatpush2.bf16.msra.mxu1 %v6479_v19  ;;  %1314 = vmatprep.subr.bf16.mxu0 %v6484_v22  ;;  %v6553_v19 = vld [vmem:[%s10109_s3 + $0x14] ss:$8 sps:$4 sm:$0xff]   ;;  %v6548_v22 = vld [vmem:[%s10109_s3 + $0x890] ss:$8 sps:$4 sm:$0xff]  }
  0x70   :  { %1357 = vmatprep.subr.bf16.mxu1 %v6487_v23  ;;  %v6551_v23 = vld [vmem:[%s10109_s3 + $0x10] ss:$8 sps:$4 sm:$0xff]  }
  0x72   :  { %1315 = vmatpush2.bf16.msra.mxu0 %v6482_v24  ;;  %v6556_v24 = vld [vmem:[%s10109_s3 + $0x884] ss:$8 sps:$4 sm:$0xff]  }
  0x73   :  { %1358 = vmatpush2.bf16.msra.mxu1 %v6485_v25  ;;  %1316 = vmatprep.subr.bf16.mxu0 %v6490_v26  ;;  %v6559_v25 = vld [vmem:[%s10109_s3 + $0x4] ss:$8 sps:$4 sm:$0xff]   ;;  %v6554_v26 = vld [vmem:[%s10109_s3 + $0x880] ss:$8 sps:$4 sm:$0xff]  }
  0x74   :  { %1359 = vmatprep.subr.bf16.mxu1 %v6493_v27  ;;  %v6557_v27 = vld [vmem:[%s10109_s3] ss:$8 sps:$4 sm:$0xff]  }
  0x76   :  { %1317 = vmatpush2.bf16.msra.mxu0 %v6488_v28  ;;  %v283_v28 = vld [vmem:[%s10131_s21 + $0x88] sm:$0xff] }
  0x77   :  { %1360 = vmatpush2.bf16.msra.mxu1 %v6491_v29  ;;  %1318 = vmatprep.subr.bf16.mxu0 %v6496_v30  ;;  %v292_v29 = vld [vmem:[%s10131_s21 + $0x1a8] sm:$0xff]  ;;  %v6562_v30 = vld [vmem:[%s10109_s3 + $0xf4] ss:$8 sps:$4 sm:$0xff]  }
  0x78   :  { %1361 = vmatprep.subr.bf16.mxu1 %v6499_v31  ;;  %v6565_v31 = vld [vmem:[%s10109_s3 + $0x174] ss:$8 sps:$4 sm:$0xff]  }
  0x7a   :  { %1319 = vmatpush2.bf16.msra.mxu0 %v6494_v32  ;;  %v8004_v32 = vld [vmem:[%s10131_s21 + $0x10] sm:$0xff] }
  0x7b   :  { %1362 = vmatpush2.bf16.msra.mxu1 %v6497_v33  ;;  %1320 = vmatprep.subr.bf16.mxu0 %v6502_v34  ;;  %v67_v33 = vld [vmem:[%s10131_s21 + $0x18] sm:$0xff]  ;;  %v8012_v34 = vld [vmem:[%s10131_s21 + $0x130] sm:$0xff] }
  0x7c   :  { %1363 = vmatprep.subr.bf16.mxu1 %v6505_v35  ;;  %v76_v35 = vld [vmem:[%s10131_s21 + $0x138] sm:$0xff] }
  0x7e   :  { %1321 = vmatpush2.bf16.msra.mxu0 %v6500_v36  ;;  %v84_v36 = vmul.f32 %v8004_v32, %v8004_v32 }
  0x7f   :  { %1364 = vmatpush2.bf16.msra.mxu1 %v6503_v37  ;;  %1322 = vmatprep.subr.bf16.mxu0 %v6508_v38  ;;  %v85_v37 = vmul.f32 %v67_v33, %v67_v33  ;;  %v93_v38 = vmul.f32 %v8012_v34, %v8012_v34 }
  0x80   :  { %1365 = vmatprep.subr.bf16.mxu1 %v6511_v39  ;;  %v94_v39 = vmul.f32 %v76_v35, %v76_v35 }
  0x82   :  { %1323 = vmatpush2.bf16.msra.mxu0 %v6506_v40  ;;  %v341_v40 = vpack.c.bf16 %v292_v29, %v283_v28  ;;  %v6625_v28 = vld [vmem:[%s10109_s3 + $0x254] ss:$8 sps:$4 sm:$0xff]   ;;  %v6620_v29 = vld [vmem:[%s10109_s3 + $0x1d0] ss:$8 sps:$4 sm:$0xff]  }
  0x83   :  { %1366 = vmatpush2.bf16.msra.mxu1 %v6509_v41  ;;  %1378 = vmatprep.subr.bf16.mxu0 %v6514_v44  ;;  %v101_v41 = vadd.f32 %v100_v6, %v84_v36  ;;  %v111_v44 = vadd.f32 %v110_v7, %v93_v38  ;;  %v6593_v6 = vld [vmem:[%s10109_s3 + $0x120] ss:$8 sps:$4 sm:$0xff]   ;;  %v6598_v7 = vld [vmem:[%s10109_s3 + $0x94] ss:$8 sps:$4 sm:$0xff]  }
  0x84   :  { %2141 = vmatprep.subr.bf16.mxu1 %v6517_v45  ;;  %v6568_v45 = vld [vmem:[%s10109_s3 + $0xe4] ss:$8 sps:$4 sm:$0xff]   ;;  %v6629_v36 = vld [vmem:[%s10109_s3 + $0x240] ss:$8 sps:$4 sm:$0xff]   ;;  %v6637_v38 = vld [vmem:[%s10109_s3 + $0x234] ss:$8 sps:$4 sm:$0xff]  }
  0x85   :  { %1325 = vmatmul.mubr.bf16.vlgmr.msra.gmra.mxu0 %v337_v46  ;;  %v6571_v46 = vld [vmem:[%s10109_s3 + $0x164] ss:$8 sps:$4 sm:$0xff]  }
  0x86   :  { %1368 = vmatmul.mubr.bf16.vlgmr.msra.gmra.mxu1 %v339_v47  ;;  %1379 = vmatpush1.bf16.msra.mxu0 %v6512_v48  ;;  %v8033_v47 = vadd.f32 %v101_v41, %v85_v37  ;;  %v8035_v48 = vadd.f32 %v111_v44, %v94_v39  ;;  %v6634_v37 = vld [vmem:[%s10109_s3 + $0x1b4] ss:$8 sps:$4 sm:$0xff]   ;;  %v6632_v39 = vld [vmem:[%s10109_s3 + $0x1b0] ss:$8 sps:$4 sm:$0xff]   ;;  %v6640_v41 = vld [vmem:[%s10109_s3 + $0x1a4] ss:$8 sps:$4 sm:$0xff]  }
  0x87   :  { %2142 = vmatpush1.bf16.msra.mxu1 %v6515_v49  ;;  %1380 = vmatprep.subr.bf16.mxu0 %v6520_v50  ;;  %v125_v49 = vpack.c.bf16 %v76_v35, %v67_v33  ;;  %v6566_v50 = vld [vmem:[%s10109_s3 + $0xe0] ss:$8 sps:$4 sm:$0xff]   ;;  %v6631_v33 = vld [vmem:[%s10109_s3 + $0x244] ss:$8 sps:$4 sm:$0xff]  }
  0x88   :  { %2143 = vmatprep.subr.bf16.mxu1 %v6523_v2  ;;  %1410 = vmatprep.mubr.bf16.mxu0 %v7305_v54  ;;  %v6569_v2 = vld [vmem:[%s10109_s3 + $0x160] ss:$8 sps:$4 sm:$0xff]  }
  0x89   :  { %2173 = vmatprep.mubr.bf16.mxu1 %v123_v1  ;;  %v6592_v1 = vld [vmem:[%s10109_s3 + $0xa4] ss:$8 sps:$4 sm:$0xff]   ;;  %v6626_v35 = vld [vmem:[%s10109_s3 + $0x1c0] ss:$8 sps:$4 sm:$0xff]  }
  0x8a   :  { %1381 = vmatpush1.bf16.msra.mxu0 %v6518_v5  ;;  %v6574_v5 = vld [vmem:[%s10109_s3 + $0xd4] ss:$8 sps:$4 sm:$0xff]   ;;  %v6641_v44 = vld [vmem:[%s10109_s3 + $0x220] ss:$8 sps:$4 sm:$0xff]  }
  0x8b   :  { %2144 = vmatpush1.bf16.msra.mxu1 %v6521_v51  ;;  %1382 = vmatprep.subr.bf16.mxu0 %v6526_v52  ;;  %v6577_v51 = vld [vmem:[%s10109_s3 + $0x154] ss:$8 sps:$4 sm:$0xff]   ;;  %v6572_v52 = vld [vmem:[%s10109_s3 + $0xd0] ss:$8 sps:$4 sm:$0xff]  }
  0x8c   :  { %2145 = vmatprep.subr.bf16.mxu1 %v6529_v53  ;;  %v6575_v53 = vld [vmem:[%s10109_s3 + $0x150] ss:$8 sps:$4 sm:$0xff]  }
  0x8e   :  { %1383 = vmatpush1.bf16.msra.mxu0 %v6524_v62  ;;  %v6589_v62 = vld [vmem:[%s10109_s3 + $0x134] ss:$8 sps:$4 sm:$0xff]  }
  0x8f   :  { %2146 = vmatpush1.bf16.msra.mxu1 %v6527_v63  ;;  %1384 = vmatprep.subr.bf16.mxu0 %v6532_v3  ;;  %v6584_v63 = vld [vmem:[%s10109_s3 + $0xb0] ss:$8 sps:$4 sm:$0xff]   ;;  %v6595_v3 = vld [vmem:[%s10109_s3 + $0x124] ss:$8 sps:$4 sm:$0xff]  }
  0x90   :  { %2147 = vmatprep.subr.bf16.mxu1 %v6535_v4  ;;  %v6590_v4 = vld [vmem:[%s10109_s3 + $0xa0] ss:$8 sps:$4 sm:$0xff]  }
  0x92   :  { %1385 = vmatpush1.bf16.msra.mxu0 %v6530_v8  ;;  %v6601_v8 = vld [vmem:[%s10109_s3 + $0x114] ss:$8 sps:$4 sm:$0xff]  }
  0x93   :  { %2148 = vmatpush1.bf16.msra.mxu1 %v6533_v9  ;;  %1386 = vmatprep.subr.bf16.mxu0 %v6538_v10  ;;  %v6596_v9 = vld [vmem:[%s10109_s3 + $0x90] ss:$8 sps:$4 sm:$0xff]  }
  0x94   :  { %2149 = vmatprep.subr.bf16.mxu1 %v6541_v11  ;;  %v6599_v10 = vld [vmem:[%s10109_s3 + $0x110] ss:$8 sps:$4 sm:$0xff]   ;;  %v6604_v11 = vld [vmem:[%s10109_s3 + $0x84] ss:$8 sps:$4 sm:$0xff]  }
  0x96   :  { %1387 = vmatpush1.bf16.msra.mxu0 %v6536_v12  ;;  %v6607_v12 = vld [vmem:[%s10109_s3 + $0x104] ss:$8 sps:$4 sm:$0xff]  }
  0x97   :  { %2150 = vmatpush1.bf16.msra.mxu1 %v6539_v13  ;;  %1388 = vmatprep.subr.bf16.mxu0 %v6544_v14  ;;  %v6602_v13 = vld [vmem:[%s10109_s3 + $0x80] ss:$8 sps:$4 sm:$0xff]  }
  0x98   :  { %2151 = vmatprep.subr.bf16.mxu1 %v6547_v15  ;;  %v6605_v14 = vld [vmem:[%s10109_s3 + $0x100] ss:$8 sps:$4 sm:$0xff]   ;;  %v6610_v15 = vld [vmem:[%s10109_s3 + $0x1f4] ss:$8 sps:$4 sm:$0xff]  }
  0x9a   :  { %1389 = vmatpush1.bf16.msra.mxu0 %v6542_v16  ;;  %v6613_v16 = vld [vmem:[%s10109_s3 + $0x274] ss:$8 sps:$4 sm:$0xff]  }
  0x9b   :  { %2152 = vmatpush1.bf16.msra.mxu1 %v6545_v17  ;;  %1390 = vmatprep.subr.bf16.mxu0 %v6550_v18  ;;  %v69_v17 = vld [vmem:[%s10131_s21 + $0x28] sm:$0xff]  ;;  %v122_v18 = vpack.c.bf16 %v7914_v57, %v7906_v55 }
  0x9c   :  { %2153 = vmatprep.subr.bf16.mxu1 %v6553_v19  ;;  %v78_v19 = vld [vmem:[%s10131_s21 + $0x148] sm:$0xff] }
  0x9d   :  { %v6616_v55 = vld [vmem:[%s10109_s3 + $0x1e4] ss:$8 sps:$4 sm:$0xff]  }
  0x9e   :  { %1391 = vmatpush1.bf16.msra.mxu0 %v6548_v22  ;;  %v6608_v22 = vld [vmem:[%s10109_s3 + $0x1f0] ss:$8 sps:$4 sm:$0xff]   ;;  %v6619_v57 = vld [vmem:[%s10109_s3 + $0x264] ss:$8 sps:$4 sm:$0xff]  }
  0x9f   :  { %2154 = vmatpush1.bf16.msra.mxu1 %v6551_v23  ;;  %1392 = vmatprep.subr.bf16.mxu0 %v6556_v24  ;;  %v6611_v23 = vld [vmem:[%s10109_s3 + $0x270] ss:$8 sps:$4 sm:$0xff]   ;;  %v127_v24 = vpack.c.bf16 %v78_v19, %v69_v17  ;;  %v6691_v17 = vld [vmem:[%s10109_s3 + $0x324] ss:$8 sps:$4 sm:$0xff]   ;;  %v6689_v19 = vld [vmem:[%s10109_s3 + $0x320] ss:$8 sps:$4 sm:$0xff]  }
  0xa0   :  { %2155 = vmatprep.subr.bf16.mxu1 %v6559_v25  ;;  %v6614_v25 = vld [vmem:[%s10109_s3 + $0x1e0] ss:$8 sps:$4 sm:$0xff]  }
  0xa2   :  { %1393 = vmatpush1.bf16.msra.mxu0 %v6554_v26  ;;  %v6617_v26 = vld [vmem:[%s10109_s3 + $0x260] ss:$8 sps:$4 sm:$0xff]  }
  0xa3   :  { %2156 = vmatpush1.bf16.msra.mxu1 %v6557_v27  ;;  %2184 = vmatprep.subr.bf16.mxu0 %v6565_v31  ;;  %v6622_v27 = vld [vmem:[%s10109_s3 + $0x1d4] ss:$8 sps:$4 sm:$0xff]   ;;  %v6628_v31 = vld [vmem:[%s10109_s3 + $0x1c4] ss:$8 sps:$4 sm:$0xff]  }
  0xa4   :  { %2157 = vmatprep.subr.bf16.mxu1 %v6562_v30  ;;  %v6623_v30 = vld [vmem:[%s10109_s3 + $0x250] ss:$8 sps:$4 sm:$0xff]  }
  0xa5   :  { %1411 = vmatmul.mubr.bf16.vlgmr.msra.gmra.mxu0 %v341_v40  ;;  %v6635_v40 = vld [vmem:[%s10109_s3 + $0x230] ss:$8 sps:$4 sm:$0xff]  }
  0xa6   :  { %2185 = vmatpush1.bf16.msra.mxu0 %v6563_v43  ;;  %2216 = vmatprep.mubr.bf16.mxu0 %v125_v49  ;;  %v6638_v43 = vld [vmem:[%s10109_s3 + $0x1a0] ss:$8 sps:$4 sm:$0xff]   ;;  %v6644_v49 = vld [vmem:[%s10109_s3 + $0x190] ss:$8 sps:$4 sm:$0xff]  }
  0xa7   :  { %2158 = vmatpush2.bf16.msra.mxu1 %v6560_v42  ;;  %2186 = vmatprep.subr.bf16.mxu0 %v6571_v46  ;;  %v6643_v42 = vld [vmem:[%s10109_s3 + $0x224] ss:$8 sps:$4 sm:$0xff]   ;;  %v6649_v46 = vld [vmem:[%s10109_s3 + $0x214] ss:$8 sps:$4 sm:$0xff]  }
  0xa8   :  { %2159 = vmatprep.subr.bf16.mxu1 %v6568_v45  ;;  %v6646_v45 = vld [vmem:[%s10109_s3 + $0x194] ss:$8 sps:$4 sm:$0xff]  }
  0xaa   :  { %2187 = vmatpush1.bf16.msra.mxu0 %v6569_v2  ;;  %v6652_v2 = vld [vmem:[%s10109_s3 + $0x184] ss:$8 sps:$4 sm:$0xff]  }
  0xab   :  { %2160 = vmatpush2.bf16.msra.mxu1 %v6566_v50  ;;  %2188 = vmatprep.subr.bf16.mxu0 %v6577_v51  ;;  %v6647_v50 = vld [vmem:[%s10109_s3 + $0x210] ss:$8 sps:$4 sm:$0xff]   ;;  %v6650_v51 = vld [vmem:[%s10109_s3 + $0x180] ss:$8 sps:$4 sm:$0xff]  }
  0xac   :  { %2161 = vmatprep.subr.bf16.mxu1 %v6574_v5  ;;  %v6655_v5 = vld [vmem:[%s10109_s3 + $0x204] ss:$8 sps:$4 sm:$0xff]  }
  0xae   :  { %2189 = vmatpush1.bf16.msra.mxu0 %v6575_v53  ;;  %v6658_v53 = vld [vmem:[%s10109_s3 + $0x2f4] ss:$8 sps:$4 sm:$0xff]  }
  0xaf   :  { %2162 = vmatpush2.bf16.msra.mxu1 %v6572_v52  ;;  %2190 = vmatprep.subr.bf16.mxu0 %v6583_v58  ;;  %v6653_v52 = vld [vmem:[%s10109_s3 + $0x200] ss:$8 sps:$4 sm:$0xff]   ;;  %v6656_v58 = vld [vmem:[%s10109_s3 + $0x2f0] ss:$8 sps:$4 sm:$0xff]  }
  0xb0   :  { %2163 = vmatprep.subr.bf16.mxu1 %v6580_v56  ;;  %v6661_v56 = vld [vmem:[%s10109_s3 + $0x374] ss:$8 sps:$4 sm:$0xff]  }
  0xb2   :  { %2191 = vmatpush1.bf16.msra.mxu0 %v6581_v60  ;;  %v124_v60 = vpack.c.bf16 %v8012_v34, %v8004_v32  ;;  %v6667_v32 = vld [vmem:[%s10109_s3 + $0x364] ss:$8 sps:$4 sm:$0xff]  }
  0xb3   :  { %2164 = vmatpush2.bf16.msra.mxu1 %v6578_v59  ;;  %2192 = vmatprep.subr.bf16.mxu0 %v6589_v62  ;;  %v6659_v59 = vld [vmem:[%s10109_s3 + $0x370] ss:$8 sps:$4 sm:$0xff]  }
  0xb4   :  { %2165 = vmatprep.subr.bf16.mxu1 %v6586_v61  ;;  %v71_v61 = vld [vmem:[%s10131_s21 + $0x38] sm:$0xff] }
  0xb5   :  { %v80_v62 = vld [vmem:[%s10131_s21 + $0x158] sm:$0xff] }
  0xb6   :  { %2193 = vmatpush1.bf16.msra.mxu0 %v6587_v0  ;;  %v129_v34 = vpack.c.bf16 %v80_v62, %v71_v61  ;;  %v6662_v0 = vld [vmem:[%s10109_s3 + $0x2e0] ss:$8 sps:$4 sm:$0xff]   ;;  %v6707_v61 = vld [vmem:[%s10109_s3 + $0x470] ss:$8 sps:$4 sm:$0xff]   ;;  %v6712_v62 = vld [vmem:[%s10109_s3 + $0x3e4] ss:$8 sps:$4 sm:$0xff]  }
  0xb7   :  { %2166 = vmatpush2.bf16.msra.mxu1 %v6584_v63  ;;  %2194 = vmatprep.subr.bf16.mxu0 %v6595_v3  ;;  %v6664_v63 = vld [vmem:[%s10109_s3 + $0x2e4] ss:$8 sps:$4 sm:$0xff]   ;;  %v6670_v3 = vld [vmem:[%s10109_s3 + $0x2d4] ss:$8 sps:$4 sm:$0xff]  }
  0xb8   :  { %2167 = vmatprep.subr.bf16.mxu1 %v6592_v1  ;;  %v6665_v1 = vld [vmem:[%s10109_s3 + $0x360] ss:$8 sps:$4 sm:$0xff]  }
  0xba   :  { %2195 = vmatpush1.bf16.msra.mxu0 %v6593_v6  ;;  %v6668_v6 = vld [vmem:[%s10109_s3 + $0x2d0] ss:$8 sps:$4 sm:$0xff]  }
  0xbb   :  { %2168 = vmatpush2.bf16.msra.mxu1 %v6590_v4  ;;  %2196 = vmatprep.subr.bf16.mxu0 %v6601_v8  ;;  %v6673_v4 = vld [vmem:[%s10109_s3 + $0x354] ss:$8 sps:$4 sm:$0xff]   ;;  %v6676_v8 = vld [vmem:[%s10109_s3 + $0x2c4] ss:$8 sps:$4 sm:$0xff]  }
  0xbc   :  { %2169 = vmatprep.subr.bf16.mxu1 %v6598_v7  ;;  %v6671_v7 = vld [vmem:[%s10109_s3 + $0x350] ss:$8 sps:$4 sm:$0xff]  }
  0xbe   :  { %2197 = vmatpush1.bf16.msra.mxu0 %v6599_v10  ;;  %v6674_v10 = vld [vmem:[%s10109_s3 + $0x2c0] ss:$8 sps:$4 sm:$0xff]  }
  0xbf   :  { %2170 = vmatpush2.bf16.msra.mxu1 %v6596_v9  ;;  %2198 = vmatprep.subr.bf16.mxu0 %v6607_v12  ;;  %v6679_v9 = vld [vmem:[%s10109_s3 + $0x344] ss:$8 sps:$4 sm:$0xff]   ;;  %v6682_v12 = vld [vmem:[%s10109_s3 + $0x2b4] ss:$8 sps:$4 sm:$0xff]  }
  0xc0   :  { %2171 = vmatprep.subr.bf16.mxu1 %v6604_v11  ;;  %v6677_v11 = vld [vmem:[%s10109_s3 + $0x340] ss:$8 sps:$4 sm:$0xff]  }
  0xc2   :  { %2199 = vmatpush1.bf16.msra.mxu0 %v6605_v14  ;;  %v6680_v14 = vld [vmem:[%s10109_s3 + $0x2b0] ss:$8 sps:$4 sm:$0xff]  }
  0xc3   :  { %2172 = vmatpush2.bf16.msra.mxu1 %v6602_v13  ;;  %2200 = vmatprep.subr.bf16.mxu0 %v6610_v15  ;;  %v6685_v13 = vld [vmem:[%s10109_s3 + $0x334] ss:$8 sps:$4 sm:$0xff]   ;;  %v6683_v15 = vld [vmem:[%s10109_s3 + $0x330] ss:$8 sps:$4 sm:$0xff]  }
  0xc4   :  { %2227 = vmatprep.subr.bf16.mxu1 %v6613_v16  ;;  %v6688_v16 = vld [vmem:[%s10109_s3 + $0x2a4] ss:$8 sps:$4 sm:$0xff]  }
  0xc6   :  { %2174 = vmatmul.mubr.bf16.vlgmr.msra.gmra.mxu1 %v122_v18  ;;  %2201 = vmatpush2.bf16.msra.mxu0 %v6608_v22  ;;  %v6686_v18 = vld [vmem:[%s10109_s3 + $0x2a0] ss:$8 sps:$4 sm:$0xff]   ;;  %v6694_v22 = vld [vmem:[%s10109_s3 + $0x294] ss:$8 sps:$4 sm:$0xff]  }
  0xc7   :  { %2228 = vmatpush1.bf16.msra.mxu1 %v6611_v23  ;;  %2202 = vmatprep.subr.bf16.mxu0 %v6616_v55  ;;  %v6697_v23 = vld [vmem:[%s10109_s3 + $0x314] ss:$8 sps:$4 sm:$0xff]   ;;  %v6692_v55 = vld [vmem:[%s10109_s3 + $0x290] ss:$8 sps:$4 sm:$0xff]  }
  0xc8   :  { %2229 = vmatprep.subr.bf16.mxu1 %v6619_v57  ;;  %2259 = vmatprep.mubr.bf16.mxu1 %v127_v24  ;;  %v6695_v57 = vld [vmem:[%s10109_s3 + $0x310] ss:$8 sps:$4 sm:$0xff]  }
  0xc9   :  { %v8314_v24 = vld [vmem:[%s10131_s21 + $0x90] sm:$0xff] }
  0xca   :  { %2203 = vmatpush2.bf16.msra.mxu0 %v6614_v25  ;;  %v6700_v25 = vld [vmem:[%s10109_s3 + $0x284] ss:$8 sps:$4 sm:$0xff]  }
  0xcb   :  { %2230 = vmatpush1.bf16.msra.mxu1 %v6617_v26  ;;  %2204 = vmatprep.subr.bf16.mxu0 %v6622_v27  ;;  %v6703_v26 = vld [vmem:[%s10109_s3 + $0x304] ss:$8 sps:$4 sm:$0xff]   ;;  %v8325_v27 = vld [vmem:[%s10131_s21 + $0x98] sm:$0xff] }
  0xcc   :  { %2231 = vmatprep.subr.bf16.mxu1 %v6625_v28  ;;  %v8330_v28 = vld [vmem:[%s10131_s21 + $0x1b0] sm:$0xff] }
  0xce   :  { %2205 = vmatpush2.bf16.msra.mxu0 %v6620_v29  ;;  %v8335_v29 = vld [vmem:[%s10131_s21 + $0x1b8] sm:$0xff] }
  0xcf   :  { %2232 = vmatpush1.bf16.msra.mxu1 %v6623_v30  ;;  %2206 = vmatprep.subr.bf16.mxu0 %v6628_v31  ;;  %v2374_v30 = vmul.f32 %v8314_v24, %v8314_v24  ;;  %v2375_v31 = vmul.f32 %v8325_v27, %v8325_v27 }
  0xd0   :  { %2233 = vmatprep.subr.bf16.mxu1 %v6631_v33  ;;  %v2383_v33 = vmul.f32 %v8330_v28, %v8330_v28 }
  0xd2   :  { %2207 = vmatpush2.bf16.msra.mxu0 %v6626_v35  ;;  %v2384_v35 = vmul.f32 %v8335_v29, %v8335_v29 }
  0xd3   :  { %2234 = vmatpush1.bf16.msra.mxu1 %v6629_v36  ;;  %2208 = vmatprep.subr.bf16.mxu0 %v6634_v37  ;;  %v8348_v36 = vld [vmem:[%s10131_s21 + $0xa0] sm:$0xff]  ;;  %v8353_v37 = vld [vmem:[%s10131_s21 + $0xa8] sm:$0xff] }
  0xd4   :  { %2235 = vmatprep.subr.bf16.mxu1 %v6637_v38  ;;  %v8358_v38 = vld [vmem:[%s10131_s21 + $0x1c0] sm:$0xff] }
  0xd6   :  { %2209 = vmatpush2.bf16.msra.mxu0 %v6632_v39  ;;  %v8363_v39 = vld [vmem:[%s10131_s21 + $0x1c8] sm:$0xff] }
  0xd7   :  { %2236 = vmatpush1.bf16.msra.mxu1 %v6635_v40  ;;  %2210 = vmatprep.subr.bf16.mxu0 %v6640_v41  ;;  %v2376_v40 = vmul.f32 %v8348_v36, %v8348_v36  ;;  %v2377_v41 = vmul.f32 %v8353_v37, %v8353_v37 }
  0xd8   :  { %2237 = vmatprep.subr.bf16.mxu1 %v6643_v42  ;;  %v6698_v42 = vld [vmem:[%s10109_s3 + $0x280] ss:$8 sps:$4 sm:$0xff]  }
  0xda   :  { %2211 = vmatpush2.bf16.msra.mxu0 %v6638_v43  ;;  %v6701_v43 = vld [vmem:[%s10109_s3 + $0x300] ss:$8 sps:$4 sm:$0xff]  }
  0xdb   :  { %2238 = vmatpush1.bf16.msra.mxu1 %v6641_v44  ;;  %2212 = vmatprep.subr.bf16.mxu0 %v6646_v45  ;;  %v2392_v44 = vadd.f32 %v2375_v31, %v2374_v30  ;;  %v2402_v45 = vadd.f32 %v2384_v35, %v2383_v33  ;;  %v70_v30 = vld [vmem:[%s10131_s21 + $0x30] sm:$0xff]  ;;  %v72_v33 = vld [vmem:[%s10131_s21 + $0x40] sm:$0xff] }
  0xdc   :  { %2239 = vmatprep.subr.bf16.mxu1 %v6649_v46  ;;  %v2385_v46 = vmul.f32 %v8358_v38, %v8358_v38  ;;  %v79_v31 = vld [vmem:[%s10131_s21 + $0x150] sm:$0xff]  ;;  %v81_v35 = vld [vmem:[%s10131_s21 + $0x160] sm:$0xff] }
  0xde   :  { %2213 = vmatpush2.bf16.msra.mxu0 %v6644_v49  ;;  %v2386_v49 = vmul.f32 %v8363_v39, %v8363_v39 }
  0xdf   :  { %2240 = vmatpush1.bf16.msra.mxu1 %v6647_v50  ;;  %2214 = vmatprep.subr.bf16.mxu0 %v6652_v2  ;;  %v68_v50 = vld [vmem:[%s10131_s21 + $0x20] sm:$0xff] }
  0xe0   :  { %2241 = vmatprep.subr.bf16.mxu1 %v6655_v5  ;;  %v77_v2 = vld [vmem:[%s10131_s21 + $0x140] sm:$0xff]  ;;  %v6706_v5 = vld [vmem:[%s10109_s3 + $0x3f4] ss:$8 sps:$4 sm:$0xff]  }
  0xe2   :  { %2215 = vmatpush2.bf16.msra.mxu0 %v6650_v51  ;;  %v2393_v51 = vadd.f32 %v2392_v44, %v2376_v40  ;;  %v6754_v40 = vld [vmem:[%s10109_s3 + $0x974] ss:$8 sps:$4 sm:$0xff]   ;;  %v6752_v44 = vld [vmem:[%s10109_s3 + $0x970] ss:$8 sps:$4 sm:$0xff]  }
  0xe3   :  { %2242 = vmatpush1.bf16.msra.mxu1 %v6653_v52  ;;  %2270 = vmatprep.subr.bf16.mxu0 %v6661_v56  ;;  %v2403_v52 = vadd.f32 %v2402_v45, %v2385_v46  ;;  %v6755_v45 = vld [vmem:[%s10109_s3 + $0xa70] ss:$8 sps:$4 sm:$0xff]   ;;  %v6760_v46 = vld [vmem:[%s10109_s3 + $0x964] ss:$8 sps:$4 sm:$0xff]  }
  0xe4   :  { %2243 = vmatprep.subr.bf16.mxu1 %v6658_v53  ;;  %v6709_v53 = vld [vmem:[%s10109_s3 + $0x474] ss:$8 sps:$4 sm:$0xff]   ;;  %v8391_v56 = vadd.f32 %v2393_v51, %v2377_v41  ;;  %v6761_v51 = vld [vmem:[%s10109_s3 + $0xa60] ss:$8 sps:$4 sm:$0xff]  }
  0xe5   :  { %2217 = vmatmul.mubr.bf16.vlgmr.msra.gmra.mxu0 %v124_v60  ;;  %v6704_v60 = vld [vmem:[%s10109_s3 + $0x3f0] ss:$8 sps:$4 sm:$0xff]   ;;  %v6757_v41 = vld [vmem:[%s10109_s3 + $0xa74] ss:$8 sps:$4 sm:$0xff]  }
  0xe6   :  { %2271 = vmatpush1.bf16.msra.mxu0 %v6659_v59  ;;  %2302 = vmatprep.mubr.bf16.mxu0 %v129_v34  ;;  %v126_v59 = vpack.c.bf16 %v77_v2, %v68_v50  ;;  %v6713_v34 = vld [vmem:[%s10109_s3 + $0x460] ss:$8 sps:$4 sm:$0xff]   ;;  %v2415_v50 = vpack.c.bf16 %v8335_v29, %v8325_v27  ;;  %v2417_v2 = vpack.c.bf16 %v8363_v39, %v8353_v37  ;;  %v6766_v27 = vld [vmem:[%s10109_s3 + $0x954] ss:$8 sps:$4 sm:$0xff]   ;;  %v6764_v37 = vld [vmem:[%s10109_s3 + $0x950] ss:$8 sps:$4 sm:$0xff]  }
  0xe7   :  { %2244 = vmatpush2.bf16.msra.mxu1 %v6656_v58  ;;  %2272 = vmatprep.subr.bf16.mxu0 %v6667_v32  ;;  %v8393_v58 = vadd.f32 %v2403_v52, %v2386_v49  ;;  %v6710_v32 = vld [vmem:[%s10109_s3 + $0x3e0] ss:$8 sps:$4 sm:$0xff]   ;;  %v6763_v49 = vld [vmem:[%s10109_s3 + $0xa64] ss:$8 sps:$4 sm:$0xff]   ;;  %v6769_v29 = vld [vmem:[%s10109_s3 + $0xa54] ss:$8 sps:$4 sm:$0xff]  }
  0xe8   :  { %2245 = vmatprep.subr.bf16.mxu1 %v6664_v63  ;;  %v6715_v63 = vld [vmem:[%s10109_s3 + $0x464] ss:$8 sps:$4 sm:$0xff]   ;;  %v6767_v39 = vld [vmem:[%s10109_s3 + $0xa50] ss:$8 sps:$4 sm:$0xff]  }
  0xe9   :  { %v6772_v52 = vld [vmem:[%s10109_s3 + $0x944] ss:$8 sps:$4 sm:$0xff]  }
  0xea   :  { %2273 = vmatpush1.bf16.msra.mxu0 %v6665_v1  ;;  %v6721_v1 = vld [vmem:[%s10109_s3 + $0x454] ss:$8 sps:$4 sm:$0xff]  }
  0xeb   :  { %2246 = vmatpush2.bf16.msra.mxu1 %v6662_v0  ;;  %2274 = vmatprep.subr.bf16.mxu0 %v6673_v4  ;;  %v6718_v0 = vld [vmem:[%s10109_s3 + $0x3d4] ss:$8 sps:$4 sm:$0xff]   ;;  %v6719_v4 = vld [vmem:[%s10109_s3 + $0x450] ss:$8 sps:$4 sm:$0xff]  }
  0xec   :  { %2247 = vmatprep.subr.bf16.mxu1 %v6670_v3  ;;  %v6716_v3 = vld [vmem:[%s10109_s3 + $0x3d0] ss:$8 sps:$4 sm:$0xff]  }
  0xee   :  { %2275 = vmatpush1.bf16.msra.mxu0 %v6671_v7  ;;  %v6727_v7 = vld [vmem:[%s10109_s3 + $0x444] ss:$8 sps:$4 sm:$0xff]  }
  0xef   :  { %2248 = vmatpush2.bf16.msra.mxu1 %v6668_v6  ;;  %2276 = vmatprep.subr.bf16.mxu0 %v6679_v9  ;;  %v6724_v6 = vld [vmem:[%s10109_s3 + $0x3c4] ss:$8 sps:$4 sm:$0xff]   ;;  %v6725_v9 = vld [vmem:[%s10109_s3 + $0x440] ss:$8 sps:$4 sm:$0xff]  }
  0xf0   :  { %2249 = vmatprep.subr.bf16.mxu1 %v6676_v8  ;;  %v6722_v8 = vld [vmem:[%s10109_s3 + $0x3c0] ss:$8 sps:$4 sm:$0xff]  }
  0xf2   :  { %2277 = vmatpush1.bf16.msra.mxu0 %v6677_v11  ;;  %v6733_v11 = vld [vmem:[%s10109_s3 + $0x434] ss:$8 sps:$4 sm:$0xff]  }
  0xf3   :  { %2250 = vmatpush2.bf16.msra.mxu1 %v6674_v10  ;;  %2278 = vmatprep.subr.bf16.mxu0 %v6685_v13  ;;  %v6730_v10 = vld [vmem:[%s10109_s3 + $0x3b4] ss:$8 sps:$4 sm:$0xff]   ;;  %v6731_v13 = vld [vmem:[%s10109_s3 + $0x430] ss:$8 sps:$4 sm:$0xff]  }
  0xf4   :  { %2251 = vmatprep.subr.bf16.mxu1 %v6682_v12  ;;  %v6728_v12 = vld [vmem:[%s10109_s3 + $0x3b0] ss:$8 sps:$4 sm:$0xff]  }
  0xf6   :  { %2279 = vmatpush1.bf16.msra.mxu0 %v6683_v15  ;;  %v6739_v15 = vld [vmem:[%s10109_s3 + $0x424] ss:$8 sps:$4 sm:$0xff]  }
  0xf7   :  { %2252 = vmatpush2.bf16.msra.mxu1 %v6680_v14  ;;  %2280 = vmatprep.subr.bf16.mxu0 %v6691_v17  ;;  %v6736_v14 = vld [vmem:[%s10109_s3 + $0x3a4] ss:$8 sps:$4 sm:$0xff]   ;;  %v6737_v17 = vld [vmem:[%s10109_s3 + $0x420] ss:$8 sps:$4 sm:$0xff]  }
  0xf8   :  { %2253 = vmatprep.subr.bf16.mxu1 %v6688_v16  ;;  %v6734_v16 = vld [vmem:[%s10109_s3 + $0x3a0] ss:$8 sps:$4 sm:$0xff]  }
  0xfa   :  { %2281 = vmatpush1.bf16.msra.mxu0 %v6689_v19  ;;  %v6745_v19 = vld [vmem:[%s10109_s3 + $0x414] ss:$8 sps:$4 sm:$0xff]  }
  0xfb   :  { %2254 = vmatpush2.bf16.msra.mxu1 %v6686_v18  ;;  %2282 = vmatprep.subr.bf16.mxu0 %v6697_v23  ;;  %v6742_v18 = vld [vmem:[%s10109_s3 + $0x394] ss:$8 sps:$4 sm:$0xff]   ;;  %v6743_v23 = vld [vmem:[%s10109_s3 + $0x410] ss:$8 sps:$4 sm:$0xff]  }
  0xfc   :  { %2255 = vmatprep.subr.bf16.mxu1 %v6694_v22  ;;  %v6740_v22 = vld [vmem:[%s10109_s3 + $0x390] ss:$8 sps:$4 sm:$0xff]  }
  0xfe   :  { %2283 = vmatpush1.bf16.msra.mxu0 %v6695_v57  ;;  %v6751_v57 = vld [vmem:[%s10109_s3 + $0x404] ss:$8 sps:$4 sm:$0xff]  }
  0xff   :  { %2256 = vmatpush2.bf16.msra.mxu1 %v6692_v55  ;;  %2284 = vmatprep.subr.bf16.mxu0 %v6703_v26  ;;  %v6748_v55 = vld [vmem:[%s10109_s3 + $0x384] ss:$8 sps:$4 sm:$0xff]   ;;  %v6749_v26 = vld [vmem:[%s10109_s3 + $0x400] ss:$8 sps:$4 sm:$0xff]  }
 0x100   :  { %2257 = vmatprep.subr.bf16.mxu1 %v6700_v25  ;;  %v6746_v25 = vld [vmem:[%s10109_s3 + $0x380] ss:$8 sps:$4 sm:$0xff]  }
 0x102   :  { %2285 = vmatpush1.bf16.msra.mxu0 %v6701_v43  ;;  %v130_v43 = vpack.c.bf16 %v81_v35, %v72_v33  ;;  %v6821_v33 = vld [vmem:[%s10109_s3 + $0xac0] ss:$8 sps:$4 sm:$0xff]   ;;  %v6826_v35 = vld [vmem:[%s10109_s3 + $0x9b4] ss:$8 sps:$4 sm:$0xff]  }
 0x103   :  { %2258 = vmatpush2.bf16.msra.mxu1 %v6698_v42  ;;  %2286 = vmatprep.subr.bf16.mxu0 %v6706_v5  ;;  %v128_v42 = vpack.c.bf16 %v79_v31, %v70_v30  ;;  %v6758_v5 = vld [vmem:[%s10109_s3 + $0x960] ss:$8 sps:$4 sm:$0xff]   ;;  %v6823_v30 = vld [vmem:[%s10109_s3 + $0xac4] ss:$8 sps:$4 sm:$0xff]  }
 0x104   :  { %2313 = vmatprep.subr.bf16.mxu1 %v6709_v53  ;;  %v6775_v53 = vld [vmem:[%s10109_s3 + $0xa44] ss:$8 sps:$4 sm:$0xff]   ;;  %v6818_v31 = vld [vmem:[%s10109_s3 + $0x9c0] ss:$8 sps:$4 sm:$0xff]  }
 0x106   :  { %2260 = vmatmul.mubr.bf16.vlgmr.msra.gmra.mxu1 %v126_v59  ;;  %2287 = vmatpush2.bf16.msra.mxu0 %v6704_v60  ;;  %v6770_v59 = vld [vmem:[%s10109_s3 + $0x940] ss:$8 sps:$4 sm:$0xff]  }
 0x107   :  { %2314 = vmatpush1.bf16.msra.mxu1 %v6707_v61  ;;  %2288 = vmatprep.subr.bf16.mxu0 %v6712_v62  ;;  %v6773_v60 = vld [vmem:[%s10109_s3 + $0xa40] ss:$8 sps:$4 sm:$0xff]   ;;  %v6778_v61 = vld [vmem:[%s10109_s3 + $0x934] ss:$8 sps:$4 sm:$0xff]  }
 0x108   :  { %2315 = vmatprep.subr.bf16.mxu1 %v6715_v63  ;;  %2345 = vmatprep.mubr.bf16.mxu1 %v7305_v54  ;;  %v6781_v62 = vld [vmem:[%s10109_s3 + $0xa34] ss:$8 sps:$4 sm:$0xff]   ;;  %v6776_v63 = vld [vmem:[%s10109_s3 + $0x930] ss:$8 sps:$4 sm:$0xff]  }
 0x10a   :  { %2289 = vmatpush2.bf16.msra.mxu0 %v6710_v32  ;;  %v6779_v32 = vld [vmem:[%s10109_s3 + $0xa30] ss:$8 sps:$4 sm:$0xff]  }
 0x10b   :  { %2316 = vmatpush1.bf16.msra.mxu1 %v6713_v34  ;;  %2290 = vmatprep.subr.bf16.mxu0 %v6718_v0  ;;  %v6784_v34 = vld [vmem:[%s10109_s3 + $0x924] ss:$8 sps:$4 sm:$0xff]  }
 0x10c   :  { %2317 = vmatprep.subr.bf16.mxu1 %v6721_v1  ;;  %v6787_v0 = vld [vmem:[%s10109_s3 + $0xa24] ss:$8 sps:$4 sm:$0xff]   ;;  %v6782_v1 = vld [vmem:[%s10109_s3 + $0x920] ss:$8 sps:$4 sm:$0xff]  }
 0x10e   :  { %2291 = vmatpush2.bf16.msra.mxu0 %v6716_v3  ;;  %v6785_v3 = vld [vmem:[%s10109_s3 + $0xa20] ss:$8 sps:$4 sm:$0xff]  }
 0x10f   :  { %2318 = vmatpush1.bf16.msra.mxu1 %v6719_v4  ;;  %2292 = vmatprep.subr.bf16.mxu0 %v6724_v6  ;;  %v6790_v4 = vld [vmem:[%s10109_s3 + $0x914] ss:$8 sps:$4 sm:$0xff]  }
 0x110   :  { %2319 = vmatprep.subr.bf16.mxu1 %v6727_v7  ;;  %v6793_v6 = vld [vmem:[%s10109_s3 + $0xa14] ss:$8 sps:$4 sm:$0xff]   ;;  %v6788_v7 = vld [vmem:[%s10109_s3 + $0x910] ss:$8 sps:$4 sm:$0xff]  }
 0x112   :  { %2293 = vmatpush2.bf16.msra.mxu0 %v6722_v8  ;;  %v6791_v8 = vld [vmem:[%s10109_s3 + $0xa10] ss:$8 sps:$4 sm:$0xff]  }
 0x113   :  { %2320 = vmatpush1.bf16.msra.mxu1 %v6725_v9  ;;  %2294 = vmatprep.subr.bf16.mxu0 %v6730_v10  ;;  %v6796_v9 = vld [vmem:[%s10109_s3 + $0x904] ss:$8 sps:$4 sm:$0xff]  }
 0x114   :  { %2321 = vmatprep.subr.bf16.mxu1 %v6733_v11  ;;  %v6799_v10 = vld [vmem:[%s10109_s3 + $0xa04] ss:$8 sps:$4 sm:$0xff]   ;;  %v6794_v11 = vld [vmem:[%s10109_s3 + $0x900] ss:$8 sps:$4 sm:$0xff]  }
 0x116   :  { %2295 = vmatpush2.bf16.msra.mxu0 %v6728_v12  ;;  %v6797_v12 = vld [vmem:[%s10109_s3 + $0xa00] ss:$8 sps:$4 sm:$0xff]  }
 0x117   :  { %2322 = vmatpush1.bf16.msra.mxu1 %v6731_v13  ;;  %2296 = vmatprep.subr.bf16.mxu0 %v6736_v14  ;;  %v6802_v13 = vld [vmem:[%s10109_s3 + $0x9f4] ss:$8 sps:$4 sm:$0xff]  }
 0x118   :  { %2323 = vmatprep.subr.bf16.mxu1 %v6739_v15  ;;  %v6805_v14 = vld [vmem:[%s10109_s3 + $0xaf4] ss:$8 sps:$4 sm:$0xff]   ;;  %v6800_v15 = vld [vmem:[%s10109_s3 + $0x9f0] ss:$8 sps:$4 sm:$0xff]  }
 0x11a   :  { %2297 = vmatpush2.bf16.msra.mxu0 %v6734_v16  ;;  %v6803_v16 = vld [vmem:[%s10109_s3 + $0xaf0] ss:$8 sps:$4 sm:$0xff]  }
 0x11b   :  { %2324 = vmatpush1.bf16.msra.mxu1 %v6737_v17  ;;  %2298 = vmatprep.subr.bf16.mxu0 %v6742_v18  ;;  %v6808_v17 = vld [vmem:[%s10109_s3 + $0x9e4] ss:$8 sps:$4 sm:$0xff]  }
 0x11c   :  { %2325 = vmatprep.subr.bf16.mxu1 %v6745_v19  ;;  %v6811_v18 = vld [vmem:[%s10109_s3 + $0xae4] ss:$8 sps:$4 sm:$0xff]   ;;  %v6806_v19 = vld [vmem:[%s10109_s3 + $0x9e0] ss:$8 sps:$4 sm:$0xff]  }
 0x11e   :  { %2299 = vmatpush2.bf16.msra.mxu0 %v6740_v22  ;;  %v6809_v22 = vld [vmem:[%s10109_s3 + $0xae0] ss:$8 sps:$4 sm:$0xff]  }
 0x11f   :  { %2326 = vmatpush1.bf16.msra.mxu1 %v6743_v23  ;;  %2300 = vmatprep.subr.bf16.mxu0 %v6748_v55  ;;  %v6814_v23 = vld [vmem:[%s10109_s3 + $0x9d4] ss:$8 sps:$4 sm:$0xff]  }
 0x120   :  { %2327 = vmatprep.subr.bf16.mxu1 %v6751_v57  ;;  %v6817_v55 = vld [vmem:[%s10109_s3 + $0xad4] ss:$8 sps:$4 sm:$0xff]   ;;  %v6812_v57 = vld [vmem:[%s10109_s3 + $0x9d0] ss:$8 sps:$4 sm:$0xff]  }
 0x122   :  { %2301 = vmatpush2.bf16.msra.mxu0 %v6746_v25  ;;  %v6815_v25 = vld [vmem:[%s10109_s3 + $0xad0] ss:$8 sps:$4 sm:$0xff]  }
 0x123   :  { %2328 = vmatpush1.bf16.msra.mxu1 %v6749_v26  ;;  %3287 = vmatprep.subr.bf16.mxu0 %v6754_v40  ;;  %v6820_v26 = vld [vmem:[%s10109_s3 + $0x9c4] ss:$8 sps:$4 sm:$0xff]   ;;  %v6829_v40 = vld [vmem:[%s10109_s3 + $0xab4] ss:$8 sps:$4 sm:$0xff]  }
 0x124   :  { %3330 = vmatprep.subr.bf16.mxu1 %v6757_v41  ;;  %v6824_v41 = vld [vmem:[%s10109_s3 + $0x9b0] ss:$8 sps:$4 sm:$0xff]  }
 0x125   :  { %2303 = vmatmul.mubr.bf16.vlgmr.msra.gmra.mxu0 %v128_v42  ;;  %v6827_v42 = vld [vmem:[%s10109_s3 + $0xab0] ss:$8 sps:$4 sm:$0xff]  }
 0x126   :  { %2346 = vmatmul.mubr.bf16.vlgmr.msra.gmra.mxu1 %v130_v43  ;;  %3288 = vmatpush1.bf16.msra.mxu0 %v6752_v44  ;;  %v6832_v43 = vld [vmem:[%s10109_s3 + $0x9a4] ss:$8 sps:$4 sm:$0xff]  }
 0x127   :  { %3331 = vmatpush1.bf16.msra.mxu1 %v6755_v45  ;;  %3289 = vmatprep.subr.bf16.mxu0 %v6760_v46  ;;  %v6835_v44 = vld [vmem:[%s10109_s3 + $0xaa4] ss:$8 sps:$4 sm:$0xff]   ;;  %v6830_v45 = vld [vmem:[%s10109_s3 + $0x9a0] ss:$8 sps:$4 sm:$0xff]  }
 0x128   :  { %3332 = vmatprep.subr.bf16.mxu1 %v6763_v49  ;;  %3319 = vmatprep.mubr.bf16.mxu0 %v2415_v50  ;;  %v6833_v46 = vld [vmem:[%s10109_s3 + $0xaa0] ss:$8 sps:$4 sm:$0xff]   ;;  %v6838_v49 = vld [vmem:[%s10109_s3 + $0x994] ss:$8 sps:$4 sm:$0xff]  }
 0x129   :  { %3362 = vmatprep.mubr.bf16.mxu1 %v2417_v2  ;;  %v6841_v50 = vld [vmem:[%s10109_s3 + $0xa94] ss:$8 sps:$4 sm:$0xff]   ;;  %v6836_v2 = vld [vmem:[%s10109_s3 + $0x990] ss:$8 sps:$4 sm:$0xff]  }
 0x12a   :  { %3290 = vmatpush1.bf16.msra.mxu0 %v6758_v5  ;;  %v6839_v5 = vld [vmem:[%s10109_s3 + $0xa90] ss:$8 sps:$4 sm:$0xff]  }
 0x12b   :  { %3333 = vmatpush1.bf16.msra.mxu1 %v6761_v51  ;;  %3291 = vmatprep.subr.bf16.mxu0 %v6766_v27  ;;  %v6844_v51 = vld [vmem:[%s10109_s3 + $0x984] ss:$8 sps:$4 sm:$0xff]  }
 0x12c   :  { %3334 = vmatprep.subr.bf16.mxu1 %v6769_v29  ;;  %v6847_v27 = vld [vmem:[%s10109_s3 + $0xa84] ss:$8 sps:$4 sm:$0xff]   ;;  %v6842_v29 = vld [vmem:[%s10109_s3 + $0x980] ss:$8 sps:$4 sm:$0xff]  }
 0x12e   :  { %3292 = vmatpush1.bf16.msra.mxu0 %v6764_v37  ;;  %v6845_v37 = vld [vmem:[%s10109_s3 + $0xa80] ss:$8 sps:$4 sm:$0xff]  }
 0x12f   :  { %3335 = vmatpush1.bf16.msra.mxu1 %v6767_v39  ;;  %3293 = vmatprep.subr.bf16.mxu0 %v6772_v52  ;;  %v6850_v39 = vld [vmem:[%s10109_s3 + $0xb74] ss:$8 sps:$4 sm:$0xff]  }
 0x130   :  { %3336 = vmatprep.subr.bf16.mxu1 %v6775_v53  ;;  %v6853_v52 = vld [vmem:[%s10109_s3 + $0xc74] ss:$8 sps:$4 sm:$0xff]  }
 0x131   :  { %v8703_v53 = vld [vmem:[%s10131_s21 + $0xb8] sm:$0xff] }
 0x132   :  { %3294 = vmatpush1.bf16.msra.mxu0 %v6770_v59  ;;  %v8708_v59 = vld [vmem:[%s10131_s21 + $0x1d8] sm:$0xff] }
 0x133   :  { %3337 = vmatpush1.bf16.msra.mxu1 %v6773_v60  ;;  %3295 = vmatprep.subr.bf16.mxu0 %v6778_v61  ;;  %v2414_v60 = vpack.c.bf16 %v8330_v28, %v8314_v24  ;;  %v2416_v61 = vpack.c.bf16 %v8358_v38, %v8348_v36  ;;  %v6851_v24 = vld [vmem:[%s10109_s3 + $0xc70] ss:$8 sps:$4 sm:$0xff]   ;;  %v6856_v28 = vld [vmem:[%s10109_s3 + $0xb64] ss:$8 sps:$4 sm:$0xff]   ;;  %v6854_v38 = vld [vmem:[%s10109_s3 + $0xb60] ss:$8 sps:$4 sm:$0xff]  }
 0x134   :  { %3338 = vmatprep.subr.bf16.mxu1 %v6781_v62  ;;  %v8717_v62 = vld [vmem:[%s10131_s21 + $0xc8] sm:$0xff] }
 0x135   :  { %v6859_v36 = vld [vmem:[%s10109_s3 + $0xc64] ss:$8 sps:$4 sm:$0xff]  }
 0x136   :  { %3296 = vmatpush1.bf16.msra.mxu0 %v6776_v63  ;;  %v2372_v63 = vld [vmem:[%s10131_s21 + $0x1e8] sm:$0xff] }
 0x137   :  { %3339 = vmatpush1.bf16.msra.mxu1 %v6779_v32  ;;  %3297 = vmatprep.subr.bf16.mxu0 %v6784_v34  ;;  %v6848_v32 = vld [vmem:[%s10109_s3 + $0xb70] ss:$8 sps:$4 sm:$0xff]   ;;  %v6857_v34 = vld [vmem:[%s10109_s3 + $0xc60] ss:$8 sps:$4 sm:$0xff]  }
 0x138   :  { %3340 = vmatprep.subr.bf16.mxu1 %v6787_v0  ;;  %v2419_v0 = vpack.c.bf16 %v8708_v59, %v8703_v53 }
 0x13a   :  { %3298 = vmatpush1.bf16.msra.mxu0 %v6782_v1  ;;  %v2421_v1 = vpack.c.bf16 %v2372_v63, %v8717_v62  ;;  %v6931_v63 = vld [vmem:[%s10109_s3 + $0xca4] ss:$8 sps:$4 sm:$0xff]  }
 0x13b   :  { %3341 = vmatpush1.bf16.msra.mxu1 %v6785_v3  ;;  %3299 = vmatprep.subr.bf16.mxu0 %v6790_v4  ;;  %v6862_v3 = vld [vmem:[%s10109_s3 + $0xb54] ss:$8 sps:$4 sm:$0xff]  }
 0x13c   :  { %3342 = vmatprep.subr.bf16.mxu1 %v6793_v6  ;;  %v6865_v4 = vld [vmem:[%s10109_s3 + $0xc54] ss:$8 sps:$4 sm:$0xff]   ;;  %v6860_v6 = vld [vmem:[%s10109_s3 + $0xb50] ss:$8 sps:$4 sm:$0xff]  }
 0x13e   :  { %3300 = vmatpush1.bf16.msra.mxu0 %v6788_v7  ;;  %v6863_v7 = vld [vmem:[%s10109_s3 + $0xc50] ss:$8 sps:$4 sm:$0xff]  }
 0x13f   :  { %3343 = vmatpush1.bf16.msra.mxu1 %v6791_v8  ;;  %3301 = vmatprep.subr.bf16.mxu0 %v6796_v9  ;;  %v6868_v8 = vld [vmem:[%s10109_s3 + $0xb44] ss:$8 sps:$4 sm:$0xff]  }
 0x140   :  { %3344 = vmatprep.subr.bf16.mxu1 %v6799_v10  ;;  %v6871_v9 = vld [vmem:[%s10109_s3 + $0xc44] ss:$8 sps:$4 sm:$0xff]   ;;  %v6866_v10 = vld [vmem:[%s10109_s3 + $0xb40] ss:$8 sps:$4 sm:$0xff]  }
 0x142   :  { %3302 = vmatpush1.bf16.msra.mxu0 %v6794_v11  ;;  %v6869_v11 = vld [vmem:[%s10109_s3 + $0xc40] ss:$8 sps:$4 sm:$0xff]  }
 0x143   :  { %3345 = vmatpush1.bf16.msra.mxu1 %v6797_v12  ;;  %3303 = vmatprep.subr.bf16.mxu0 %v6802_v13  ;;  %v6874_v12 = vld [vmem:[%s10109_s3 + $0xb34] ss:$8 sps:$4 sm:$0xff]  }
 0x144   :  { %3346 = vmatprep.subr.bf16.mxu1 %v6805_v14  ;;  %v6877_v13 = vld [vmem:[%s10109_s3 + $0xc34] ss:$8 sps:$4 sm:$0xff]   ;;  %v6872_v14 = vld [vmem:[%s10109_s3 + $0xb30] ss:$8 sps:$4 sm:$0xff]  }
 0x146   :  { %3304 = vmatpush2.bf16.msra.mxu0 %v6800_v15  ;;  %v6875_v15 = vld [vmem:[%s10109_s3 + $0xc30] ss:$8 sps:$4 sm:$0xff]  }
 0x147   :  { %3347 = vmatpush2.bf16.msra.mxu1 %v6803_v16  ;;  %3305 = vmatprep.subr.bf16.mxu0 %v6808_v17  ;;  %v6880_v16 = vld [vmem:[%s10109_s3 + $0xb24] ss:$8 sps:$4 sm:$0xff]  }
 0x148   :  { %3348 = vmatprep.subr.bf16.mxu1 %v6811_v18  ;;  %v6883_v17 = vld [vmem:[%s10109_s3 + $0xc24] ss:$8 sps:$4 sm:$0xff]   ;;  %v6878_v18 = vld [vmem:[%s10109_s3 + $0xb20] ss:$8 sps:$4 sm:$0xff]  }
 0x14a   :  { %3306 = vmatpush2.bf16.msra.mxu0 %v6806_v19  ;;  %v6881_v19 = vld [vmem:[%s10109_s3 + $0xc20] ss:$8 sps:$4 sm:$0xff]  }
 0x14b   :  { %3349 = vmatpush2.bf16.msra.mxu1 %v6809_v22  ;;  %3307 = vmatprep.subr.bf16.mxu0 %v6814_v23  ;;  %v6886_v22 = vld [vmem:[%s10109_s3 + $0xb14] ss:$8 sps:$4 sm:$0xff]  }
 0x14c   :  { %3350 = vmatprep.subr.bf16.mxu1 %v6817_v55  ;;  %v6889_v23 = vld [vmem:[%s10109_s3 + $0xc14] ss:$8 sps:$4 sm:$0xff]   ;;  %v6884_v55 = vld [vmem:[%s10109_s3 + $0xb10] ss:$8 sps:$4 sm:$0xff]  }
 0x14e   :  { %3308 = vmatpush2.bf16.msra.mxu0 %v6812_v57  ;;  %v6887_v57 = vld [vmem:[%s10109_s3 + $0xc10] ss:$8 sps:$4 sm:$0xff]  }
 0x14f   :  { %3351 = vmatpush2.bf16.msra.mxu1 %v6815_v25  ;;  %3309 = vmatprep.subr.bf16.mxu0 %v6820_v26  ;;  %v6892_v25 = vld [vmem:[%s10109_s3 + $0xb04] ss:$8 sps:$4 sm:$0xff]  }
 0x150   :  { %3352 = vmatprep.subr.bf16.mxu1 %v6823_v30  ;;  %v6895_v26 = vld [vmem:[%s10109_s3 + $0xc04] ss:$8 sps:$4 sm:$0xff]   ;;  %v6890_v30 = vld [vmem:[%s10109_s3 + $0xb00] ss:$8 sps:$4 sm:$0xff]  }
 0x152   :  { %3310 = vmatpush2.bf16.msra.mxu0 %v6818_v31  ;;  %v6893_v31 = vld [vmem:[%s10109_s3 + $0xc00] ss:$8 sps:$4 sm:$0xff]  }
 0x153   :  { %3353 = vmatpush2.bf16.msra.mxu1 %v6821_v33  ;;  %3311 = vmatprep.subr.bf16.mxu0 %v6826_v35  ;;  %v6898_v33 = vld [vmem:[%s10109_s3 + $0xbf4] ss:$8 sps:$4 sm:$0xff]  }
 0x154   :  { %3354 = vmatprep.subr.bf16.mxu1 %v6829_v40  ;;  %v6901_v35 = vld [vmem:[%s10109_s3 + $0xcf4] ss:$8 sps:$4 sm:$0xff]   ;;  %v6896_v40 = vld [vmem:[%s10109_s3 + $0xbf0] ss:$8 sps:$4 sm:$0xff]  }
 0x156   :  { %3312 = vmatpush2.bf16.msra.mxu0 %v6824_v41  ;;  %v6899_v41 = vld [vmem:[%s10109_s3 + $0xcf0] ss:$8 sps:$4 sm:$0xff]  }
 0x157   :  { %3355 = vmatpush2.bf16.msra.mxu1 %v6827_v42  ;;  %3313 = vmatprep.subr.bf16.mxu0 %v6832_v43  ;;  %v6904_v42 = vld [vmem:[%s10109_s3 + $0xbe4] ss:$8 sps:$4 sm:$0xff]  }
 0x158   :  { %3356 = vmatprep.subr.bf16.mxu1 %v6835_v44  ;;  %v6907_v43 = vld [vmem:[%s10109_s3 + $0xce4] ss:$8 sps:$4 sm:$0xff]   ;;  %v6902_v44 = vld [vmem:[%s10109_s3 + $0xbe0] ss:$8 sps:$4 sm:$0xff]  }
 0x15a   :  { %3314 = vmatpush2.bf16.msra.mxu0 %v6830_v45  ;;  %v6905_v45 = vld [vmem:[%s10109_s3 + $0xce0] ss:$8 sps:$4 sm:$0xff]  }
 0x15b   :  { %3357 = vmatpush2.bf16.msra.mxu1 %v6833_v46  ;;  %3315 = vmatprep.subr.bf16.mxu0 %v6838_v49  ;;  %v6910_v46 = vld [vmem:[%s10109_s3 + $0xbd4] ss:$8 sps:$4 sm:$0xff]  }
 0x15c   :  { %3358 = vmatprep.subr.bf16.mxu1 %v6841_v50  ;;  %v6913_v49 = vld [vmem:[%s10109_s3 + $0xcd4] ss:$8 sps:$4 sm:$0xff]   ;;  %v6908_v50 = vld [vmem:[%s10109_s3 + $0xbd0] ss:$8 sps:$4 sm:$0xff]  }
 0x15e   :  { %3316 = vmatpush2.bf16.msra.mxu0 %v6836_v2  ;;  %v6911_v2 = vld [vmem:[%s10109_s3 + $0xcd0] ss:$8 sps:$4 sm:$0xff]  }
 0x15f   :  { %3359 = vmatpush2.bf16.msra.mxu1 %v6839_v5  ;;  %3317 = vmatprep.subr.bf16.mxu0 %v6844_v51  ;;  %v6916_v5 = vld [vmem:[%s10109_s3 + $0xbc4] ss:$8 sps:$4 sm:$0xff]  }
 0x160   :  { %3360 = vmatprep.subr.bf16.mxu1 %v6847_v27  ;;  %v6919_v51 = vld [vmem:[%s10109_s3 + $0xcc4] ss:$8 sps:$4 sm:$0xff]   ;;  %v6914_v27 = vld [vmem:[%s10109_s3 + $0xbc0] ss:$8 sps:$4 sm:$0xff]  }
 0x162   :  { %3318 = vmatpush2.bf16.msra.mxu0 %v6842_v29  ;;  %v6917_v29 = vld [vmem:[%s10109_s3 + $0xcc0] ss:$8 sps:$4 sm:$0xff]  }
 0x163   :  { %3361 = vmatpush2.bf16.msra.mxu1 %v6845_v37  ;;  %3373 = vmatprep.subr.bf16.mxu0 %v6850_v39  ;;  %v6922_v37 = vld [vmem:[%s10109_s3 + $0xbb4] ss:$8 sps:$4 sm:$0xff]  }
 0x164   :  { %3416 = vmatprep.subr.bf16.mxu1 %v6853_v52  ;;  %v6925_v39 = vld [vmem:[%s10109_s3 + $0xcb4] ss:$8 sps:$4 sm:$0xff]   ;;  %v6920_v52 = vld [vmem:[%s10109_s3 + $0xbb0] ss:$8 sps:$4 sm:$0xff]  }
 0x165   :  { %3320 = vmatmul.mubr.bf16.vlgmr.msra.gmra.mxu0 %v2414_v60  ;;  %v6923_v60 = vld [vmem:[%s10109_s3 + $0xcb0] ss:$8 sps:$4 sm:$0xff]  }
 0x166   :  { %3363 = vmatmul.mubr.bf16.vlgmr.msra.gmra.mxu1 %v2416_v61  ;;  %3374 = vmatpush1.bf16.msra.mxu0 %v6848_v32  ;;  %v6928_v61 = vld [vmem:[%s10109_s3 + $0xba4] ss:$8 sps:$4 sm:$0xff]   ;;  %v6926_v32 = vld [vmem:[%s10109_s3 + $0xba0] ss:$8 sps:$4 sm:$0xff]  }
 0x167   :  { %3417 = vmatpush1.bf16.msra.mxu1 %v6851_v24  ;;  %3375 = vmatprep.subr.bf16.mxu0 %v6856_v28  ;;  %v6929_v24 = vld [vmem:[%s10109_s3 + $0xca0] ss:$8 sps:$4 sm:$0xff]   ;;  %v6934_v28 = vld [vmem:[%s10109_s3 + $0xb94] ss:$8 sps:$4 sm:$0xff]  }
 0x168   :  { %3418 = vmatprep.subr.bf16.mxu1 %v6859_v36  ;;  %3405 = vmatprep.mubr.bf16.mxu0 %v2419_v0  ;;  %v6937_v36 = vld [vmem:[%s10109_s3 + $0xc94] ss:$8 sps:$4 sm:$0xff]   ;;  %v6940_v0 = vld [vmem:[%s10109_s3 + $0xb84] ss:$8 sps:$4 sm:$0xff]  }
 0x169   :  { %3448 = vmatprep.mubr.bf16.mxu1 %v2421_v1  ;;  %v6943_v1 = vld [vmem:[%s10109_s3 + $0xc84] ss:$8 sps:$4 sm:$0xff]  }
 0x16a   :  { %3376 = vmatpush1.bf16.msra.mxu0 %v6854_v38  ;;  %v6932_v38 = vld [vmem:[%s10109_s3 + $0xb90] ss:$8 sps:$4 sm:$0xff]  }
 0x16b   :  { %3419 = vmatpush1.bf16.msra.mxu1 %v6857_v34  ;;  %3377 = vmatprep.subr.bf16.mxu0 %v6862_v3  ;;  %v6935_v34 = vld [vmem:[%s10109_s3 + $0xc90] ss:$8 sps:$4 sm:$0xff]   ;;  %v6938_v3 = vld [vmem:[%s10109_s3 + $0xb80] ss:$8 sps:$4 sm:$0xff]  }
 0x16c   :  { %3420 = vmatprep.subr.bf16.mxu1 %v6865_v4  ;;  %v6941_v4 = vld [vmem:[%s10109_s3 + $0xc80] ss:$8 sps:$4 sm:$0xff]  }
 0x16e   :  { %3378 = vmatpush1.bf16.msra.mxu0 %v6860_v6  ;;  %v8914_v6 = vld [vmem:[%s10131_s21 + $0xb0] sm:$0xff] }
 0x16f   :  { %3421 = vmatpush1.bf16.msra.mxu1 %v6863_v7  ;;  %3379 = vmatprep.subr.bf16.mxu0 %v6868_v8  ;;  %v8919_v7 = vld [vmem:[%s10131_s21 + $0x1d0] sm:$0xff]  ;;  %v8924_v8 = vld [vmem:[%s10131_s21 + $0xc0] sm:$0xff] }
 0x170   :  { %3422 = vmatprep.subr.bf16.mxu1 %v6871_v9  ;;  %v8929_v9 = vld [vmem:[%s10131_s21 + $0x1e0] sm:$0xff] }
 0x172   :  { %3380 = vmatpush1.bf16.msra.mxu0 %v6866_v10  ;;  %v6946_v10 = vld [vmem:[%s10109_s3 + $0xd74] ss:$8 sps:$4 sm:$0xff]  }
 0x173   :  { %3423 = vmatpush1.bf16.msra.mxu1 %v6869_v11  ;;  %3381 = vmatprep.subr.bf16.mxu0 %v6874_v12  ;;  %v6949_v11 = vld [vmem:[%s10109_s3 + $0xdf4] ss:$8 sps:$4 sm:$0xff]   ;;  %v2418_v12 = vpack.c.bf16 %v8919_v7, %v8914_v6 }
 0x174   :  { %3424 = vmatprep.subr.bf16.mxu1 %v6877_v13  ;;  %v2420_v13 = vpack.c.bf16 %v8929_v9, %v8924_v8 }
 0x176   :  { %3382 = vmatpush1.bf16.msra.mxu0 %v6872_v14  ;;  %v8944_v14 = vld [vmem:[%s10131_s21 + $0xe0] sm:$0xff] }
 0x177   :  { %3425 = vmatpush1.bf16.msra.mxu1 %v6875_v15  ;;  %3383 = vmatprep.subr.bf16.mxu0 %v6880_v16  ;;  %v8949_v15 = vld [vmem:[%s10131_s21 + $0x200] sm:$0xff]  ;;  %v6944_v16 = vld [vmem:[%s10109_s3 + $0xd70] ss:$8 sps:$4 sm:$0xff]  }
 0x178   :  { %3426 = vmatprep.subr.bf16.mxu1 %v6883_v17  ;;  %v6947_v17 = vld [vmem:[%s10109_s3 + $0xdf0] ss:$8 sps:$4 sm:$0xff]  }
 0x17a   :  { %3384 = vmatpush1.bf16.msra.mxu0 %v6878_v18  ;;  %v6952_v18 = vld [vmem:[%s10109_s3 + $0xd64] ss:$8 sps:$4 sm:$0xff]  }
 0x17b   :  { %3427 = vmatpush1.bf16.msra.mxu1 %v6881_v19  ;;  %3385 = vmatprep.subr.bf16.mxu0 %v6886_v22  ;;  %v6955_v19 = vld [vmem:[%s10109_s3 + $0xde4] ss:$8 sps:$4 sm:$0xff]   ;;  %v6950_v22 = vld [vmem:[%s10109_s3 + $0xd60] ss:$8 sps:$4 sm:$0xff]  }
 0x17c   :  { %3428 = vmatprep.subr.bf16.mxu1 %v6889_v23  ;;  %v6953_v23 = vld [vmem:[%s10109_s3 + $0xde0] ss:$8 sps:$4 sm:$0xff]  }
 0x17e   :  { %3386 = vmatpush1.bf16.msra.mxu0 %v6884_v55  ;;  %v3565_v55 = vpack.c.bf16 %v8949_v15, %v8944_v14 }
 0x17f   :  { %3429 = vmatpush1.bf16.msra.mxu1 %v6887_v57  ;;  %3387 = vmatprep.subr.bf16.mxu0 %v6892_v25  ;;  %v6958_v57 = vld [vmem:[%s10109_s3 + $0xd54] ss:$8 sps:$4 sm:$0xff]  }
 0x180   :  { %3430 = vmatprep.subr.bf16.mxu1 %v6895_v26  ;;  %v6961_v25 = vld [vmem:[%s10109_s3 + $0xdd4] ss:$8 sps:$4 sm:$0xff]   ;;  %v6956_v26 = vld [vmem:[%s10109_s3 + $0xd50] ss:$8 sps:$4 sm:$0xff]  }
 0x182   :  { %3388 = vmatpush1.bf16.msra.mxu0 %v6890_v30  ;;  %v6959_v30 = vld [vmem:[%s10109_s3 + $0xdd0] ss:$8 sps:$4 sm:$0xff]  }
 0x183   :  { %3431 = vmatpush1.bf16.msra.mxu1 %v6893_v31  ;;  %3389 = vmatprep.subr.bf16.mxu0 %v6898_v33  ;;  %v6964_v31 = vld [vmem:[%s10109_s3 + $0xd44] ss:$8 sps:$4 sm:$0xff]  }
 0x184   :  { %3432 = vmatprep.subr.bf16.mxu1 %v6901_v35  ;;  %v6967_v33 = vld [vmem:[%s10109_s3 + $0xdc4] ss:$8 sps:$4 sm:$0xff]   ;;  %v6962_v35 = vld [vmem:[%s10109_s3 + $0xd40] ss:$8 sps:$4 sm:$0xff]  }
 0x186   :  { %3390 = vmatpush2.bf16.msra.mxu0 %v6896_v40  ;;  %v6965_v40 = vld [vmem:[%s10109_s3 + $0xdc0] ss:$8 sps:$4 sm:$0xff]  }
 0x187   :  { %3433 = vmatpush2.bf16.msra.mxu1 %v6899_v41  ;;  %3391 = vmatprep.subr.bf16.mxu0 %v6904_v42  ;;  %v6970_v41 = vld [vmem:[%s10109_s3 + $0xd34] ss:$8 sps:$4 sm:$0xff]  }
 0x188   :  { %3434 = vmatprep.subr.bf16.mxu1 %v6907_v43  ;;  %v6973_v42 = vld [vmem:[%s10109_s3 + $0xdb4] ss:$8 sps:$4 sm:$0xff]  }
 0x18a   :  { %3392 = vmatpush2.bf16.msra.mxu0 %v6902_v44 }
 0x18b   :  { %3435 = vmatpush2.bf16.msra.mxu1 %v6905_v45  ;;  %3393 = vmatprep.subr.bf16.mxu0 %v6910_v46 }
 0x18c   :  { %3436 = vmatprep.subr.bf16.mxu1 %v6913_v49 }
 0x18e   :  { %3394 = vmatpush2.bf16.msra.mxu0 %v6908_v50 }
 0x18f   :  { %3437 = vmatpush2.bf16.msra.mxu1 %v6911_v2  ;;  %3395 = vmatprep.subr.bf16.mxu0 %v6916_v5 }
 0x190   :  { %3438 = vmatprep.subr.bf16.mxu1 %v6919_v51 }
 0x192   :  { %3396 = vmatpush2.bf16.msra.mxu0 %v6914_v27 }
 0x193   :  { %3439 = vmatpush2.bf16.msra.mxu1 %v6917_v29  ;;  %3397 = vmatprep.subr.bf16.mxu0 %v6922_v37 }
 0x194   :  { %3440 = vmatprep.subr.bf16.mxu1 %v6925_v39 }
 0x196   :  { %3398 = vmatpush2.bf16.msra.mxu0 %v6920_v52 }
 0x197   :  { %3441 = vmatpush2.bf16.msra.mxu1 %v6923_v60  ;;  %3399 = vmatprep.subr.bf16.mxu0 %v6928_v61 }
 0x198   :  { %3442 = vmatprep.subr.bf16.mxu1 %v6931_v63 }
 0x19a   :  { %3400 = vmatpush2.bf16.msra.mxu0 %v6926_v32 }
 0x19b   :  { %3443 = vmatpush2.bf16.msra.mxu1 %v6929_v24  ;;  %3401 = vmatprep.subr.bf16.mxu0 %v6934_v28 }
 0x19c   :  { %3444 = vmatprep.subr.bf16.mxu1 %v6937_v36 }
 0x19e   :  { %3402 = vmatpush2.bf16.msra.mxu0 %v6932_v38 }
 0x19f   :  { %3445 = vmatpush2.bf16.msra.mxu1 %v6935_v34  ;;  %3403 = vmatprep.subr.bf16.mxu0 %v6940_v0 }
 0x1a0   :  { %3446 = vmatprep.subr.bf16.mxu1 %v6943_v1 }
 0x1a2   :  { %3404 = vmatpush2.bf16.msra.mxu0 %v6938_v3 }
 0x1a3   :  { %3447 = vmatpush2.bf16.msra.mxu1 %v6941_v4  ;;  %3459 = vmatprep.subr.bf16.mxu0 %v6946_v10 }
 0x1a4   :  { %4437 = vmatprep.subr.bf16.mxu1 %v6949_v11 }
 0x1a5   :  { %3406 = vmatmul.mubr.bf16.vlgmr.msra.gmra.mxu0 %v2418_v12 }
 0x1a6   :  { %3449 = vmatmul.mubr.bf16.vlgmr.msra.gmra.mxu1 %v2420_v13  ;;  %3460 = vmatpush1.bf16.msra.mxu0 %v6944_v16 }
 0x1a7   :  { %4438 = vmatpush1.bf16.msra.mxu1 %v6947_v17  ;;  %3461 = vmatprep.subr.bf16.mxu0 %v6952_v18 }
 0x1a8   :  { %4439 = vmatprep.subr.bf16.mxu1 %v6955_v19  ;;  %3491 = vmatprep.mubr.bf16.mxu0 %v7305_v54 }
 0x1a9   :  { %4469 = vmatprep.mubr.bf16.mxu1 %v3565_v55 }
 0x1aa   :  { %3462 = vmatpush1.bf16.msra.mxu0 %v6950_v22 }
 0x1ab   :  { %4440 = vmatpush1.bf16.msra.mxu1 %v6953_v23  ;;  %3463 = vmatprep.subr.bf16.mxu0 %v6958_v57 }
 0x1ac   :  { %4441 = vmatprep.subr.bf16.mxu1 %v6961_v25 }
 0x1ae   :  { %3464 = vmatpush1.bf16.msra.mxu0 %v6956_v26 }
 0x1af   :  { %4442 = vmatpush1.bf16.msra.mxu1 %v6959_v30  ;;  %3465 = vmatprep.subr.bf16.mxu0 %v6964_v31 }
 0x1b0   :  { %4443 = vmatprep.subr.bf16.mxu1 %v6967_v33 }
 0x1b1   :  { %24 = vsyncpa [#allocation3], 0  ;;  %v6968_v43 = vld [vmem:[%s10109_s3 + $0xd30] ss:$8 sps:$4 sm:$0xff]   ;;  %v6976_v45 = vld [vmem:[%s10109_s3 + $0xd24] ss:$8 sps:$4 sm:$0xff]  }
 0x1b2   :  { %3466 = vmatpush1.bf16.msra.mxu0 %v6962_v35  ;;  %v6971_v44 = vld [vmem:[%s10109_s3 + $0xdb0] ss:$8 sps:$4 sm:$0xff]   ;;  %v6979_v46 = vld [vmem:[%s10109_s3 + $0xda4] ss:$8 sps:$4 sm:$0xff]   ;;  %v6974_v49 = vld [vmem:[%s10109_s3 + $0xd20] ss:$8 sps:$4 sm:$0xff]  }
 0x1b3   :  { %4444 = vmatpush1.bf16.msra.mxu1 %v6965_v40  ;;  %3467 = vmatprep.subr.bf16.mxu0 %v6970_v41  ;;  %v6977_v50 = vld [vmem:[%s10109_s3 + $0xda0] ss:$8 sps:$4 sm:$0xff]   ;;  %v6982_v2 = vld [vmem:[%s10109_s3 + $0xd14] ss:$8 sps:$4 sm:$0xff]   ;;  %v6980_v51 = vld [vmem:[%s10109_s3 + $0xd10] ss:$8 sps:$4 sm:$0xff]  }
 0x1b4   :  { %4445 = vmatprep.subr.bf16.mxu1 %v6973_v42  ;;  %v6985_v5 = vld [vmem:[%s10109_s3 + $0xd94] ss:$8 sps:$4 sm:$0xff]   ;;  %v6983_v27 = vld [vmem:[%s10109_s3 + $0xd90] ss:$8 sps:$4 sm:$0xff]   ;;  %v6988_v29 = vld [vmem:[%s10109_s3 + $0xd04] ss:$8 sps:$4 sm:$0xff]  }
 0x1b5   :  { %v6991_v37 = vld [vmem:[%s10109_s3 + $0xd84] ss:$8 sps:$4 sm:$0xff]   ;;  %v6986_v39 = vld [vmem:[%s10109_s3 + $0xd00] ss:$8 sps:$4 sm:$0xff]   ;;  %v9047_v60 = vld [vmem:[%s10131_s21 + $0xd0] sm:$0xff]  ;;  %vm7307_vm0 = vmmov 0  }
 0x1b6   :  { %3468 = vmatpush1.bf16.msra.mxu0 %v6968_v43  ;;  %v6989_v52 = vld [vmem:[%s10109_s3 + $0xd80] ss:$8 sps:$4 sm:$0xff]   ;;  %v9052_v61 = vld [vmem:[%s10131_s21 + $0x1f0] sm:$0xff]  ;;  %v9094_v10 = vld [vmem:[%s10131_s21 + $0x118] sm:$0xff]  ;;  %vm5126_vm1 = vcmask 261120   ;;  %s10154_s19 = sld [smem:[#allocation16_spill]] }
 0x1b7   :  { %4446 = vmatpush1.bf16.msra.mxu1 %v6971_v44  ;;  %3469 = vmatprep.subr.bf16.mxu0 %v6976_v45  ;;  %v6994_v63 = vld [vmem:[%s10109_s3 + $0xe74] ss:$8 sps:$4 sm:$0xff]   ;;  %v6992_v24 = vld [vmem:[%s10109_s3 + $0xe70] ss:$8 sps:$4 sm:$0xff]   ;;  %v7264_v28 = vld [vmem:[%s10131_s21 + $0x20] sm:$0xff]  ;;  %v2422_v38 = vpack.c.bf16 %v9052_v61, %v9047_v60  ;;  %s10155_s2 = sld [smem:[#allocation17_spill]] }
 0x1b8   :  { %4447 = vmatprep.subr.bf16.mxu1 %v6979_v46  ;;  %v6997_v32 = vld [vmem:[%s10109_s3 + $0xef4] ss:$8 sps:$4 sm:$0xff]   ;;  %v86_v36 = vmul.f32 %v7264_v28, %v7264_v28  ;;  %v6995_v34 = vld [vmem:[%s10109_s3 + $0xef0] ss:$8 sps:$4 sm:$0xff]   ;;  %v9084_v3 = vld [vmem:[%s10131_s21 + $0x108] sm:$0xff]  ;;  %vm5373_vm2 = vcmask 785408  }
 0x1b9   :  { %v9074_v0 = vld [vmem:[%s10131_s21 + $0xf0] sm:$0xff]  ;;  %v9089_v4 = vld [vmem:[%s10131_s21 + $0x228] sm:$0xff]  ;;  %v9110_v18 = vld [vmem:[%s10131_s21 + $0x238] sm:$0xff] }
 0x1ba   :  { %3470 = vmatpush1.bf16.msra.mxu0 %v6974_v49  ;;  %v9079_v1 = vld [vmem:[%s10131_s21 + $0x210] sm:$0xff]  ;;  %v7265_v11 = vld [vmem:[%s10131_s21 + $0x28] sm:$0xff]  ;;  %v3570_v17 = vpack.c.bf16 %v9089_v4, %v9084_v3  ;;  %v3572_v22 = vpack.c.bf16 %v9110_v18, %v9094_v10  ;;  %v103_v57 = vadd.f32 %v8033_v47, %v86_v36  ;;  %v7267_v31 = vld [vmem:[%s10131_s21 + $0x38] sm:$0xff] }
 0x1bb   :  { %4448 = vmatpush1.bf16.msra.mxu1 %v6977_v50  ;;  %3471 = vmatprep.subr.bf16.mxu0 %v6982_v2  ;;  %v87_v12 = vmul.f32 %v7265_v11, %v7265_v11  ;;  %v7000_v13 = vld [vmem:[%s10109_s3 + $0xe64] ss:$8 sps:$4 sm:$0xff]   ;;  %v3567_v19 = vpack.c.bf16 %v9079_v1, %v9074_v0  ;;  %v7266_v23 = vld [vmem:[%s10131_s21 + $0x30] sm:$0xff]  ;;  %v6998_v25 = vld [vmem:[%s10109_s3 + $0xe60] ss:$8 sps:$4 sm:$0xff]   ;;  %v89_v33 = vmul.f32 %v7267_v31, %v7267_v31 }
 0x1bc   :  { %4449 = vmatprep.subr.bf16.mxu1 %v6985_v5  ;;  %v7003_v16 = vld [vmem:[%s10109_s3 + $0xee4] ss:$8 sps:$4 sm:$0xff]   ;;  %v88_v55 = vmul.f32 %v7266_v23, %v7266_v23  ;;  %v7001_v26 = vld [vmem:[%s10109_s3 + $0xee0] ss:$8 sps:$4 sm:$0xff]   ;;  %v7006_v30 = vld [vmem:[%s10109_s3 + $0xe54] ss:$8 sps:$4 sm:$0xff]   ;;  %v9230_v31 = vmul.f32 %v8708_v59, %v8708_v59 }
 0x1bd   :  { %v7009_v47 = vld [vmem:[%s10109_s3 + $0xed4] ss:$8 sps:$4 sm:$0xff]   ;;  %v104_v35 = vadd.f32 %v103_v57, %v87_v12  ;;  %v7268_v40 = vld [vmem:[%s10131_s21 + $0x40] sm:$0xff]  ;;  %v7004_v43 = vld [vmem:[%s10109_s3 + $0xe50] ss:$8 sps:$4 sm:$0xff]  }
 0x1be   :  { %3472 = vmatpush1.bf16.msra.mxu0 %v6980_v51  ;;  %v90_v41 = vmul.f32 %v7268_v40, %v7268_v40  ;;  %v7007_v44 = vld [vmem:[%s10109_s3 + $0xed0] ss:$8 sps:$4 sm:$0xff]   ;;  %v7012_v45 = vld [vmem:[%s10109_s3 + $0xe44] ss:$8 sps:$4 sm:$0xff]   ;;  %v7010_v2 = vld [vmem:[%s10109_s3 + $0xe40] ss:$8 sps:$4 sm:$0xff]  }
 0x1bf   :  { %4450 = vmatpush1.bf16.msra.mxu1 %v6983_v27  ;;  %3473 = vmatprep.subr.bf16.mxu0 %v6988_v29  ;;  %v105_v42 = vadd.f32 %v104_v35, %v88_v55  ;;  %v7015_v46 = vld [vmem:[%s10109_s3 + $0xec4] ss:$8 sps:$4 sm:$0xff]   ;;  %v7013_v5 = vld [vmem:[%s10109_s3 + $0xec0] ss:$8 sps:$4 sm:$0xff]   ;;  %v7018_v51 = vld [vmem:[%s10109_s3 + $0xe34] ss:$8 sps:$4 sm:$0xff]  }
 0x1c0   :  { %4451 = vmatprep.subr.bf16.mxu1 %v6991_v37  ;;  %v7021_v27 = vld [vmem:[%s10109_s3 + $0xeb4] ss:$8 sps:$4 sm:$0xff]   ;;  %v7016_v29 = vld [vmem:[%s10109_s3 + $0xe30] ss:$8 sps:$4 sm:$0xff]   ;;  %v7039_v35 = vld [vmem:[%s10109_s3 + $0xe84] ss:$8 sps:$4 sm:$0xff]  }
 0x1c1   :  { %v106_v49 = vadd.f32 %v105_v42, %v89_v33  ;;  %v7019_v37 = vld [vmem:[%s10109_s3 + $0xeb0] ss:$8 sps:$4 sm:$0xff]   ;;  %v7033_v28 = vld [vmem:[%s10109_s3 + $0xe94] ss:$8 sps:$4 sm:$0xff]   ;;  %v7036_v33 = vld [vmem:[%s10109_s3 + $0xe04] ss:$8 sps:$4 sm:$0xff]  }
 0x1c2   :  { %3474 = vmatpush1.bf16.msra.mxu0 %v6986_v39  ;;  %v7024_v39 = vld [vmem:[%s10109_s3 + $0xe24] ss:$8 sps:$4 sm:$0xff]   ;;  %v9189_v36 = vld [vmem:[%s10131_s21 + $0xd8] sm:$0xff]  ;;  %v7270_v23 = vld [vmem:[%s10131_s21 + $0x70] sm:$0xff] }
 0x1c3   :  { %4452 = vmatpush1.bf16.msra.mxu1 %v6989_v52  ;;  %4480 = vmatprep.subr.bf16.mxu0 %v6997_v32  ;;  %v107_v50 = vadd.f32 %v106_v49, %v90_v41  ;;  %v7027_v52 = vld [vmem:[%s10109_s3 + $0xea4] ss:$8 sps:$4 sm:$0xff]   ;;  %v7025_v32 = vld [vmem:[%s10109_s3 + $0xea0] ss:$8 sps:$4 sm:$0xff]   ;;  %v9197_v11 = vld [vmem:[%s10131_s21 + $0x1f8] sm:$0xff]  ;;  %v3524_v12 = vmul.f32 %v9189_v36, %v9189_v36  ;;  %v298_v55 = vmul.f32 %v7270_v23, %v7270_v23 }
 0x1c4   :  { %4453 = vmatprep.subr.bf16.mxu1 %v6994_v63  ;;  %v7022_v63 = vld [vmem:[%s10109_s3 + $0xe20] ss:$8 sps:$4 sm:$0xff]   ;;  %v7271_v57 = vld [vmem:[%s10131_s21 + $0x190] sm:$0xff] }
 0x1c5   :  { %3492 = vmatmul.mubr.bf16.vlgmr.msra.gmra.mxu0 %v2422_v38  ;;  %108 = vadd.xlane.f32.xlu0 %v107_v50  ;;  %v7269_v38 = vld [vmem:[%s10131_s21 + $0x140] sm:$0xff]  ;;  %v9241_v40 = vld [vmem:[%s10131_s21 + $0xe8] sm:$0xff] }
 0x1c6   :  { %4481 = vmatpush1.bf16.msra.mxu0 %v6995_v34  ;;  %4512 = vmatprep.mubr.bf16.mxu0 %v3567_v19  ;;  %v95_v34 = vmul.f32 %v7269_v38, %v7269_v38  ;;  %v3534_v19 = vmul.f32 %v8949_v15, %v8949_v15  ;;  %v7031_v15 = vld [vmem:[%s10109_s3 + $0xe90] ss:$8 sps:$4 sm:$0xff]   ;;  %v9248_v41 = vld [vmem:[%s10131_s21 + $0x208] sm:$0xff]  ;;  %v3526_v42 = vmul.f32 %v9241_v40, %v9241_v40  ;;  %v9273_v50 = vld [vmem:[%s10131_s21 + $0x220] sm:$0xff] }
 0x1c7   :  { %4454 = vmatpush2.bf16.msra.mxu1 %v6992_v24  ;;  %4482 = vmatprep.subr.bf16.mxu0 %v7003_v16  ;;  %v7030_v24 = vld [vmem:[%s10109_s3 + $0xe14] ss:$8 sps:$4 sm:$0xff]   ;;  %v3533_v16 = vmul.f32 %v9197_v11, %v9197_v11  ;;  %v3535_v49 = vmul.f32 %v9248_v41, %v9248_v41 }
 0x1c8   :  { %4455 = vmatprep.subr.bf16.mxu1 %v7000_v13  ;;  %v3525_v13 = vmul.f32 %v8944_v14, %v8944_v14  ;;  %v7028_v14 = vld [vmem:[%s10109_s3 + $0xe10] ss:$8 sps:$4 sm:$0xff]  }
 0x1c9   :  { %v7276_v38 = vld [vmem:[%s10131_s21 + $0x158] sm:$0xff] }
 0x1ca   :  { %4483 = vmatpush1.bf16.msra.mxu0 %v7001_v26  ;;  %v7272_v26 = vld [vmem:[%s10131_s21 + $0x148] sm:$0xff]  ;;  %v3542_v59 = vadd.f32 %v3525_v13, %v3524_v12  ;;  %v7040_v13 = vld [vmem:[%s10109_s3 + $0xf70] ss:$8 sps:$4 sm:$0xff]  }
 0x1cb   :  { %4456 = vmatpush2.bf16.msra.mxu1 %v6998_v25  ;;  %4484 = vmatprep.subr.bf16.mxu0 %v7009_v47  ;;  %v9213_v25 = vmul.f32 %v7271_v57, %v7271_v57  ;;  %v9226_v47 = vmul.f32 %v8703_v53, %v8703_v53  ;;  %v2378_v53 = vmul.f32 %v8914_v6, %v8914_v6 }
 0x1cc   :  { %4457 = vmatprep.subr.bf16.mxu1 %v7006_v30  ;;  %v96_v30 = vmul.f32 %v7272_v26, %v7272_v26  ;;  %v3564_v6 = vpack.c.bf16 %v9197_v11, %v9189_v36 }
 0x1ce   :  { %4485 = vmatpush1.bf16.msra.mxu0 %v7007_v44  ;;  %v2387_v44 = vmul.f32 %v8919_v7, %v8919_v7  ;;  %v9268_v7 = vld [vmem:[%s10131_s21 + $0x100] sm:$0xff] }
 0x1cf   :  { %4458 = vmatpush2.bf16.msra.mxu1 %v7004_v43  ;;  %4486 = vmatprep.subr.bf16.mxu0 %v7015_v46  ;;  %v113_v43 = vadd.f32 %v8035_v48, %v95_v34  ;;  %v3552_v46 = vadd.f32 %v3534_v19, %v3533_v16  ;;  %v7037_v48 = vld [vmem:[%s10109_s3 + $0xe80] ss:$8 sps:$4 sm:$0xff]   ;;  %v98_v34 = vmul.f32 %v7276_v38, %v7276_v38  ;;  %v7043_v16 = vld [vmem:[%s10109_s3 + $0xff0] ss:$8 sps:$4 sm:$0xff]  }
 0x1d0   :  { %4459 = vmatprep.subr.bf16.mxu1 %v7012_v45  ;;  %v7034_v45 = vld [vmem:[%s10109_s3 + $0xe00] ss:$8 sps:$4 sm:$0xff]   ;;  %v3529_v38 = vmul.f32 %v9268_v7, %v9268_v7 }
 0x1d1   :  { %v3553_v11 = vadd.f32 %v3552_v46, %v3535_v49  ;;  %v7277_v19 = vld [vmem:[%s10131_s21 + $0x88] sm:$0xff] }
 0x1d2   :  { %4487 = vmatpush1.bf16.msra.mxu0 %v7013_v5  ;;  %v301_v23 = vmul.f32 %v7277_v19, %v7277_v19  ;;  %v3539_v19 = vmul.f32 %v9089_v4, %v9089_v4  ;;  %v7188_v4 = vld [vmem:[%s10111_s5 + $0x68] sm:$0xff]  }
 0x1d3   :  { %4460 = vmatpush2.bf16.msra.mxu1 %v7010_v2  ;;  %4488 = vmatprep.subr.bf16.mxu0 %v7021_v27  ;;  %v7273_v2 = vld [vmem:[%s10131_s21 + $0x78] sm:$0xff]  ;;  %v7274_v27 = vld [vmem:[%s10131_s21 + $0x150] sm:$0xff] }
 0x1d4   :  { %4461 = vmatprep.subr.bf16.mxu1 %v7018_v51  ;;  %v299_v5 = vmul.f32 %v7273_v2, %v7273_v2  ;;  %v315_v51 = vadd.f32 %v7628_v20, %v298_v55  ;;  %v3536_v20 = vmul.f32 %v9079_v1, %v9079_v1  ;;  %v2395_v1 = vadd.f32 %v8391_v56, %v2378_v53  ;;  %v7278_v56 = vld [vmem:[%s10131_s21 + $0x160] sm:$0xff] }
 0x1d5   :  { %v99_v57 = vmul.f32 %v7278_v56, %v7278_v56  ;;  %v2405_v2 = vadd.f32 %v8393_v58, %v2387_v44  ;;  %v2382_v44 = vmul.f32 %v9047_v60, %v9047_v60  ;;  %v2389_v60 = vmul.f32 %v8929_v9, %v8929_v9  ;;  %v7052_v9 = vld [vmem:[%s10109_s3 + $0xf50] ss:$8 sps:$4 sm:$0xff]  }
 0x1d6   :  { %4489 = vmatpush1.bf16.msra.mxu0 %v7019_v37  ;;  %v7042_v37 = vld [vmem:[%s10109_s3 + $0xf74] ss:$8 sps:$4 sm:$0xff]   ;;  %v316_v36 = vadd.f32 %v315_v51, %v299_v5 }
 0x1d7   :  { %4462 = vmatpush2.bf16.msra.mxu1 %v7016_v29  ;;  %4490 = vmatprep.subr.bf16.mxu0 %v7027_v52  ;;  %v97_v29 = vmul.f32 %v7274_v27, %v7274_v27  ;;  %v3527_v52 = vmul.f32 %v9074_v0, %v9074_v0  ;;  %v3569_v0 = vpack.c.bf16 %v9273_v50, %v9268_v7  ;;  %v9353_v5 = vld [vmem:[%s10131_s21 + $0xf8] sm:$0xff]  ;;  %v9406_v56 = vld [vmem:[%s10131_s21 + $0x230] sm:$0xff] }
 0x1d8   :  { %4463 = vmatprep.subr.bf16.mxu1 %v7024_v39  ;;  %v7045_v39 = vld [vmem:[%s10109_s3 + $0xff4] ss:$8 sps:$4 sm:$0xff]   ;;  %v3530_v7 = vmul.f32 %v9084_v3, %v9084_v3 }
 0x1d9   :  { %v9358_v51 = vld [vmem:[%s10131_s21 + $0x218] sm:$0xff]  ;;  %v7187_v3 = vld [vmem:[%s10111_s5 + $0x30] sm:$0xff]  }
 0x1da   :  { %4491 = vmatpush1.bf16.msra.mxu0 %v7025_v32  ;;  %v3543_v32 = vadd.f32 %v3542_v59, %v3526_v42  ;;  %v7280_v59 = vld [vmem:[%s10131_s21 + $0x1a0] sm:$0xff] }
 0x1db   :  { %4464 = vmatpush2.bf16.msra.mxu1 %v7022_v63  ;;  %4492 = vmatprep.subr.bf16.mxu0 %v7033_v28  ;;  %v114_v63 = vadd.f32 %v113_v43, %v96_v30  ;;  %v7279_v30 = vld [vmem:[%s10131_s21 + $0x198] sm:$0xff]  ;;  %v309_v42 = vmul.f32 %v7280_v59, %v7280_v59  ;;  %v2380_v43 = vmul.f32 %v8924_v8, %v8924_v8  ;;  %v7049_v8 = vld [vmem:[%s10109_s3 + $0xfe0] ss:$8 sps:$4 sm:$0xff]  }
 0x1dc   :  { %4465 = vmatprep.subr.bf16.mxu1 %v7030_v24  ;;  %v7275_v24 = vld [vmem:[%s10131_s21 + $0x80] sm:$0xff] }
 0x1dd   :  { %v300_v28 = vmul.f32 %v7275_v24, %v7275_v24  ;;  %v115_v12 = vadd.f32 %v114_v63, %v97_v29  ;;  %v7282_v24 = vld [vmem:[%s10131_s21 + $0x1e8] sm:$0xff] }
 0x1de   :  { %4493 = vmatpush1.bf16.msra.mxu0 %v7031_v15  ;;  %v7051_v15 = vld [vmem:[%s10109_s3 + $0xfe4] ss:$8 sps:$4 sm:$0xff]  }
 0x1df   :  { %4466 = vmatpush2.bf16.msra.mxu1 %v7028_v14  ;;  %4494 = vmatprep.subr.bf16.mxu0 %v7039_v35  ;;  %v317_v55 = vadd.f32 %v316_v36, %v300_v28  ;;  %v7048_v14 = vld [vmem:[%s10109_s3 + $0xf64] ss:$8 sps:$4 sm:$0xff]   ;;  %v116_v26 = vadd.f32 %v115_v12, %v98_v34  ;;  %v325_v35 = vadd.f32 %v7630_v21, %v9213_v25  ;;  %v7046_v21 = vld [vmem:[%s10109_s3 + $0xf60] ss:$8 sps:$4 sm:$0xff]  }
 0x1e0   :  { %4467 = vmatprep.subr.bf16.mxu1 %v7036_v33  ;;  %v308_v33 = vmul.f32 %v7279_v30, %v7279_v30  ;;  %v3544_v25 = vadd.f32 %v3543_v32, %v3527_v52  ;;  %v3537_v52 = vmul.f32 %v9358_v51, %v9358_v51  ;;  %v2390_v28 = vmul.f32 %v7282_v24, %v7282_v24  ;;  %v7088_v24 = vld [vmem:[%s10109_s3 + $0x1070] ss:$8 sps:$4 sm:$0xff]  }
 0x1e1   :  { %v318_v53 = vadd.f32 %v317_v55, %v301_v23  ;;  %v117_v46 = vadd.f32 %v116_v26, %v99_v57  ;;  %v2406_v36 = vadd.f32 %v2405_v2, %v9230_v31  ;;  %v3538_v34 = vmul.f32 %v9273_v50, %v9273_v50  ;;  %v7060_v31 = vld [vmem:[%s10109_s3 + $0xf44] ss:$8 sps:$4 sm:$0xff]   ;;  %v7061_v55 = vld [vmem:[%s10109_s3 + $0xfc0] ss:$8 sps:$4 sm:$0xff]   ;;  %v7069_v26 = vld [vmem:[%s10109_s3 + $0xfb4] ss:$8 sps:$4 sm:$0xff]  }
 0x1e2   :  { %4495 = vmatpush1.bf16.msra.mxu0 %v7037_v48  ;;  %v326_v49 = vadd.f32 %v325_v35, %v308_v33  ;;  %v2396_v48 = vadd.f32 %v2395_v1, %v9226_v47  ;;  %v7281_v47 = vld [vmem:[%s10131_s21 + $0x1a8] sm:$0xff]  ;;  %v2391_v12 = vmul.f32 %v9052_v61, %v9052_v61  ;;  %v3540_v33 = vmul.f32 %v9406_v56, %v9406_v56 }
 0x1e3   :  { %4468 = vmatpush2.bf16.msra.mxu1 %v7034_v45  ;;  %4496 = vmatprep.subr.bf16.mxu0 %v7042_v37  ;;  %v2381_v45 = vmul.f32 %v8717_v62, %v8717_v62  ;;  %v7054_v62 = vld [vmem:[%s10109_s3 + $0xf54] ss:$8 sps:$4 sm:$0xff]   ;;  %v310_v58 = vmul.f32 %v7281_v47, %v7281_v47  ;;  %v3554_v37 = vadd.f32 %v3553_v11, %v3536_v20  ;;  %v7055_v20 = vld [vmem:[%s10109_s3 + $0xfd0] ss:$8 sps:$4 sm:$0xff]   ;;  %v7063_v11 = vld [vmem:[%s10109_s3 + $0xfc4] ss:$8 sps:$4 sm:$0xff]  }
 0x1e4   :  { %4523 = vmatprep.subr.bf16.mxu1 %v7045_v39  ;;  %v327_v27 = vadd.f32 %v326_v49, %v309_v42  ;;  %v2397_v29 = vadd.f32 %v2396_v48, %v2380_v43  ;;  %v3528_v39 = vmul.f32 %v9353_v5, %v9353_v5  ;;  %319 = vadd.xlane.f32.xlu1 %v318_v53  ;;  %v7058_v61 = vld [vmem:[%s10109_s3 + $0xf40] ss:$8 sps:$4 sm:$0xff]   ;;  %v7072_v48 = vld [vmem:[%s10109_s3 + $0xf24] ss:$8 sps:$4 sm:$0xff]  }
 0x1e5   :  { %118 = vadd.xlane.f32.xlu0 %v117_v46  ;;  %v2407_v1 = vadd.f32 %v2406_v36, %v2389_v60  ;;  %v3555_v23 = vadd.f32 %v3554_v37, %v3537_v52  ;;  %v3532_v53 = vmul.f32 %v9094_v10, %v9094_v10  ;;  %v3541_v42 = vmul.f32 %v9110_v18, %v9110_v18  ;;  %v7067_v46 = vld [vmem:[%s10109_s3 + $0xfb0] ss:$8 sps:$4 sm:$0xff]   ;;  %v7075_v2 = vld [vmem:[%s10109_s3 + $0xfa4] ss:$8 sps:$4 sm:$0xff]   ;;  %v7073_v47 = vld [vmem:[%s10109_s3 + $0xfa0] ss:$8 sps:$4 sm:$0xff]  }
 0x1e6   :  { %4470 = vmatmul.mubr.bf16.vlgmr.msra.gmra.mxu1 %v3564_v6  ;;  %4497 = vmatpush2.bf16.msra.mxu0 %v7040_v13  ;;  %v7057_v6 = vld [vmem:[%s10109_s3 + $0xfd4] ss:$8 sps:$4 sm:$0xff]   ;;  %v328_v63 = vadd.f32 %v327_v27, %v310_v58  ;;  %v2398_v32 = vadd.f32 %v2397_v29, %v2381_v45  ;;  %v3545_v50 = vadd.f32 %v3544_v25, %v3528_v39  ;;  %v7064_v45 = vld [vmem:[%s10109_s3 + $0xf30] ss:$8 sps:$4 sm:$0xff]   ;;  %v7070_v25 = vld [vmem:[%s10109_s3 + $0xf20] ss:$8 sps:$4 sm:$0xff]  }
 0x1e7   :  { %4524 = vmatpush1.bf16.msra.mxu1 %v7043_v16  ;;  %4498 = vmatprep.subr.bf16.mxu0 %v7048_v14  ;;  %v9393_v13 = vld [vmem:[%s10131_s21 + $0x110] sm:$0xff]  ;;  %v2408_v16 = vadd.f32 %v2407_v1, %v2390_v28  ;;  %v3556_v35 = vadd.f32 %v3555_v23, %v3538_v34  ;;  %v7084_v29 = vld [vmem:[%s10109_s3 + $0xf04] ss:$8 sps:$4 sm:$0xff]   ;;  %v7082_v37 = vld [vmem:[%s10109_s3 + $0xf00] ss:$8 sps:$4 sm:$0xff]  }
 0x1e8   :  { %4525 = vmatprep.subr.bf16.mxu1 %v7051_v15  ;;  %4555 = vmatprep.mubr.bf16.mxu1 %v3569_v0  ;;  %v2399_v0 = vadd.f32 %v2398_v32, %v2382_v44  ;;  %v3531_v57 = vmul.f32 %v9393_v13, %v9393_v13  ;;  %v3546_v14 = vadd.f32 %v3545_v50, %v3529_v38  ;;  %v7066_v15 = vld [vmem:[%s10109_s3 + $0xf34] ss:$8 sps:$4 sm:$0xff]   ;;  %v7079_v27 = vld [vmem:[%s10109_s3 + $0xf90] ss:$8 sps:$4 sm:$0xff]   ;;  %v7087_v60 = vld [vmem:[%s10109_s3 + $0xf84] ss:$8 sps:$4 sm:$0xff]  }
 0x1e9   :  { %329 = vadd.xlane.f32.xlu1 %v328_v63  ;;  %v2409_v30 = vadd.f32 %v2408_v16, %v2391_v12  ;;  %v3557_v43 = vadd.f32 %v3556_v35, %v3539_v19  ;;  %v7078_v58 = vld [vmem:[%s10109_s3 + $0xf14] ss:$8 sps:$4 sm:$0xff]   ;;  %v7085_v39 = vld [vmem:[%s10109_s3 + $0xf80] ss:$8 sps:$4 sm:$0xff]   ;;  %v3566_v32 = vpack.c.bf16 %v9248_v41, %v9241_v40  ;;  %v7091_v28 = vld [vmem:[%s10109_s3 + $0x10f0] ss:$8 sps:$4 sm:$0xff]   ;;  %v3571_v41 = vpack.c.bf16 %v9406_v56, %v9393_v13 }
 0x1ea   :  { %4499 = vmatpush2.bf16.msra.mxu0 %v7046_v21  ;;  %2400 = vadd.xlane.f32.xlu0 %v2399_v0  ;;  %v3547_v59 = vadd.f32 %v3546_v14, %v3530_v7  ;;  %v7081_v44 = vld [vmem:[%s10109_s3 + $0xf94] ss:$8 sps:$4 sm:$0xff]   ;;  %v7096_v36 = vld [vmem:[%s10109_s3 + $0x1064] ss:$8 sps:$4 sm:$0xff]   ;;  %v7106_v1 = vld [vmem:[%s10109_s3 + $0x1040] ss:$8 sps:$4 sm:$0xff]  }
 0x1eb   :  { %4526 = vmatpush1.bf16.msra.mxu1 %v7049_v8  ;;  %4500 = vmatprep.subr.bf16.mxu0 %v7054_v62  ;;  %v3558_v21 = vadd.f32 %v3557_v43, %v3540_v33  ;;  %v7090_v52 = vld [vmem:[%s10109_s3 + $0x1074] ss:$8 sps:$4 sm:$0xff]   ;;  %v7099_v40 = vld [vmem:[%s10109_s3 + $0x10e4] ss:$8 sps:$4 sm:$0xff]   ;;  %v7109_v7 = vld [vmem:[%s10109_s3 + $0x10c0] ss:$8 sps:$4 sm:$0xff]   ;;  %v3568_v43 = vpack.c.bf16 %v9358_v51, %v9353_v5 }
 0x1ec   :  { %4527 = vmatprep.subr.bf16.mxu1 %v7057_v6  ;;  %v3548_v49 = vadd.f32 %v3547_v59, %v3531_v57  ;;  %v7076_v6 = vld [vmem:[%s10109_s3 + $0xf10] ss:$8 sps:$4 sm:$0xff]   ;;  %v7093_v63 = vld [vmem:[%s10109_s3 + $0x10f4] ss:$8 sps:$4 sm:$0xff]   ;;  %v7108_v0 = vld [vmem:[%s10109_s3 + $0x1044] ss:$8 sps:$4 sm:$0xff]  }
 0x1ed   :  { %2410 = vadd.xlane.f32.xlu1 %v2409_v30  ;;  %v3559_v62 = vadd.f32 %v3558_v21, %v3541_v42  ;;  %v7102_v38 = vld [vmem:[%s10109_s3 + $0x1054] ss:$8 sps:$4 sm:$0xff]   ;;  %v7111_v12 = vld [vmem:[%s10109_s3 + $0x10c4] ss:$8 sps:$4 sm:$0xff]   ;;  %v7112_v16 = vld [vmem:[%s10109_s3 + $0x1030] ss:$8 sps:$4 sm:$0xff]  }
 0x1ee   :  { %4501 = vmatpush2.bf16.msra.mxu0 %v7052_v9  ;;  %v3549_v8 = vadd.f32 %v3548_v49, %v3532_v53  ;;  %v7094_v9 = vld [vmem:[%s10109_s3 + $0x1060] ss:$8 sps:$4 sm:$0xff]   ;;  %v7105_v34 = vld [vmem:[%s10109_s3 + $0x10d4] ss:$8 sps:$4 sm:$0xff]   ;;  %v7115_v19 = vld [vmem:[%s10109_s3 + $0x10b0] ss:$8 sps:$4 sm:$0xff]  }
 0x1ef   :  { %4528 = vmatpush1.bf16.msra.mxu1 %v7055_v20  ;;  %4502 = vmatprep.subr.bf16.mxu0 %v7060_v31  ;;  %v7097_v20 = vld [vmem:[%s10109_s3 + $0x10e0] ss:$8 sps:$4 sm:$0xff]   ;;  %v7100_v31 = vld [vmem:[%s10109_s3 + $0x1050] ss:$8 sps:$4 sm:$0xff]   ;;  %v7114_v50 = vld [vmem:[%s10109_s3 + $0x1034] ss:$8 sps:$4 sm:$0xff]  }
 0x1f0   :  { %4529 = vmatprep.subr.bf16.mxu1 %v7063_v11  ;;  %3550 = vadd.xlane.f32.xlu0 %v3549_v8  ;;  %v7103_v11 = vld [vmem:[%s10109_s3 + $0x10d0] ss:$8 sps:$4 sm:$0xff]   ;;  %v7117_v13 = vld [vmem:[%s10109_s3 + $0x10b4] ss:$8 sps:$4 sm:$0xff]   ;;  %v7120_v23 = vld [vmem:[%s10109_s3 + $0x1024] ss:$8 sps:$4 sm:$0xff]  }
 0x1f1   :  { %3560 = vadd.xlane.f32.xlu1 %v3559_v62  ;;  %v7121_v56 = vld [vmem:[%s10109_s3 + $0x10a0] ss:$8 sps:$4 sm:$0xff]   ;;  %v7126_v57 = vld [vmem:[%s10109_s3 + $0x1014] ss:$8 sps:$4 sm:$0xff]   ;;  %v7132_v30 = vld [vmem:[%s10109_s3 + $0x1004] ss:$8 sps:$4 sm:$0xff]  }
 0x1f2   :  { %4503 = vmatpush2.bf16.msra.mxu0 %v7058_v61  ;;  %v7123_v61 = vld [vmem:[%s10109_s3 + $0x10a4] ss:$8 sps:$4 sm:$0xff]   ;;  %v7129_v14 = vld [vmem:[%s10109_s3 + $0x1094] ss:$8 sps:$4 sm:$0xff]   ;;  %v7130_v35 = vld [vmem:[%s10109_s3 + $0x1000] ss:$8 sps:$4 sm:$0xff]  }
 0x1f3   :  { %4530 = vmatpush1.bf16.msra.mxu1 %v7061_v55  ;;  %4504 = vmatprep.subr.bf16.mxu0 %v7066_v15  ;;  %v7118_v55 = vld [vmem:[%s10109_s3 + $0x1020] ss:$8 sps:$4 sm:$0xff]   ;;  %v7124_v15 = vld [vmem:[%s10109_s3 + $0x1010] ss:$8 sps:$4 sm:$0xff]   ;;  %v7135_v33 = vld [vmem:[%s10109_s3 + $0x1084] ss:$8 sps:$4 sm:$0xff]  }
 0x1f4   :  { %4531 = vmatprep.subr.bf16.mxu1 %v7069_v26  ;;  %v7127_v26 = vld [vmem:[%s10109_s3 + $0x1090] ss:$8 sps:$4 sm:$0xff]   ;;  %v7133_v53 = vld [vmem:[%s10109_s3 + $0x1080] ss:$8 sps:$4 sm:$0xff]   ;;  %v7138_v59 = vld [vmem:[%s10109_s3 + $0x1174] ss:$8 sps:$4 sm:$0xff]  }
 0x1f5   :  { %v7141_v42 = vld [vmem:[%s10109_s3 + $0x11f4] ss:$8 sps:$4 sm:$0xff]   ;;  %v7144_v49 = vld [vmem:[%s10109_s3 + $0x1164] ss:$8 sps:$4 sm:$0xff]   ;;  %v7142_v51 = vld [vmem:[%s10109_s3 + $0x1160] ss:$8 sps:$4 sm:$0xff]  }
 0x1f6   :  { %4505 = vmatpush2.bf16.msra.mxu0 %v7064_v45  ;;  %v7136_v45 = vld [vmem:[%s10109_s3 + $0x1170] ss:$8 sps:$4 sm:$0xff]   ;;  %v7147_v5 = vld [vmem:[%s10109_s3 + $0x11e4] ss:$8 sps:$4 sm:$0xff]   ;;  %v7153_v21 = vld [vmem:[%s10109_s3 + $0x11d4] ss:$8 sps:$4 sm:$0xff]  }
 0x1f7   :  { %4532 = vmatpush1.bf16.msra.mxu1 %v7067_v46  ;;  %4506 = vmatprep.subr.bf16.mxu0 %v7072_v48  ;;  %v7139_v46 = vld [vmem:[%s10109_s3 + $0x11f0] ss:$8 sps:$4 sm:$0xff]   ;;  %v7145_v48 = vld [vmem:[%s10109_s3 + $0x11e0] ss:$8 sps:$4 sm:$0xff]  }
 0x1f8   :  { %4533 = vmatprep.subr.bf16.mxu1 %v7075_v2  ;;  %v7150_v2 = vld [vmem:[%s10109_s3 + $0x1154] ss:$8 sps:$4 sm:$0xff]   ;;  %v7148_v8 = vld [vmem:[%s10109_s3 + $0x1150] ss:$8 sps:$4 sm:$0xff]   ;;  %v7189_v10 = vld [vmem:[%s10111_s5 + $0x28] sm:$0xff]  }
 0x1f9   :  { %v7151_v62 = vld [vmem:[%s10109_s3 + $0x11d0] ss:$8 sps:$4 sm:$0xff]   ;;  %v7191_v18 = vld [vmem:[%s10111_s5 + $0x20] sm:$0xff]  }
 0x1fa   :  { %4507 = vmatpush2.bf16.msra.mxu0 %v7070_v25  ;;  %v7156_v25 = vld [vmem:[%s10109_s3 + $0x1144] ss:$8 sps:$4 sm:$0xff]  }
 0x1fb   :  { %4534 = vmatpush1.bf16.msra.mxu1 %v7073_v47  ;;  %4508 = vmatprep.subr.bf16.mxu0 %v7078_v58  ;;  %v7154_v47 = vld [vmem:[%s10109_s3 + $0x1140] ss:$8 sps:$4 sm:$0xff]  }
 0x1fc   :  { %4535 = vmatprep.subr.bf16.mxu1 %v7081_v44  ;;  %v7157_v58 = vld [vmem:[%s10109_s3 + $0x11c0] ss:$8 sps:$4 sm:$0xff]   ;;  %v7162_v44 = vld [vmem:[%s10109_s3 + $0x1134] ss:$8 sps:$4 sm:$0xff]  }
 0x1fe   :  { %4509 = vmatpush2.bf16.msra.mxu0 %v7076_v6  ;;  %v7165_v6 = vld [vmem:[%s10109_s3 + $0x11b4] ss:$8 sps:$4 sm:$0xff]  }
 0x1ff   :  { %4536 = vmatpush1.bf16.msra.mxu1 %v7079_v27  ;;  %4510 = vmatprep.subr.bf16.mxu0 %v7084_v29  ;;  %v7160_v27 = vld [vmem:[%s10109_s3 + $0x1130] ss:$8 sps:$4 sm:$0xff]  }
 0x200   :  { %4537 = vmatprep.subr.bf16.mxu1 %v7087_v60  ;;  %v7163_v29 = vld [vmem:[%s10109_s3 + $0x11b0] ss:$8 sps:$4 sm:$0xff]   ;;  %v7168_v60 = vld [vmem:[%s10109_s3 + $0x1124] ss:$8 sps:$4 sm:$0xff]  }
 0x202   :  { %4511 = vmatpush2.bf16.msra.mxu0 %v7082_v37  ;;  %v7171_v37 = vld [vmem:[%s10109_s3 + $0x11a4] ss:$8 sps:$4 sm:$0xff]  }
 0x203   :  { %4538 = vmatpush1.bf16.msra.mxu1 %v7085_v39  ;;  %4566 = vmatprep.subr.bf16.mxu0 %v7093_v63  ;;  %v7166_v39 = vld [vmem:[%s10109_s3 + $0x1120] ss:$8 sps:$4 sm:$0xff]   ;;  %v7174_v63 = vld [vmem:[%s10109_s3 + $0x1114] ss:$8 sps:$4 sm:$0xff]  }
 0x204   :  { %4539 = vmatprep.subr.bf16.mxu1 %v7090_v52  ;;  %v7169_v52 = vld [vmem:[%s10109_s3 + $0x11a0] ss:$8 sps:$4 sm:$0xff]  }
 0x205   :  { %4513 = vmatmul.mubr.bf16.vlgmr.msra.gmra.mxu0 %v3566_v32  ;;  %v7177_v32 = vld [vmem:[%s10109_s3 + $0x1194] ss:$8 sps:$4 sm:$0xff]  }
 0x206   :  { %4567 = vmatpush1.bf16.msra.mxu0 %v7091_v28  ;;  %4598 = vmatprep.mubr.bf16.mxu0 %v3571_v41  ;;  %v7175_v28 = vld [vmem:[%s10109_s3 + $0x1190] ss:$8 sps:$4 sm:$0xff]   ;;  %v7178_v41 = vld [vmem:[%s10109_s3 + $0x1100] ss:$8 sps:$4 sm:$0xff]  }
 0x207   :  { %4540 = vmatpush2.bf16.msra.mxu1 %v7088_v24  ;;  %4568 = vmatprep.subr.bf16.mxu0 %v7099_v40  ;;  %v7172_v24 = vld [vmem:[%s10109_s3 + $0x1110] ss:$8 sps:$4 sm:$0xff]   ;;  %v7183_v40 = vld [vmem:[%s10109_s3 + $0x1184] ss:$8 sps:$4 sm:$0xff]  }
 0x208   :  { %4541 = vmatprep.subr.bf16.mxu1 %v7096_v36  ;;  %v7180_v36 = vld [vmem:[%s10109_s3 + $0x1104] ss:$8 sps:$4 sm:$0xff]  }
 0x20a   :  { %4569 = vmatpush1.bf16.msra.mxu0 %v7097_v20  ;;  %v7184_v20 = vld [vmem:[%s10111_s5 + $0x78] sm:$0xff]  }
 0x20b   :  { %4542 = vmatpush2.bf16.msra.mxu1 %v7094_v9  ;;  %4570 = vmatprep.subr.bf16.mxu0 %v7105_v34  ;;  %v7181_v9 = vld [vmem:[%s10109_s3 + $0x1180] ss:$8 sps:$4 sm:$0xff]   ;;  %v7186_v34 = vld [vmem:[%s10111_s5 + $0x70] sm:$0xff]  }
 0x20c   :  { %4543 = vmatprep.subr.bf16.mxu1 %v7102_v38  ;;  %v7185_v38 = vld [vmem:[%s10111_s5 + $0x38] sm:$0xff]  }
 0x20e   :  { %4571 = vmatpush1.bf16.msra.mxu0 %v7103_v11  ;;  %v7192_v11 = vld [vmem:[%s10111_s5 + $0x58] sm:$0xff]  }
 0x20f   :  { %4544 = vmatpush2.bf16.msra.mxu1 %v7100_v31  ;;  %4572 = vmatprep.subr.bf16.mxu0 %v7111_v12  ;;  %v9695_v31 = vpop.f32.mrf.mxu1 }
 0x210   :  { %4545 = vmatprep.subr.bf16.mxu1 %v7108_v0  ;;  %v7193_v0 = vld [vmem:[%s10111_s5 + $0x18] sm:$0xff]  }
 0x212   :  { %4573 = vmatpush1.bf16.msra.mxu0 %v7109_v7  ;;  %v7194_v7 = vld [vmem:[%s10111_s5 + $0x50] sm:$0xff]  }
 0x213   :  { %4546 = vmatpush2.bf16.msra.mxu1 %v7106_v1  ;;  %4574 = vmatprep.subr.bf16.mxu0 %v7117_v13  ;;  %v9705_v1 = vpop.f32.mrf.mxu1 }
 0x214   :  { %4547 = vmatprep.subr.bf16.mxu1 %v7114_v50  ;;  %v7195_v50 = vld [vmem:[%s10111_s5 + $0x10] sm:$0xff]  }
 0x216   :  { %4575 = vmatpush1.bf16.msra.mxu0 %v7115_v19  ;;  %v7196_v19 = vld [vmem:[%s10111_s5 + $0x48] sm:$0xff]  }
 0x217   :  { %4548 = vmatpush2.bf16.msra.mxu1 %v7112_v16  ;;  %4576 = vmatprep.subr.bf16.mxu0 %v7123_v61  ;;  %v9715_v16 = vpop.f32.mrf.mxu1 }
 0x218   :  { %4549 = vmatprep.subr.bf16.mxu1 %v7120_v23  ;;  %v7197_v23 = vld [vmem:[%s10111_s5 + $0x8] sm:$0xff]  }
 0x21a   :  { %4577 = vmatpush1.bf16.msra.mxu0 %v7121_v56  ;;  %v7198_v56 = vld [vmem:[%s10111_s5 + $0x40] sm:$0xff]  }
 0x21b   :  { %4550 = vmatpush2.bf16.msra.mxu1 %v7118_v55  ;;  %4578 = vmatprep.subr.bf16.mxu0 %v7129_v14  ;;  %v9725_v55 = vpop.f32.mrf.mxu1 }
 0x21c   :  { %4551 = vmatprep.subr.bf16.mxu1 %v7126_v57  ;;  %v7199_v57 = vld [vmem:[%s10111_s5] sm:$0xff]  }
 0x21e   :  { %4579 = vmatpush1.bf16.msra.mxu0 %v7127_v26 }
 0x21f   :  { %4552 = vmatpush2.bf16.msra.mxu1 %v7124_v15  ;;  %4580 = vmatprep.subr.bf16.mxu0 %v7135_v33  ;;  %v9735_v15 = vpop.f32.mrf.mxu1 }
 0x220   :  { %4553 = vmatprep.subr.bf16.mxu1 %v7132_v30 }
 0x221   :  { %v9739_v30 = vpop.f32.mrf.mxu1 }
 0x222   :  { %4581 = vmatpush1.bf16.msra.mxu0 %v7133_v53 }
 0x223   :  { %4554 = vmatpush2.bf16.msra.mxu1 %v7130_v35  ;;  %4582 = vmatprep.subr.bf16.mxu0 %v7138_v59  ;;  %v9743_v35 = vpop.f32.mrf.mxu1 }
 0x224   :  { %4609 = vmatprep.subr.bf16.mxu1 %v7141_v42 }
 0x225   :  { %v9747_v59 = vpop.f32.mrf.mxu1 }
 0x226   :  { %4556 = vmatmul.mubr.bf16.vlgmr.msra.gmra.mxu1 %v3568_v43  ;;  %4583 = vmatpush2.bf16.msra.mxu0 %v7136_v45 }
 0x227   :  { %4610 = vmatpush1.bf16.msra.mxu1 %v7139_v46  ;;  %4584 = vmatprep.subr.bf16.mxu0 %v7144_v49  ;;  %v9751_v43 = vpop.f32.mrf.mxu1 }
 0x228   :  { %4611 = vmatprep.subr.bf16.mxu1 %v7147_v5  ;;  %4641 = vmatprep.mubr.bf16.mxu1 %v7305_v54  ;;  %v7159_v54 = vld [vmem:[%s10109_s3 + $0x11c4] ss:$8 sps:$4 sm:$0xff]  }
 0x229   :  { %v9755_v46 = vpop.f32.mrf.mxu1 }
 0x22a   :  { %4585 = vmatpush2.bf16.msra.mxu0 %v7142_v51 }
 0x22b   :  { %4612 = vmatpush1.bf16.msra.mxu1 %v7145_v48  ;;  %4586 = vmatprep.subr.bf16.mxu0 %v7150_v2  ;;  %v9759_v5 = vpop.f32.mrf.mxu1 }
 0x22c   :  { %4613 = vmatprep.subr.bf16.mxu1 %v7153_v21 }
 0x22d   :  { %v9763_v48 = vpop.f32.mrf.mxu1 }
 0x22e   :  { %4587 = vmatpush2.bf16.msra.mxu0 %v7148_v8 }
 0x22f   :  { %4614 = vmatpush1.bf16.msra.mxu1 %v7151_v62  ;;  %4588 = vmatprep.subr.bf16.mxu0 %v7156_v25  ;;  %v9767_v21 = vpop.f32.mrf.mxu1 }
 0x230   :  { %4615 = vmatprep.subr.bf16.mxu1 %v7159_v54 }
 0x231   :  { %v9771_v62 = vpop.f32.mrf.mxu1 }
 0x232   :  { %4589 = vmatpush2.bf16.msra.mxu0 %v7154_v47 }
 0x233   :  { %4616 = vmatpush1.bf16.msra.mxu1 %v7157_v58  ;;  %4590 = vmatprep.subr.bf16.mxu0 %v7162_v44  ;;  %v9775_v54 = vpop.f32.mrf.mxu1 }
 0x234   :  { %4617 = vmatprep.subr.bf16.mxu1 %v7165_v6 }
 0x235   :  { %v9779_v58 = vpop.f32.mrf.mxu1 }
 0x236   :  { %4591 = vmatpush2.bf16.msra.mxu0 %v7160_v27 }
 0x237   :  { %4618 = vmatpush1.bf16.msra.mxu1 %v7163_v29  ;;  %4592 = vmatprep.subr.bf16.mxu0 %v7168_v60  ;;  %v9783_v6 = vpop.f32.mrf.mxu1 }
 0x238   :  { %4619 = vmatprep.subr.bf16.mxu1 %v7171_v37  ;;  %10132 = vst [vmem:[#allocation5_spill] sm:$0xff] %v9783_v6 }
 0x239   :  { %v9787_v29 = vpop.f32.mrf.mxu1 }
 0x23a   :  { %4593 = vmatpush2.bf16.msra.mxu0 %v7166_v39  ;;  %10133 = vst [vmem:[#allocation6_spill] sm:$0xff] %v9787_v29 }
 0x23b   :  { %4620 = vmatpush1.bf16.msra.mxu1 %v7169_v52  ;;  %4594 = vmatprep.subr.bf16.mxu0 %v7174_v63  ;;  %v9791_v37 = vpop.f32.mrf.mxu1 }
 0x23c   :  { %4621 = vmatprep.subr.bf16.mxu1 %v7177_v32  ;;  %10135 = vst [vmem:[#allocation8_spill] sm:$0xff] %v9791_v37 }
 0x23d   :  { %v9795_v52 = vpop.f32.mrf.mxu1 }
 0x23e   :  { %4595 = vmatpush2.bf16.msra.mxu0 %v7172_v24  ;;  %10137 = vst [vmem:[#allocation10_spill] sm:$0xff] %v9795_v52 }
 0x23f   :  { %4622 = vmatpush1.bf16.msra.mxu1 %v7175_v28  ;;  %4596 = vmatprep.subr.bf16.mxu0 %v7180_v36  ;;  %v3364_v32 = vpop.f32.mrf.mxu1 }
 0x240   :  { %4623 = vmatprep.subr.bf16.mxu1 %v7183_v40 }
 0x241   :  { %v9799_v28 = vpop.f32.mrf.mxu1 }
 0x242   :  { %4597 = vmatpush2.bf16.msra.mxu0 %v7178_v41 }
 0x243   :  { %4624 = vmatpush1.bf16.msra.mxu1 %v7181_v9  ;;  %6178 = vmatprep.subr.bf16.mxu0 %v7184_v20  ;;  %v9803_v40 = vpop.f32.mrf.mxu1 }
 0x245   :  { %4599 = vmatmul.mubr.bf16.vlgmr.msra.gmra.mxu0 %v3570_v17  ;;  %v7190_v17 = vld [vmem:[%s10111_s5 + $0x60] sm:$0xff]   ;;  %v9807_v9 = vpop.f32.mrf.mxu1 }
 0x246   :  { %4642 = vmatmul.mubr.bf16.vlgmr.msra.gmra.mxu1 %v3572_v22  ;;  %6179 = vmatpush3.bf16.msra.mxu0 %v7185_v38  ;;  %v9693_v22 = vpop.f32.mrf.mxu0 }
 0x247   :  { %6180 = vmatprep.subr.bf16.mxu0 %v7186_v34 }
 0x248   :  { %v9703_v12 = vpop.f32.mrf.mxu0 }
 0x24a   :  { %6181 = vmatpush3.bf16.msra.mxu0 %v7187_v3  ;;  %v9713_v13 = vpop.f32.mrf.mxu0 }
 0x24b   :  { %6182 = vmatprep.subr.bf16.mxu0 %v7188_v4 }
 0x24c   :  { %v9723_v61 = vpop.f32.mrf.mxu0 }
 0x24e   :  { %6183 = vmatpush3.bf16.msra.mxu0 %v7189_v10  ;;  %v9733_v14 = vpop.f32.mrf.mxu0  ;;  %v109_v4 = vpop.xlane.xlu0 %108 }
 0x24f   :  { %6184 = vmatprep.subr.bf16.mxu0 %v7190_v17 }
 0x250   :  { %v9737_v26 = vpop.f32.mrf.mxu0 }
 0x252   :  { %6185 = vmatpush3.bf16.msra.mxu0 %v7191_v18  ;;  %v9741_v33 = vpop.f32.mrf.mxu0 }
 0x253   :  { %6186 = vmatprep.subr.bf16.mxu0 %v7192_v11 }
 0x254   :  { %v9745_v53 = vpop.f32.mrf.mxu0 }
 0x256   :  { %6187 = vmatpush3.bf16.msra.mxu0 %v7193_v0  ;;  %v9749_v42 = vpop.f32.mrf.mxu0 }
 0x257   :  { %6188 = vmatprep.subr.bf16.mxu0 %v7194_v7 }
 0x258   :  { %v9753_v45 = vpop.f32.mrf.mxu0 }
 0x25a   :  { %6189 = vmatpush3.bf16.msra.mxu0 %v7195_v50  ;;  %v9757_v49 = vpop.f32.mrf.mxu0 }
 0x25b   :  { %6190 = vmatprep.subr.bf16.mxu0 %v7196_v19 }
 0x25c   :  { %v9761_v51 = vpop.f32.mrf.mxu0 }
 0x25e   :  { %6191 = vmatpush3.bf16.msra.mxu0 %v7197_v23  ;;  %v9765_v2 = vpop.f32.mrf.mxu0 }
 0x25f   :  { %6192 = vmatprep.subr.bf16.mxu0 %v7198_v56 }
 0x260   :  { %v9769_v8 = vpop.f32.mrf.mxu0 }
 0x262   :  { %6193 = vmatpush3.bf16.msra.mxu0 %v7199_v57  ;;  %v9773_v25 = vpop.f32.mrf.mxu0 }
 0x264   :  { %v9777_v47 = vpop.f32.mrf.mxu0 }
 0x266   :  { %v9781_v44 = vpop.f32.mrf.mxu0  ;;  %v9809_v38 = vpop.f32.mrf.mxu1 }
 0x268   :  { %v9785_v27 = vpop.f32.mrf.mxu0  ;;  %v9813_v3 = vpop.f32.mrf.mxu1 }
 0x26a   :  { %v9789_v60 = vpop.f32.mrf.mxu0  ;;  %v9817_v17 = vpop.f32.mrf.mxu1 }
 0x26b   :  { %10134 = vst [vmem:[#allocation7_spill] sm:$0xff] %v9789_v60  ;;  %10138 = vst [vmem:[#allocation11_spill] sm:$0xff] %v9817_v17  ;;  %v1286_v17 = vadd.f32 %v9705_v1, %v9703_v12 }
 0x26c   :  { %v9793_v39 = vpop.f32.mrf.mxu0  ;;  %v9821_v7 = vpop.f32.mrf.mxu1 }
 0x26d   :  { %10136 = vst [vmem:[#allocation9_spill] sm:$0xff] %v9793_v39  ;;  %v320_v18 = vpop.xlane.xlu1 %319  ;;  %10139 = vst [vmem:[#allocation12_spill] sm:$0xff] %v9821_v7  ;;  %v1284_v39 = vadd.f32 %v9695_v31, %v9693_v22  ;;  %v1288_v7 = vadd.f32 %v9715_v16, %v9713_v13  ;;  %v1290_v22 = vadd.f32 %v9725_v55, %v9723_v61 }
 0x26e   :  { %v3321_v63 = vpop.f32.mrf.mxu0  ;;  %v119_v11 = vpop.xlane.xlu0 %118  ;;  %v331_v37 = vadd.f32 %v320_v18, %v109_v4 }
 0x26f   :  { %v1331_v31 = vadd.f32 %v9741_v33, %v1288_v7  ;;  %v1333_v1 = vadd.f32 %v9745_v53, %v1290_v22 }
 0x270   :  { %v9797_v24 = vpop.f32.mrf.mxu0 }
 0x271   :  { %v1376_v53 = vadd.f32 %v9747_v59, %v1333_v1  ;;  %v10145_v1 = vld [vmem:[#allocation6_spill] sm:$0xff] }
 0x272   :  { %v9801_v36 = vpop.f32.mrf.mxu0  ;;  %v330_v23 = vpop.xlane.xlu1 %329 }
 0x273   :  { %v2401_v56 = vpop.xlane.xlu0 %2400 }
 0x274   :  { %v9805_v41 = vpop.f32.mrf.mxu0  ;;  %v2412_v4 = vadd.f32 %v2401_v56, %v331_v37  ;;  %v1374_v37 = vadd.f32 %v9743_v35, %v1331_v31 }
 0x276   :  { %v3407_v20 = vpop.f32.mrf.mxu0  ;;  %v2411_v60 = vpop.xlane.xlu1 %2410  ;;  %v1417_v7 = vadd.f32 %v9757_v49, %v1374_v37 }
 0x278   :  { %v9811_v34 = vpop.f32.mrf.mxu0 }
 0x279   :  { %v3551_v12 = vpop.xlane.xlu0 %3550 }
 0x27a   :  { %v9815_v10 = vpop.f32.mrf.mxu0 }
 0x27c   :  { %v9819_v0 = vpop.f32.mrf.mxu0 }
 0x285   :  { %v9823_v50 = vpop.f32.mrf.mxu0 }
 0x286   :  { %10140 = vst [vmem:[#allocation13_spill] sm:$0xff] %v9823_v50  ;;  %v1327_v50 = vadd.f32 %v9733_v14, %v1284_v39 }
 0x287   :  { %v9827_v57 = vpop.f32.mrf.mxu0 }
 0x288   :  { %10141 = vst [vmem:[#allocation14_spill] sm:$0xff] %v9827_v57  ;;  %v1329_v57 = vadd.f32 %v9737_v26, %v1286_v17  ;;  %v1370_v16 = vadd.f32 %v9735_v15, %v1327_v50  ;;  %v3562_v26 = vadd.f32 %v3551_v12, %v2412_v4  ;;  %v3561_v17 = vpop.xlane.xlu1 %3560  ;;  %v3365_v50 = vadd.f32 %v3364_v32, %v3321_v63 }
 0x289   :  { %v9837_v29 = vpop.f32.mrf.mxu0 }
 0x28a   :  { %v1372_v14 = vadd.f32 %v9739_v30, %v1329_v57  ;;  %v1413_v55 = vadd.f32 %v9749_v42, %v1370_v16  ;;  %v4656_v30 = vmax.f32 %v3562_v26, 1e-24  ;;  %v2180_v57 = vadd.f32 %v9759_v5, %v1417_v7  ;;  %v10148_v26 = vld [vmem:[#allocation11_spill] sm:$0xff] }
 0x28b   :  { %v9847_v18 = vpop.f32.mrf.mxu0  ;;  %v3408_v49 = vadd.f32 %v3407_v20, %v3365_v50  ;;  %v3369_v5 = vadd.f32 %v9803_v40, %v9801_v36 }
 0x28c   :  { %v1415_v33 = vadd.f32 %v9753_v45, %v1372_v14  ;;  %7228 = vrsqrt.f32 %v4656_v30 }
 0x28d   :  { %v3412_v20 = vadd.f32 %v9815_v10, %v3369_v5 }
 0x28e   :  { %v2178_v15 = vadd.f32 %v9755_v46, %v1415_v33  ;;  %v4666_v46 = vlaneseq }
 0x290   :  { %v2221_v45 = vadd.f32 %v9769_v8, %v2178_v15  ;;  %v4667_v36 = vshrl.u32 %v4666_v46, 7  ;;  %v4664_v15 = vld [vmem:[%s10110_s4] sm:$0x3] }
 0x2a6   :  { %v9825_v19 = vpop.f32.mrf.mxu1 }
 0x2a8   :  { %v9829_v52 = vpop.f32.mrf.mxu1 }
 0x2a9   :  { %10142 = vst [vmem:[#allocation15_spill] sm:$0xff] %v9829_v52  ;;  %v332_v52 = vadd.f32 %v330_v23, %v119_v11  ;;  %v2176_v23 = vadd.f32 %v9751_v43, %v1413_v55  ;;  %v3367_v43 = vadd.f32 %v9799_v28, %v9797_v24  ;;  %v10150_v55 = vld [vmem:[#allocation9_spill] sm:$0xff] }
 0x2aa   :  { %v9839_v6 = vpop.f32.mrf.mxu1 }
 0x2ab   :  { %v2413_v39 = vadd.f32 %v2411_v60, %v332_v52  ;;  %v1419_v52 = vadd.f32 %v9761_v51, %v1376_v53  ;;  %v2219_v42 = vadd.f32 %v9765_v2, %v2176_v23  ;;  %v2264_v51 = vadd.f32 %v9771_v62, %v2221_v45 }
 0x2ac   :  { %v9849_v13 = vpop.f32.mrf.mxu1  ;;  %v3410_v2 = vadd.f32 %v9811_v34, %v3367_v43  ;;  %v3451_v62 = vadd.f32 %v9809_v38, %v3408_v49 }
 0x2ad   :  { %v3563_v60 = vadd.f32 %v3561_v17, %v2413_v39  ;;  %v2182_v59 = vadd.f32 %v9763_v48, %v1419_v52  ;;  %v2262_v4 = vadd.f32 %v9767_v21, %v2219_v42  ;;  %v2223_v48 = vadd.f32 %v9773_v25, %v2180_v57  ;;  %v10147_v39 = vld [vmem:[#allocation7_spill] sm:$0xff] }
 0x2ae   :  { %v2307_v28 = vadd.f32 %v9785_v27, %v2264_v51  ;;  %v3371_v21 = vadd.f32 %v9807_v9, %v9805_v41  ;;  %v10143_v27 = vld [vmem:[#allocation13_spill] sm:$0xff]  ;;  %v3455_v17 = vadd.f32 %v10148_v26, %v3412_v20  ;;  %v4672_v57 = vsub.s32 1, %v4667_v36 }
 0x2af   :  { %v4657_v63 = vmax.f32 %v3563_v60, 1e-24  ;;  %v2225_v22 = vadd.f32 %v9777_v47, %v2182_v59  ;;  %v2305_v24 = vadd.f32 %v9781_v44, %v2262_v4  ;;  %v2266_v40 = vadd.f32 %v9775_v54, %v2223_v48  ;;  %v10144_v9 = vld [vmem:[#allocation5_spill] sm:$0xff]  ;;  %v7229_v48 = vpop.eup %7228 }
 0x2b0   :  { %v3453_v47 = vadd.f32 %v9813_v3, %v3410_v2  ;;  %v3414_v44 = vadd.f32 %v9819_v0, %v3371_v21  ;;  %v3494_v31 = vadd.f32 %v10143_v27, %v3451_v62  ;;  %v2350_v10 = vadd.f32 %v10145_v1, %v2307_v28  ;;  %v10146_v16 = vld [vmem:[#allocation15_spill] sm:$0xff] }
 0x2b1   :  { %7230 = vrsqrt.f32 %v4657_v63  ;;  %v2268_v25 = vadd.f32 %v9779_v58, %v2225_v22  ;;  %v2348_v38 = vadd.f32 %v10144_v9, %v2305_v24  ;;  %v10149_v58 = vld [vmem:[#allocation14_spill] sm:$0xff]  ;;  %v4668_v0 = vsub.s32 0, %v4667_v36 }
 0x2b2   :  { %v3496_v37 = vadd.f32 %v10149_v58, %v3453_v47  ;;  %v3498_v52 = vadd.f32 %v9837_v29, %v3455_v17  ;;  %v10153_v22 = vld [vmem:[#allocation10_spill] sm:$0xff] }
 0x2b3   :  { %v2311_v33 = vadd.f32 %v10150_v55, %v2268_v25  ;;  %v3502_v60 = vadd.f32 %v3494_v31, %v2348_v38  ;;  %v4669_v63 = vrot.slane %v4664_v15, %v4668_v0  ;;  %v7200_v0 = vld [vmem:[%s10113_s7 + $0x38] sm:$0xff]   ;;  %v7306_v55 = vmov 0.0  }
 0x2b4   :  { %v3503_v49 = vadd.f32 %v3496_v37, %v2350_v10  ;;  %6234 = vmatprep.subr.bf16.mxu1 %v7306_v55  ;;  %6254 = vmatprep.subr.bf16.mxu0 %v7306_v55 }
 0x2b5   :  { %v2354_v24 = vadd.f32 %v10153_v22, %v2311_v33  ;;  %6235 = vmatpush3.bf16.msra.mxu1 %v7200_v0  ;;  %v7201_v33 = vld [vmem:[%s10113_s7 + $0x30] sm:$0xff]   ;;  %6250 = vmatprep.mubr.msk.bf16.mxu1 %vm7307_vm0, %v7306_v55 }
 0x2b6   :  { %6236 = vmatprep.subr.bf16.mxu1 %v7306_v55 }
 0x2b9   :  { %6237 = vmatpush3.bf16.msra.mxu1 %v7201_v33 }
 0x2ba   :  { %6238 = vmatprep.subr.bf16.mxu1 %v7306_v55 }
 0x2be   :  { %v7231_v27 = vpop.eup %7230 }
 0x2c5   :  { %v4514_v11 = vpop.f32.mrf.mxu0 }
 0x2c6   :  { %v4515_v34 = vadd.f32 %v4514_v11, %v9825_v19  ;;  %v2309_v19 = vadd.f32 %v10147_v39, %v2266_v40 }
 0x2c7   :  { %v4516_v35 = vpop.f32.mrf.mxu0 }
 0x2c8   :  { %v4517_v14 = vadd.f32 %v4516_v35, %v10146_v16 }
 0x2c9   :  { %v4518_v32 = vpop.f32.mrf.mxu0 }
 0x2ca   :  { %v4519_v53 = vadd.f32 %v4518_v32, %v9839_v6  ;;  %v10152_v6 = vld [vmem:[#allocation8_spill] sm:$0xff] }
 0x2cb   :  { %v4520_v12 = vpop.f32.mrf.mxu0 }
 0x2cc   :  { %v4521_v42 = vadd.f32 %v4520_v12, %v9849_v13 }
 0x2e6   :  { %v4557_v61 = vpop.f32.mrf.mxu1 }
 0x2e7   :  { %v4558_v54 = vadd.f32 %v4557_v61, %v4515_v34  ;;  %v10151_v61 = vld [vmem:[#allocation12_spill] sm:$0xff] }
 0x2e8   :  { %v4559_v56 = vpop.f32.mrf.mxu1  ;;  %v3457_v30 = vadd.f32 %v10151_v61, %v3414_v44  ;;  %v7206_v61 = vld [vmem:[%s10113_s7 + $0x8] sm:$0xff]  }
 0x2e9   :  { %v4560_v7 = vadd.f32 %v4559_v56, %v4517_v14  ;;  %v2352_v56 = vadd.f32 %v10152_v6, %v2309_v19  ;;  %v6141_v6 = vld [vmem:[%s10112_s6] ss:$0 sm:$0xff] }
 0x2ea   :  { %v4561_v8 = vpop.f32.mrf.mxu1  ;;  %v3500_v46 = vadd.f32 %v9847_v18, %v3457_v30  ;;  %v7207_v30 = vld [vmem:[%s10113_s7] sm:$0xff]  }
 0x2eb   :  { %v4562_v45 = vadd.f32 %v4561_v8, %v4519_v53  ;;  %v3504_v28 = vadd.f32 %v3498_v52, %v2352_v56  ;;  %v4673_v8 = vrot.slane %v4664_v15, %v4672_v57  ;;  %v7202_v53 = vld [vmem:[%s10113_s7 + $0x28] sm:$0xff]   ;;  %v7205_v15 = vld [vmem:[%s10113_s7 + $0x10] sm:$0xff]  }
 0x2ec   :  { %v4563_v41 = vpop.f32.mrf.mxu1  ;;  %v3505_v40 = vadd.f32 %v3500_v46, %v2354_v24  ;;  %6239 = vmatpush3.bf16.msra.mxu1 %v7202_v53  ;;  %v7208_v24 = vld [vmem:[%s10115_s9 + $0x38] sm:$0xff]  }
 0x2ed   :  { %v4564_v5 = vadd.f32 %v4563_v41, %v4521_v42  ;;  %6240 = vmatprep.subr.bf16.mxu1 %v7306_v55 }
 0x305   :  { %v4600_v3 = vpop.f32.mrf.mxu0 }
 0x306   :  { %v4643_v11 = vpop.f32.mrf.mxu1  ;;  %v4601_v23 = vadd.f32 %v4600_v3, %v4558_v54 }
 0x307   :  { %v4602_v50 = vpop.f32.mrf.mxu0 }
 0x308   :  { %v4645_v35 = vpop.f32.mrf.mxu1  ;;  %v4644_v59 = vadd.f32 %v4643_v11, %v4601_v23  ;;  %v4603_v43 = vadd.f32 %v4602_v50, %v4560_v7  ;;  %v7203_v7 = vld [vmem:[%s10113_s7 + $0x20] sm:$0xff]   ;;  %v7204_v23 = vld [vmem:[%s10113_s7 + $0x18] sm:$0xff]  }
 0x309   :  { %v4604_v4 = vpop.f32.mrf.mxu0  ;;  %6241 = vmatpush3.bf16.msra.mxu1 %v7203_v7 }
 0x30a   :  { %v4647_v51 = vpop.f32.mrf.mxu1  ;;  %v4652_v2 = vadd.f32 %v4644_v59, %v3502_v60  ;;  %v4646_v32 = vadd.f32 %v4645_v35, %v4603_v43  ;;  %v4605_v29 = vadd.f32 %v4604_v4, %v4562_v45  ;;  %6242 = vmatprep.subr.bf16.mxu1 %v7306_v55 }
 0x30b   :  { %v4606_v13 = vpop.f32.mrf.mxu0 }
 0x30c   :  { %v4660_v21 = vmul.f32 %v7229_v48, %v4652_v2  ;;  %v4653_v62 = vadd.f32 %v4646_v32, %v3503_v49  ;;  %v4648_v20 = vadd.f32 %v4647_v51, %v4605_v29  ;;  %v4607_v36 = vadd.f32 %v4606_v13, %v4564_v5  ;;  %v4649_v34 = vpop.f32.mrf.mxu1  ;;  %v7210_v13 = vld [vmem:[%s10115_s9 + $0x28] sm:$0xff]  }
 0x30d   :  { %6243 = vmatpush3.bf16.msra.mxu1 %v7204_v23  ;;  %v7216_v23 = vld [vmem:[%s10117_s11 + $0x8] sm:$0xff]  }
 0x30e   :  { %v4661_v18 = vmul.f32 %v7229_v48, %v4653_v62  ;;  %v4654_v25 = vadd.f32 %v4648_v20, %v3504_v28  ;;  %v4650_v47 = vadd.f32 %v4649_v34, %v4607_v36  ;;  %v4676_v44 = vadd.f32 %v4669_v63, %v4660_v21  ;;  %6244 = vmatprep.subr.bf16.mxu1 %v7306_v55  ;;  %v7209_v28 = vld [vmem:[%s10115_s9 + $0x30] sm:$0xff]   ;;  %v7212_v21 = vld [vmem:[%s10115_s9 + $0x18] sm:$0xff]   ;;  %v7214_v20 = vld [vmem:[%s10115_s9 + $0x8] sm:$0xff]  }
 0x30f   :  { %v7213_v62 = vld [vmem:[%s10115_s9 + $0x10] sm:$0xff]   ;;  %v7215_v36 = vld [vmem:[%s10115_s9] sm:$0xff]  }
 0x310   :  { %v4662_v31 = vmul.f32 %v7231_v27, %v4654_v25  ;;  %v4655_v12 = vadd.f32 %v4650_v47, %v3505_v40  ;;  %v4677_v41 = vadd.f32 %v4673_v8, %v4661_v18  ;;  %v4680_v9 = vmax.f32 %v4676_v44, 0.0 }
 0x311   :  { %6245 = vmatpush3.bf16.msra.mxu1 %v7205_v15  ;;  %v7217_v15 = vld [vmem:[%s10118_s12 + $0x8] sm:$0xff]  }
 0x312   :  { %v4678_v38 = vadd.f32 %v4669_v63, %v4662_v31  ;;  %v4663_v1 = vmul.f32 %v7231_v27, %v4655_v12  ;;  %v4681_v10 = vmax.f32 %v4677_v41, 0.0  ;;  %v4684_v14 = vmul.f32 %v4680_v9, %v4680_v9  ;;  %6246 = vmatprep.subr.bf16.mxu1 %v7306_v55  ;;  %v6150_v31 = vld [vmem:[%s10114_s8] ss:$0 sm:$0xff] }
 0x314   :  { %v4682_v16 = vmax.f32 %v4678_v38, 0.0  ;;  %v4685_v54 = vmul.f32 %v4681_v10, %v4681_v10  ;;  %v4679_v39 = vadd.f32 %v4673_v8, %v4663_v1  ;;  %v7211_v8 = vld [vmem:[%s10115_s9 + $0x20] sm:$0xff]  }
 0x315   :  { %6247 = vmatpush3.bf16.msra.mxu1 %v7206_v61  ;;  %v7218_v61 = vld [vmem:[%s10117_s11] sm:$0xff]  }
 0x316   :  { %v4688_v19 = vadd.f32 %v4685_v54, %v4684_v14  ;;  %v4683_v26 = vmax.f32 %v4679_v39, 0.0  ;;  %v4686_v58 = vmul.f32 %v4682_v16, %v4682_v16  ;;  %v4698_v3 = vpack.c.bf16 %v4682_v16, %v4680_v9  ;;  %6248 = vmatprep.subr.bf16.mxu1 %v7306_v55 }
 0x318   :  { %4689 = vadd.xlane.f32.xlu0 %v4688_v19  ;;  %v4699_v17 = vpack.c.bf16 %v4683_v26, %v4681_v10  ;;  %v4687_v37 = vmul.f32 %v4683_v26, %v4683_v26  ;;  %v6151_v19 = vld [vmem:[%s10116_s10] ss:$0 sm:$0xff] }
 0x319   :  { %6249 = vmatpush3.bf16.msra.mxu1 %v7207_v30  ;;  %v7219_v30 = vld [vmem:[%s10118_s12] sm:$0xff]  }
 0x31a   :  { %4860 = vmatprep.mubr.bf16.mxu0 %v4699_v17  ;;  %v4691_v11 = vadd.f32 %v4687_v37, %v4686_v58  ;;  %6282 = vmatprep.subr.bf16.mxu1 %v7306_v55 }
 0x31b   :  { %4861 = vmatmul.mubr.bf16.vlgmr.msra.gmra.mxu0 %v4698_v3 }
 0x31c   :  { %4692 = vadd.xlane.f32.xlu1 %v4691_v11  ;;  %6270 = vmatprep.mubr.msk.bf16.mxu0 %vm7307_vm0, %v7306_v55 }
 0x31d   :  { %6255 = vmatpush3.bf16.msra.mxu0 %v7208_v24 }
 0x31e   :  { %6256 = vmatprep.subr.bf16.mxu0 %v7306_v55 }
 0x321   :  { %6257 = vmatpush3.bf16.msra.mxu0 %v7209_v28 }
 0x322   :  { %6258 = vmatprep.subr.bf16.mxu0 %v7306_v55 }
 0x325   :  { %6259 = vmatpush3.bf16.msra.mxu0 %v7210_v13 }
 0x326   :  { %6260 = vmatprep.subr.bf16.mxu0 %v7306_v55 }
 0x329   :  { %6261 = vmatpush3.bf16.msra.mxu0 %v7211_v8 }
 0x32a   :  { %6262 = vmatprep.subr.bf16.mxu0 %v7306_v55 }
 0x32d   :  { %6263 = vmatpush3.bf16.msra.mxu0 %v7212_v21 }
 0x32e   :  { %6264 = vmatprep.subr.bf16.mxu0 %v7306_v55 }
 0x331   :  { %6265 = vmatpush3.bf16.msra.mxu0 %v7213_v62 }
 0x332   :  { %6266 = vmatprep.subr.bf16.mxu0 %v7306_v55 }
 0x335   :  { %6267 = vmatpush3.bf16.msra.mxu0 %v7214_v20 }
 0x336   :  { %6268 = vmatprep.subr.bf16.mxu0 %v7306_v55 }
 0x339   :  { %6269 = vmatpush3.bf16.msra.mxu0 %v7215_v36 }
 0x33a   :  { %6274 = vmatprep.subr.bf16.mxu0 %v7306_v55 }
 0x3a1   :  { %v4690_v60 = vpop.xlane.xlu0 %4689 }
 0x3a2   :  { %v4694_v52 = vmax.f32 %v4690_v60, 1e-24  ;;  %v10005_v60 = vld [vmem:[%s10154_s19] sm:$0xff] }
 0x3a4   :  { %7232 = vrsqrt.f32 %v4694_v52  ;;  %v10010_v52 = vld [vmem:[%s10154_s19 + $0x8] sm:$0xff] }
 0x3a5   :  { %v4693_v50 = vpop.xlane.xlu1 %4692 }
 0x3a6   :  { %v4695_v35 = vmax.f32 %v4693_v50, 1e-24  ;;  %v5173_v50 = vpack.c.bf16 %v10010_v52, %v10005_v60 }
 0x3a8   :  { %7234 = vrsqrt.f32 %v4695_v35  ;;  %v10018_v35 = vld [vmem:[%s10155_s2] sm:$0xff] }
 0x3b1   :  { %v7233_v59 = vpop.eup %7232 }
 0x3b5   :  { %v7235_v51 = vpop.eup %7234 }
 0x3db   :  { %v6194_v57 = vpop.f32.mrf.mxu0 }
 0x3dd   :  { %v6195_v42 = vpop.f32.mrf.mxu0 }
 0x3de   :  { %v6196_v45 = vadd.f32 %v6195_v42, %v6194_v57  ;;  %v10023_v57 = vld [vmem:[%s10155_s2 + $0x8] sm:$0xff] }
 0x3df   :  { %v6197_v43 = vpop.f32.mrf.mxu0  ;;  %v5178_v42 = vpack.c.bf16 %v10023_v57, %v10018_v35 }
 0x3e0   :  { %v4869_v56 = vmul.f32 %v7233_v59, %v6196_v45  ;;  %v5141_v45 = vmul.f32 %v10005_v60, %v10005_v60 }
 0x3e1   :  { %v6198_v49 = vpop.f32.mrf.mxu0 }
 0x3e2   :  { %v6199_v46 = vadd.f32 %v6198_v49, %v6197_v43  ;;  %v4878_v4 = vadd.f32 %v6141_v6, %v4869_v56  ;;  %v5143_v59 = vsel %vm5126_vm1, %v5141_v45, 0.0  ;;  %v5142_v43 = vmul.f32 %v10010_v52, %v10010_v52  ;;  %v7220_v56 = vld [vmem:[%s10119_s13 + $0x8] sm:$0xff]  }
 0x3e4   :  { %v4870_v63 = vmul.f32 %v7235_v51, %v6199_v46  ;;  %v4880_v5 = vmax.f32 %v4878_v4, 0.0  ;;  %v5146_v49 = vsel %vm5126_vm1, %v5142_v43, 0.0  ;;  %v5150_v4 = vmul.f32 %v10023_v57, %v10023_v57  ;;  %v7221_v51 = vld [vmem:[%s10119_s13] sm:$0xff]  }
 0x3e6   :  { %v4882_v2 = vmul.f32 %v4880_v5, %v4880_v5  ;;  %v4879_v32 = vadd.f32 %v6141_v6, %v4870_v63  ;;  %v5149_v6 = vmul.f32 %v10018_v35, %v10018_v35  ;;  %v5154_v63 = vsel %vm5126_vm1, %v5150_v4, 0.0 }
 0x3e8   :  { %4884 = vadd.xlane.f32.xlu0 %v4882_v2  ;;  %v4881_v29 = vmax.f32 %v4879_v32, 0.0  ;;  %v5151_v46 = vsel %vm5126_vm1, %v5149_v6, 0.0 }
 0x3ea   :  { %v4883_v48 = vmul.f32 %v4881_v29, %v4881_v29  ;;  %v4892_v22 = vpack.c.bf16 %v4881_v29, %v4880_v5 }
 0x3ec   :  { %4886 = vadd.xlane.f32.xlu1 %v4883_v48  ;;  %6251 = vmatmul.mubr.bf16.vlgmr.msra.gmra.mxu1 %v4892_v22 }
 0x3ed   :  { %6286 = vmatprep.mubr.msk.bf16.mxu1 %vm7307_vm0, %v7306_v55  ;;  %6283 = vmatpush3.bf16.msra.mxu1 %v7216_v23 }
 0x3ee   :  { %6284 = vmatprep.subr.bf16.mxu1 %v7306_v55 }
 0x3f1   :  { %6285 = vmatpush3.bf16.msra.mxu1 %v7218_v61 }
 0x3f2   :  { %6290 = vmatprep.subr.bf16.mxu1 %v7306_v55 }
 0x3f4   :  { %6287 = vmatmul.mubr.msk.bf16.vlgmr.msra.gmra.mxu1 %vm5126_vm1, %v5173_v50 }
 0x3f5   :  { %6294 = vmatprep.mubr.msk.bf16.mxu1 %vm7307_vm0, %v7306_v55  ;;  %6291 = vmatpush3.bf16.msra.mxu1 %v7220_v56 }
 0x3f6   :  { %6292 = vmatprep.subr.bf16.mxu1 %v7306_v55 }
 0x3f9   :  { %6293 = vmatpush3.bf16.msra.mxu1 %v7221_v51 }
 0x3fa   :  { %6298 = vmatprep.subr.bf16.mxu1 %v7306_v55 }
 0x471   :  { %v4885_v40 = vpop.xlane.xlu0 %4884 }
 0x472   :  { %v4888_v34 = vmax.f32 %v4885_v40, 1e-24 }
 0x474   :  { %7236 = vrsqrt.f32 %v4888_v34 }
 0x475   :  { %v4887_v18 = vpop.xlane.xlu1 %4886 }
 0x476   :  { %v4889_v25 = vmax.f32 %v4887_v18, 1e-24 }
 0x478   :  { %7238 = vrsqrt.f32 %v4889_v25 }
 0x481   :  { %v7237_v47 = vpop.eup %7236 }
 0x485   :  { %v7239_v41 = vpop.eup %7238 }
 0x4ac   :  { %v4991_v44 = vpop.f32.mrf.mxu1 }
 0x4ad   :  { %v4998_v27 = vmul.f32 %v7237_v47, %v4991_v44 }
 0x4ae   :  { %v6252_v12 = vpop.f32.mrf.mxu1 }
 0x4af   :  { %v5007_v38 = vadd.f32 %v6150_v31, %v4998_v27 }
 0x4b0   :  { %v4994_v9 = vpop.f32.mrf.mxu1 }
 0x4b1   :  { %v4999_v1 = vmul.f32 %v7239_v41, %v4994_v9  ;;  %v5009_v14 = vmax.f32 %v5007_v38, 0.0  ;;  %v7222_v41 = vld [vmem:[%s10121_s15 + $0x28] sm:$0xff]   ;;  %v7223_v9 = vld [vmem:[%s10121_s15 + $0x20] sm:$0xff]   ;;  %v7224_v38 = vld [vmem:[%s10121_s15 + $0x18] sm:$0xff]  }
 0x4b2   :  { %v6253_v10 = vpop.f32.mrf.mxu1 }
 0x4b3   :  { %v5008_v16 = vadd.f32 %v6150_v31, %v4999_v1  ;;  %v7225_v1 = vld [vmem:[%s10121_s15 + $0x10] sm:$0xff]   ;;  %v7226_v10 = vld [vmem:[%s10121_s15 + $0x8] sm:$0xff]  }
 0x4b4   :  { %v5288_v36 = vpop.f32.mrf.mxu1 }
 0x4b5   :  { %v5010_v54 = vmax.f32 %v5008_v16, 0.0  ;;  %v7227_v16 = vld [vmem:[%s10121_s15] sm:$0xff]  }
 0x4b6   :  { %v6288_v34 = vpop.f32.mrf.mxu1 }
 0x4b7   :  { %v5011_v39 = vpack.c.bf16 %v5010_v54, %v5009_v14 }
 0x4b8   :  { %v5291_v47 = vpop.f32.mrf.mxu1 }
 0x4b9   :  { %6271 = vmatmul.mubr.bf16.vlgmr.msra.gmra.mxu0 %v5011_v39 }
 0x4ba   :  { %6278 = vmatprep.mubr.msk.bf16.mxu0 %vm7307_vm0, %v7306_v55  ;;  %6275 = vmatpush3.bf16.msra.mxu0 %v7217_v15  ;;  %v6289_v27 = vpop.f32.mrf.mxu1 }
 0x4bb   :  { %6276 = vmatprep.subr.bf16.mxu0 %v7306_v55 }
 0x4be   :  { %6277 = vmatpush3.bf16.msra.mxu0 %v7219_v30 }
 0x4c1   :  { %6279 = vmatmul.mubr.msk.bf16.vlgmr.msra.gmra.mxu0 %vm5126_vm1, %v5178_v42 }
 0x579   :  { %v5117_v26 = vpop.f32.mrf.mxu0 }
 0x57a   :  { %v5118_v17 = vadd.f32 %v6151_v19, %v5117_v26 }
 0x57b   :  { %v6272_v58 = vpop.f32.mrf.mxu0 }
 0x57c   :  { %v5124_v37 = vmul.f32 %v5118_v17, %v5118_v17 }
 0x57d   :  { %v5120_v3 = vpop.f32.mrf.mxu0 }
 0x57e   :  { %v5121_v11 = vadd.f32 %v6151_v19, %v5120_v3  ;;  %v5127_v0 = vsel %vm5126_vm1, %v5124_v37, 0.0 }
 0x57f   :  { %5128 = vadd.xlane.f32.xlu0 %v5127_v0  ;;  %v6273_v33 = vpop.f32.mrf.mxu0 }
 0x580   :  { %v5125_v53 = vmul.f32 %v5121_v11, %v5121_v11 }
 0x581   :  { %v5232_v40 = vpop.f32.mrf.mxu0 }
 0x582   :  { %v5130_v7 = vsel %vm5126_vm1, %v5125_v53, 0.0  ;;  %v5289_v18 = vadd.f32 %v5288_v36, %v5232_v40 }
 0x583   :  { %5131 = vadd.xlane.f32.xlu1 %v5130_v7  ;;  %5144 = vadd.xlane.f32.xlu0 %v5143_v59  ;;  %v6280_v25 = vpop.f32.mrf.mxu0 }
 0x585   :  { %v5235_v44 = vpop.f32.mrf.mxu0 }
 0x586   :  { %v5292_v31 = vadd.f32 %v5291_v47, %v5235_v44 }
 0x587   :  { %5147 = vadd.xlane.f32.xlu1 %v5146_v49  ;;  %5152 = vadd.xlane.f32.xlu0 %v5151_v46  ;;  %v6281_v12 = vpop.f32.mrf.mxu0 }
 0x58b   :  { %5155 = vadd.xlane.f32.xlu1 %v5154_v63 }
 0x608   :  { %v5129_v5 = vpop.xlane.xlu0 %5128 }
 0x609   :  { %v5133_v2 = vmax.f32 %v5129_v5, 1e-24 }
 0x60b   :  { %7240 = vrsqrt.f32 %v5133_v2 }
 0x60c   :  { %v5132_v32 = vpop.xlane.xlu1 %5131  ;;  %v5145_v14 = vpop.xlane.xlu0 %5144 }
 0x60d   :  { %v5134_v29 = vmax.f32 %v5132_v32, 1e-24 }
 0x60f   :  { %7242 = vrsqrt.f32 %v5134_v29 }
 0x610   :  { %v5148_v54 = vpop.xlane.xlu1 %5147  ;;  %v5153_v39 = vpop.xlane.xlu0 %5152 }
 0x611   :  { %v5157_v26 = vadd.f32 %v5153_v39, %v5145_v14 }
 0x614   :  { %v5156_v19 = vpop.xlane.xlu1 %5155 }
 0x615   :  { %v5158_v58 = vadd.f32 %v5156_v19, %v5148_v54 }
 0x618   :  { %v7241_v48 = vpop.eup %7240 }
 0x619   :  { %v5137_v22 = vmul.f32 %v7241_v48, %v5118_v17 }
 0x61b   :  { %v5159_v24 = vmul.f32 %v5137_v22, %v5137_v22  ;;  %5139 = vst.msk [vmem:[#allocation2] sm:$0xff] %vm5126_vm1, %v5137_v22 }
 0x61c   :  { %v7243_v28 = vpop.eup %7242 }
 0x61d   :  { %v5138_v13 = vmul.f32 %v7243_v28, %v5121_v11  ;;  %v5161_v8 = vsel %vm5126_vm1, %v5159_v24, 0.0  ;;  %v6177_v28 = vld [vmem:[%s10122_s16] ss:$0 sm:$0xff]  ;;  %s7308_s16 = smov [#allocation2]  }
 0x61e   :  { %5162 = vadd.xlane.f32.xlu0 %v5161_v8  ;;  %s5534_s19 = sshll.u32 %s7308_s16, 4  ;;  %s5535_s19 = int_to_ptr.vmem [resolvable:$true] %s5534_s19 }
 0x61f   :  { %5140 = vst.msk [vmem:[#allocation2 + $0x8] sm:$0xff] %vm5126_vm1, %v5138_v13  ;;  %v5295_v21 = vpack.c.bf16 %v5138_v13, %v5137_v22  ;;  %v5160_v62 = vmul.f32 %v5138_v13, %v5138_v13  ;;  %s7283_s1 = scalar_lea.vmem %s5535_s19, 256  ;;  %p7288_p1 = scmp.lt.s32.totalorder %s5535_s19, %s5535_s19 }
 0x620   :  { %p7284_p0 = scmp.ne.s32.totalorder %s5535_s19, %s7283_s1  ;;  %p7289_p2 = scmp.lt.s32.totalorder %s7283_s1, %s7283_s1 }
 0x621   :  { %6295 = vmatmul.mubr.msk.bf16.vlgmr.msra.gmra.mxu1 %vm5126_vm1, %v5295_v21  ;;  %v5164_v20 = vsel %vm5126_vm1, %v5160_v62, 0.0 }
 0x622   :  { %5165 = vadd.xlane.f32.xlu1 %v5164_v20  ;;  %6310 = vmatprep.mubr.msk.bf16.mxu1 %vm7307_vm0, %v7306_v55  ;;  %p7290_p3 = por %p7289_p2, %p7288_p1 }
 0x623   :  { %6299 = vmatpush3.bf16.msra.mxu1 %v7222_v41 }
 0x624   :  { %6300 = vmatprep.subr.bf16.mxu1 %v7306_v55  ;;  %p7291_p4 = pnand %p7290_p3, %p7284_p0 }
 0x627   :  { %6301 = vmatpush3.bf16.msra.mxu1 %v7223_v9 }
 0x628   :  { %6302 = vmatprep.subr.bf16.mxu1 %v7306_v55 }
 0x62b   :  { %6303 = vmatpush3.bf16.msra.mxu1 %v7224_v38 }
 0x62c   :  { %6304 = vmatprep.subr.bf16.mxu1 %v7306_v55 }
 0x62f   :  { %6305 = vmatpush3.bf16.msra.mxu1 %v7225_v1 }
 0x630   :  { %6306 = vmatprep.subr.bf16.mxu1 %v7306_v55 }
 0x633   :  { %6307 = vmatpush3.bf16.msra.mxu1 %v7226_v10 }
 0x634   :  { %6308 = vmatprep.subr.bf16.mxu1 %v7306_v55  ;;  %v6169_v55 = vld [vmem:[%s10120_s14] ss:$0 sm:$0xff] }
 0x637   :  { %6309 = vmatpush3.bf16.msra.mxu1 %v7227_v16 }
 0x6a7   :  { %v5163_v17 = vpop.xlane.xlu0 %5162 }
 0x6a8   :  { %v5167_v37 = vadd.f32 %v5163_v17, %v5157_v26  ;;  %v5514_v26 = vsub.f32 %v10005_v60, %v10018_v35 }
 0x6aa   :  { %v5169_v11 = vmax.f32 %v5167_v37, 1e-24 }
 0x6ab   :  { %v5166_v3 = vpop.xlane.xlu1 %5165 }
 0x6ac   :  { %v5168_v0 = vadd.f32 %v5166_v3, %v5158_v58  ;;  %7244 = vrsqrt.f32 %v5169_v11  ;;  %v5515_v11 = vsub.f32 %v10010_v52, %v10023_v57 }
 0x6ae   :  { %v5170_v33 = vmax.f32 %v5168_v0, 1e-24 }
 0x6b0   :  { %7246 = vrsqrt.f32 %v5170_v33 }
 0x6b9   :  { %v7245_v23 = vpop.eup %7244 }
 0x6bd   :  { %v7247_v45 = vpop.eup %7246 }
 0x6e1   :  { %v5349_v53 = vpop.f32.mrf.mxu1 }
 0x6e2   :  { %v5356_v7 = vadd.f32 %v5349_v53, %v5289_v18 }
 0x6e3   :  { %v6296_v15 = vpop.f32.mrf.mxu1 }
 0x6e4   :  { %v5358_v61 = vmul.f32 %v7245_v23, %v5356_v7 }
 0x6e5   :  { %v5352_v30 = vpop.f32.mrf.mxu1 }
 0x6e6   :  { %v5367_v50 = vadd.f32 %v6169_v55, %v5358_v61  ;;  %v5357_v42 = vadd.f32 %v5352_v30, %v5292_v31 }
 0x6e7   :  { %v6297_v59 = vpop.f32.mrf.mxu1 }
 0x6e8   :  { %7248 = vtanh.f32 %v5367_v50  ;;  %v5359_v43 = vmul.f32 %v7247_v45, %v5357_v42 }
 0x6ea   :  { %v5368_v6 = vadd.f32 %v6169_v55, %v5359_v43 }
 0x6ec   :  { %7250 = vtanh.f32 %v5368_v6 }
 0x6f5   :  { %v7249_v56 = vpop.eup %7248 }
 0x6f6   :  { %v5371_v49 = vmul.f32 %v7249_v56, %v7249_v56 }
 0x6f8   :  { %v5374_v46 = vsel %vm5373_vm2, %v5371_v49, 0.0 }
 0x6f9   :  { %v7251_v4 = vpop.eup %7250  ;;  %5375 = vadd.xlane.f32.xlu0 %v5374_v46 }
 0x6fa   :  { %v5384_v51 = vpack.c.bf16 %v7251_v4, %v7249_v56  ;;  %v5372_v63 = vmul.f32 %v7251_v4, %v7251_v4 }
 0x6fc   :  { %6311 = vmatmul.mubr.msk.bf16.vlgmr.msra.gmra.mxu1 %vm5373_vm2, %v5384_v51  ;;  %v5377_v5 = vsel %vm5373_vm2, %v5372_v63, 0.0 }
 0x6fd   :  { %5378 = vadd.xlane.f32.xlu1 %v5377_v5 }
 0x782   :  { %v5376_v2 = vpop.xlane.xlu0 %5375 }
 0x783   :  { %v5380_v32 = vmax.f32 %v5376_v2, 1e-24 }
 0x785   :  { %7252 = vrsqrt.f32 %v5380_v32 }
 0x786   :  { %v5379_v29 = vpop.xlane.xlu1 %5378 }
 0x787   :  { %v5381_v48 = vmax.f32 %v5379_v29, 1e-24 }
 0x789   :  { %7254 = vrsqrt.f32 %v5381_v48 }
 0x792   :  { %v7253_v22 = vpop.eup %7252 }
 0x796   :  { %v7255_v62 = vpop.eup %7254 }
 0x7bc   :  { %v5470_v24 = vpop.f32.mrf.mxu1 }
 0x7bd   :  { %v5477_v13 = vmul.f32 %v7253_v22, %v5470_v24 }
 0x7be   :  { %v6312_v8 = vpop.f32.mrf.mxu1 }
 0x7bf   :  { %v5486_v21 = vadd.f32 %v6177_v28, %v5477_v13 }
 0x7c0   :  { %v5473_v20 = vpop.f32.mrf.mxu1 }
 0x7c1   :  { %v5478_v36 = vmul.f32 %v7255_v62, %v5473_v20  ;;  %v5488_v40 = vmax.f32 %v5486_v21, 0.0 }
 0x7c2   :  { %v6313_v34 = vpop.f32.mrf.mxu1 }
 0x7c3   :  { %v5487_v18 = vadd.f32 %v6177_v28, %v5478_v36  ;;  %v5490_v25 = vsel %vm5126_vm1, %v5488_v40, -inf }
 0x7c4   :  { %5491 = vmax.xlane.f32.xlu0 %v5490_v25 }
 0x7c5   :  { %v5489_v47 = vmax.f32 %v5487_v18, 0.0 }
 0x7c7   :  { %v5493_v44 = vsel %vm5126_vm1, %v5489_v47, -inf }
 0x7c8   :  { %5494 = vmax.xlane.f32.xlu1 %v5493_v44 }
 0x84d   :  { %v5492_v27 = vpop.xlane.xlu0 %5491 }
 0x84e   :  { %v5496_v31 = vsub.f32 %v5488_v40, %v5492_v27 }
 0x850   :  { %v5498_v12 = vmul.f32 1.442695, %v5496_v31 }
 0x851   :  { %v5495_v41 = vpop.xlane.xlu1 %5494 }
 0x852   :  { %7256 = vpow2.f32 %v5498_v12  ;;  %v5497_v9 = vsub.f32 %v5489_v47, %v5495_v41 }
 0x854   :  { %v5500_v38 = vmul.f32 1.442695, %v5497_v9 }
 0x856   :  { %7258 = vpow2.f32 %v5500_v38 }
 0x85f   :  { %v7257_v1 = vpop.eup %7256 }
 0x860   :  { %v5504_v10 = vsel %vm5126_vm1, %v7257_v1, 0.0  ;;  %v5502_v19 = vmul.f32 32.0, %v7257_v1 }
 0x861   :  { %5505 = vadd.xlane.f32.xlu0 %v5504_v10 }
 0x863   :  { %v7259_v16 = vpop.eup %7258 }
 0x864   :  { %v5507_v14 = vsel %vm5126_vm1, %v7259_v16, 0.0  ;;  %v5503_v3 = vmul.f32 32.0, %v7259_v16 }
 0x865   :  { %5508 = vadd.xlane.f32.xlu1 %v5507_v14 }
 0x8ea   :  { %v5506_v54 = vpop.xlane.xlu0 %5505 }
 0x8eb   :  { %7260 = vrcp.f32 %v5506_v54 }
 0x8ee   :  { %v5509_v39 = vpop.xlane.xlu1 %5508 }
 0x8ef   :  { %7262 = vrcp.f32 %v5509_v39 }
 0x8f8   :  { %v7261_v17 = vpop.eup %7260 }
 0x8f9   :  { %v5512_v58 = vmul.f32 %v7261_v17, %v5502_v19 }
 0x8fb   :  { %v5516_v37 = vmul.f32 %v5514_v26, %v5512_v58 }
 0x8fc   :  { %v7263_v0 = vpop.eup %7262 }
 0x8fd   :  { %v5518_v33 = vmul.f32 %v5516_v37, %v5516_v37  ;;  %v5513_v53 = vmul.f32 %v7263_v0, %v5503_v3 }
 0x8ff   :  { %v5520_v7 = vsel %vm5126_vm1, %v5518_v33, 0.0  ;;  %v5517_v23 = vmul.f32 %v5515_v11, %v5513_v53 }
 0x900   :  { %5521 = vadd.xlane.f32.xlu0 %v5520_v7 }
 0x901   :  { %v5519_v55 = vmul.f32 %v5517_v23, %v5517_v23 }
 0x903   :  { %v5523_v15 = vsel %vm5126_vm1, %v5519_v55, 0.0 }
 0x904   :  { %5524 = vadd.xlane.f32.xlu1 %v5523_v15 }
 0x905   :  { %7294 = shalt.err (!%p7291_p4)
}
 0x906   :  { %s7309_s20 = smov 128   ;;  %s7310_s11 = smov 8   ;;  %vm5526_vm3 = vcmask 7168  }
 0x907   :  { %5540 = dma.vmem_to_hbm [thread:$0]  %s5535_s19, 256, %s10123_s17, [#allocation3], %s7309_s20, %s7309_s20, %s7310_s11  }
 0x989   :  { %v5522_v60 = vpop.xlane.xlu0 %5521 }
 0x98a   :  { %5527 = vst.msk [vmem:[%s10124_s18] sm:$0xff] %vm5526_vm3, %v5522_v60 }
 0x98d   :  { %v5525_v52 = vpop.xlane.xlu1 %5524 }
 0x98e   :  { %5528 = vst.msk [vmem:[%s10124_s18 + $0x8] sm:$0xff] %vm5526_vm3, %v5525_v52 }
 0x98f   :  { %7303 = dma.done.wait [#allocation3], 256  }
 0x990   :  { %7304 = vsyncadd [#allocation3], 4294967040 }
 0x991   :  { %5548 = vsyncpa [#allocation3], 1 }

</bundles_post_ra>
